<compile_context>
chip_gen: v6e
topology: v6e:2x2x1
jax: 0.10.0
libtpu: 0.0.40
codegen_flags: <defaults>
</compile_context>

<pallas_src>
import functools

import jax
import jax.numpy as jnp
from jax import lax
from jax.experimental import pallas as pl
from jax.experimental.pallas import tpu as pltpu


def _round_up(v, m):
    return -(-v // m) * m


def _vmem_capacity_bytes():
    """Per-TensorCore VMEM capacity; conservative fallback if unavailable."""
    try:
        return int(pltpu.get_tpu_info().vmem_capacity_bytes)
    except Exception:
        return 64 * 1024 * 1024          # v7x per-core VMEM (smallest generation)


def _pick_tiles(C, HW, itemsize):
    """Channel (sublane) and spatial (lane) tile sizes for the reduction kernel.

    Budgets the *padded* VMEM footprint (sublanes padded to 8/16/32 by dtype,
    lanes padded to 128) plus double buffering.  ~8 MiB per input buffer keeps
    the DMA pipeline near HBM roofline while fitting every generation once
    vmem_limit_bytes is raised (v5e 16 MiB scoped default, v7x 64 MiB VMEM).
    """
    row_mult = 8 * max(1, 4 // itemsize)          # f32: 8, bf16: 16, int8: 32
    budget = min(8 * 1024 * 1024, _vmem_capacity_bytes() // 8)

    # Lane (spatial) tile: full H*W unless it is 128-aligned, in which case it
    # may be split -> extra "parallel" grid axis (v7x megacore) and bounded
    # VMEM for large feature maps.
    if HW % 128 == 0:
        lane_tile = min(HW, 4096)
    else:
        lane_tile = HW                             # full dim (BlockSpec legality)

    bytes_per_row = _round_up(lane_tile, 128) * itemsize
    tc = max(1, budget // bytes_per_row)
    if C <= row_mult:
        tc = C                                     # full dim (BlockSpec legality)
    else:
        tc = max(row_mult, (min(tc, C) // row_mult) * row_mult)
    return tc, lane_tile


def _reduce_kernel(x_ref, o_ref, *, C, TC):
    """Accumulate channel sum (row 0) and channel max (row 1) of one lane tile."""
    c = pl.program_id(2)

    xf = x_ref[...].astype(jnp.float32)            # (TC, LT), lane-dense
    if C % TC != 0:
        # Ragged last channel tile: out-of-bounds rows must contribute 0 to the
        # sum and -inf to the max.
        ch = c * TC + lax.broadcasted_iota(jnp.int32, xf.shape, 0)
        valid = ch < C
        x_sum = jnp.where(valid, xf, 0.0)
        x_max = jnp.where(valid, xf, -jnp.inf)
    else:
        x_sum = xf
        x_max = xf

    part_sum = jnp.sum(x_sum, axis=0, keepdims=True)   # (1, LT)
    part_max = jnp.max(x_max, axis=0, keepdims=True)   # (1, LT)

    @pl.when(c == 0)
    def _():
        o_ref[0:1, :] = part_sum
        o_ref[1:2, :] = part_max

    @pl.when(c > 0)
    def _():
        o_ref[0:1, :] = o_ref[0:1, :] + part_sum
        o_ref[1:2, :] = jnp.maximum(o_ref[1:2, :], part_max)


def _conv_kernel(w_ref, m_ref, o_ref, *, H, W, K):
    """KxK conv over the zero-padded [sum, max] maps followed by sigmoid."""
    maps = m_ref[...]                              # (2, Hp, Wp) f32
    sum_p = maps[0]                                # avg path (1/C folded into w)
    max_p = maps[1]

    # Two independent accumulator chains (avg / max) -> no single serialized
    # 2*K*K-term VALU dependency chain.
    acc_a = jnp.zeros((H, W), jnp.float32)
    acc_m = jnp.zeros((H, W), jnp.float32)
    for kw in range(K):                            # hoisted lane-axis shifts
        a_kw = sum_p[:, kw:kw + W]
        m_kw = max_p[:, kw:kw + W]
        for kh in range(K):                        # cheap sublane-axis shifts
            wa = w_ref[kh * K + kw]                # avg weight (already * 1/C)
            wm = w_ref[K * K + kh * K + kw]        # max weight
            acc_a = acc_a + wa * a_kw[kh:kh + H, :]
            acc_m = acc_m + wm * m_kw[kh:kh + H, :]

    o_ref[...] = jax.nn.sigmoid(acc_a + acc_m).astype(o_ref.dtype)


@functools.partial(
    jax.jit, static_argnames=("kernel_size", "channel_tile", "lane_tile"))
def spatial_attention(x, conv_weight, kernel_size=7, channel_tile=None,
                      lane_tile=None):
    """x: (N, C, H, W) f32/bf16; conv_weight: (1, 2, K, K). Returns (N, 1, H, W) f32."""
    N, C, H, W = x.shape
    K = kernel_size
    assert K in (3, 7), "kernel size must be 3 or 7"
    pad = 3 if K == 7 else 1
    HW = H * W
    Hp, Wp = H + 2 * pad, W + 2 * pad

    tc_auto, lt_auto = _pick_tiles(C, HW, x.dtype.itemsize)
    TC = channel_tile if channel_tile is not None else tc_auto
    LT = lane_tile if lane_tile is not None else lt_auto
    assert LT == HW or LT % 128 == 0, "lane_tile must be 128-aligned or H*W"

    n_c = pl.cdiv(C, TC)
    n_hw = pl.cdiv(HW, LT)

    # Padded-footprint accounting for the VMEM limit (double-buffered in + out).
    row_mult = 8 * max(1, 4 // x.dtype.itemsize)
    in_buf = _round_up(TC, row_mult) * _round_up(LT, 128) * x.dtype.itemsize
    out_buf = 8 * _round_up(LT, 128) * 4
    vmem_limit = int(min(_vmem_capacity_bytes(),
                         max(32 * 1024 * 1024,
                             2 * (in_buf + out_buf) + (4 << 20))))

    # ---- Kernel 1: lane-dense channel reduction over x viewed as (N, C, H*W).
    x_flat = x.reshape(N, C, HW)
    maps_flat = pl.pallas_call(
        functools.partial(_reduce_kernel, C=C, TC=TC),
        out_shape=jax.ShapeDtypeStruct((N, 2, HW), jnp.float32),
        grid_spec=pltpu.PrefetchScalarGridSpec(
            num_scalar_prefetch=0,
            grid=(N, n_hw, n_c),
            in_specs=[pl.BlockSpec((None, TC, LT), lambda b, hw, c: (b, c, hw))],
            out_specs=pl.BlockSpec((None, 2, LT), lambda b, hw, c: (b, 0, hw)),
        ),
        compiler_params=pltpu.CompilerParams(
            dimension_semantics=("parallel", "parallel", "arbitrary"),
            vmem_limit_bytes=vmem_limit),
    )(x_flat)

    # ---- Kernel 2: tiny per-batch conv + sigmoid on the two reduced maps.
    maps = maps_flat.reshape(N, 2, H, W)
    maps_padded = jnp.pad(maps, ((0, 0), (0, 0), (pad, pad), (pad, pad)))

    # Fold the 1/C mean scaling into the avg-path conv weights (uses the true C).
    w = conv_weight.astype(jnp.float32).reshape(2, K * K)
    w_flat = jnp.concatenate([w[0] * (1.0 / C), w[1]])        # (2*K*K,)

    out = pl.pallas_call(
        functools.partial(_conv_kernel, H=H, W=W, K=K),
        out_shape=jax.ShapeDtypeStruct((N, 1, H, W), jnp.float32),
        grid_spec=pltpu.PrefetchScalarGridSpec(
            num_scalar_prefetch=1,                 # w_flat lands in SMEM
            grid=(N,),
            in_specs=[pl.BlockSpec((None, 2, Hp, Wp),
                                   lambda b, w_r: (b, 0, 0, 0))],
            out_specs=pl.BlockSpec((None, None, H, W),
                                   lambda b, w_r: (b, 0, 0, 0)),
        ),
        compiler_params=pltpu.CompilerParams(
            dimension_semantics=("parallel",)),
    )(w_flat, maps_padded)
    return out


def _reference(x, conv_weight, kernel_size=7):
    pad = 3 if kernel_size == 7 else 1
    avg = jnp.mean(x, axis=1, keepdims=True)
    mx = jnp.max(x, axis=1, keepdims=True)
    cat = jnp.concatenate([avg, mx], axis=1)
    y = lax.conv_general_dilated(
        cat, conv_weight, window_strides=(1, 1),
        padding=((pad, pad), (pad, pad)),
        dimension_numbers=("NCHW", "OIHW", "NCHW"),
        precision=lax.Precision.HIGHEST)
    return jax.nn.sigmoid(y)


if __name__ == "__main__":
    key = jax.random.PRNGKey(0)
    kx, kw_key = jax.random.split(key)

    N, C, H, W = 2, 20, 16, 16
    K = 7
    x = jax.random.normal(kx, (N, C, H, W), dtype=jnp.float32)
    # Deterministic synthetic conv weight; shape matches nn.Conv2d(2, 1, 7, bias=False).
    conv_weight = 0.1 * jax.random.normal(kw_key, (1, 2, K, K), dtype=jnp.float32)

    ref = _reference(x, conv_weight, kernel_size=K)

    # Explicit small tiles: channel_tile=8 with C=20 exercises the multi-step
    # accumulator AND the ragged-last-tile mask; lane_tile=128 exercises the
    # spatial "parallel" grid axis.
    out = spatial_attention(x, conv_weight, kernel_size=K,
                            channel_tile=8, lane_tile=128)
    out = jax.block_until_ready(out)
    assert out.shape == (N, 1, H, W)
    assert jnp.allclose(out, ref, atol=2e-5, rtol=2e-5), "mismatch (explicit tiles)"

    # Default (auto-picked) tiles.
    out2 = spatial_attention(x, conv_weight, kernel_size=K)
    out2 = jax.block_until_ready(out2)
    assert jnp.allclose(out2, ref, atol=2e-5, rtol=2e-5), "mismatch (auto tiles)"

    print("KERNEL_OK")
</pallas_src>

<mosaic_0001>
module attributes {stable_mosaic.version = 11 : i64} {
  func.func @_reduce_kernel(%arg0: i32, %arg1: i32, %arg2: i32, %arg3: memref<1x8x128xf32, #tpu.memory_space<vmem>>, %arg4: memref<1x2x128xf32, #tpu.memory_space<vmem>>) attributes {dimension_semantics = [#tpu.dimension_semantics<parallel>, #tpu.dimension_semantics<parallel>, #tpu.dimension_semantics<arbitrary>], iteration_bounds = array<i64: 2, 2, 3>, scalar_prefetch = 0 : i64, scratch_operands = 0 : i64, tpu.core_type = #tpu.core_type<tc>, window_params = [{transform_indices = @transform_0, window_bounds = array<i64: 1, 8, 128>}, {transform_indices = @transform_1, window_bounds = array<i64: 1, 2, 128>}]} {
    %c0 = arith.constant 0 : index
    %c0_0 = arith.constant 0 : index
    %c0_1 = arith.constant 0 : index
    %0 = vector.load %arg3[%c0, %c0_0, %c0_1] : memref<1x8x128xf32, #tpu.memory_space<vmem>>, vector<1x8x128xf32>
    %1 = vector.shape_cast %0 : vector<1x8x128xf32> to vector<8x128xf32>
    %c8_i32 = arith.constant 8 : i32
    %2 = arith.muli %arg2, %c8_i32 : i32
    %3 = tpu.iota {dimensions = array<i32: 0>} : vector<8x128xi32>
    %4 = vector.broadcast %2 : i32 to vector<8x128xi32>
    %5 = arith.addi %4, %3 : vector<8x128xi32>
    %c20_i32 = arith.constant 20 : i32
    %6 = vector.broadcast %c20_i32 : i32 to vector<8x128xi32>
    %7 = arith.cmpi slt, %5, %6 : vector<8x128xi32>
    %cst = arith.constant 0.000000e+00 : f32
    %8 = vector.broadcast %cst : f32 to vector<8x128xf32>
    %9 = arith.select %7, %1, %8 : vector<8x128xi1>, vector<8x128xf32>
    %cst_2 = arith.constant 0xFF800000 : f32
    %10 = vector.broadcast %cst_2 : f32 to vector<8x128xf32>
    %11 = arith.select %7, %1, %10 : vector<8x128xi1>, vector<8x128xf32>
    %cst_3 = arith.constant dense<0.000000e+00> : vector<128xf32>
    %12 = vector.multi_reduction <add>, %9, %cst_3 [0] : vector<8x128xf32> to vector<128xf32>
    %13 = vector.shape_cast %12 : vector<128xf32> to vector<1x128xf32>
    %cst_4 = arith.constant dense<0xFF800000> : vector<128xf32>
    %14 = vector.multi_reduction <maximumf>, %11, %cst_4 [0] : vector<8x128xf32> to vector<128xf32>
    %15 = vector.shape_cast %14 : vector<128xf32> to vector<1x128xf32>
    %c0_i32 = arith.constant 0 : i32
    %16 = arith.cmpi eq, %arg2, %c0_i32 : i32
    %17 = arith.extui %16 : i1 to i32
    %c0_i32_5 = arith.constant 0 : i32
    %18 = arith.cmpi ne, %17, %c0_i32_5 : i32
    scf.if %18 {
      %c0_8 = arith.constant 0 : index
      %c0_9 = arith.constant 0 : index
      %c0_10 = arith.constant 0 : index
      %22 = vector.load %arg4[%c0_8, %c0_9, %c0_10] : memref<1x2x128xf32, #tpu.memory_space<vmem>>, vector<1x1x128xf32>
      %23 = vector.shape_cast %22 : vector<1x1x128xf32> to vector<1x128xf32>
      %24 = vector.shape_cast %13 : vector<1x128xf32> to vector<1x1x128xf32>
      tpu.vector_store %arg4[%c0_8, %c0_9, %c0_10], %24 {strides = array<i32>} : memref<1x2x128xf32, #tpu.memory_space<vmem>>, vector<1x1x128xf32>,
      %c0_11 = arith.constant 0 : index
      %c1 = arith.constant 1 : index
      %c0_12 = arith.constant 0 : index
      %25 = vector.load %arg4[%c0_11, %c1, %c0_12] : memref<1x2x128xf32, #tpu.memory_space<vmem>>, vector<1x1x128xf32>
      %26 = vector.shape_cast %25 : vector<1x1x128xf32> to vector<1x128xf32>
      %27 = vector.shape_cast %15 : vector<1x128xf32> to vector<1x1x128xf32>
      tpu.vector_store %arg4[%c0_11, %c1, %c0_12], %27 {strides = array<i32>} : memref<1x2x128xf32, #tpu.memory_space<vmem>>, vector<1x1x128xf32>,
    } else {
    }
    %c0_i32_6 = arith.constant 0 : i32
    %19 = arith.cmpi sgt, %arg2, %c0_i32_6 : i32
    %20 = arith.extui %19 : i1 to i32
    %c0_i32_7 = arith.constant 0 : i32
    %21 = arith.cmpi ne, %20, %c0_i32_7 : i32
    scf.if %21 {
      %c0_8 = arith.constant 0 : index
      %c0_9 = arith.constant 0 : index
      %c0_10 = arith.constant 0 : index
      %22 = vector.load %arg4[%c0_8, %c0_9, %c0_10] : memref<1x2x128xf32, #tpu.memory_space<vmem>>, vector<1x1x128xf32>
      %23 = vector.shape_cast %22 : vector<1x1x128xf32> to vector<1x128xf32>
      %24 = arith.addf %23, %13 : vector<1x128xf32>
      %c0_11 = arith.constant 0 : index
      %c0_12 = arith.constant 0 : index
      %c0_13 = arith.constant 0 : index
      %25 = vector.load %arg4[%c0_11, %c0_12, %c0_13] : memref<1x2x128xf32, #tpu.memory_space<vmem>>, vector<1x1x128xf32>
      %26 = vector.shape_cast %25 : vector<1x1x128xf32> to vector<1x128xf32>
      %27 = vector.shape_cast %24 : vector<1x128xf32> to vector<1x1x128xf32>
      tpu.vector_store %arg4[%c0_11, %c0_12, %c0_13], %27 {strides = array<i32>} : memref<1x2x128xf32, #tpu.memory_space<vmem>>, vector<1x1x128xf32>,
      %c0_14 = arith.constant 0 : index
      %c1 = arith.constant 1 : index
      %c0_15 = arith.constant 0 : index
      %28 = vector.load %arg4[%c0_14, %c1, %c0_15] : memref<1x2x128xf32, #tpu.memory_space<vmem>>, vector<1x1x128xf32>
      %29 = vector.shape_cast %28 : vector<1x1x128xf32> to vector<1x128xf32>
      %30 = arith.maximumf %29, %15 : vector<1x128xf32>
      %c0_16 = arith.constant 0 : index
      %c1_17 = arith.constant 1 : index
      %c0_18 = arith.constant 0 : index
      %31 = vector.load %arg4[%c0_16, %c1_17, %c0_18] : memref<1x2x128xf32, #tpu.memory_space<vmem>>, vector<1x1x128xf32>
      %32 = vector.shape_cast %31 : vector<1x1x128xf32> to vector<1x128xf32>
      %33 = vector.shape_cast %30 : vector<1x128xf32> to vector<1x1x128xf32>
      tpu.vector_store %arg4[%c0_16, %c1_17, %c0_18], %33 {strides = array<i32>} : memref<1x2x128xf32, #tpu.memory_space<vmem>>, vector<1x1x128xf32>,
    } else {
    }
    return
  }
  func.func @transform_0(%arg0: i32, %arg1: i32, %arg2: i32) -> (i32, i32, i32) {
    %c0_i32 = arith.constant 0 : i32
    return %arg0, %arg2, %arg1 : i32, i32, i32
  }
  func.func @transform_1(%arg0: i32, %arg1: i32, %arg2: i32) -> (i32, i32, i32) {
    %c0_i32 = arith.constant 0 : i32
    %c0_i32_0 = arith.constant 0 : i32
    return %arg0, %c0_i32, %arg1 : i32, i32, i32
  }
}

module attributes {stable_mosaic.version = 11 : i64} {
  func.func @_conv_kernel(%arg0: i32, %arg1: memref<98xf32, #tpu.memory_space<smem>>, %arg2: memref<1x2x22x22xf32, #tpu.memory_space<vmem>>, %arg3: memref<1x1x16x16xf32, #tpu.memory_space<vmem>>) attributes {dimension_semantics = [#tpu.dimension_semantics<parallel>], iteration_bounds = array<i64: 2>, scalar_prefetch = 1 : i64, scratch_operands = 0 : i64, tpu.core_type = #tpu.core_type<tc>, window_params = [{transform_indices = @transform_0, window_bounds = array<i64: 1, 2, 22, 22>}, {transform_indices = @transform_1, window_bounds = array<i64: 1, 1, 16, 16>}]} {
    %c0 = arith.constant 0 : index
    %c0_0 = arith.constant 0 : index
    %c0_1 = arith.constant 0 : index
    %c0_2 = arith.constant 0 : index
    %0 = vector.load %arg2[%c0, %c0_0, %c0_1, %c0_2] : memref<1x2x22x22xf32, #tpu.memory_space<vmem>>, vector<1x2x22x22xf32>
    %1 = vector.shape_cast %0 : vector<1x2x22x22xf32> to vector<2x22x22xf32>
    %2 = vector.extract_strided_slice %1 {offsets = [0, 0, 0], sizes = [1, 22, 22], strides = [1, 1, 1]} : vector<2x22x22xf32> to vector<1x22x22xf32>
    %3 = vector.shape_cast %2 : vector<1x22x22xf32> to vector<22x22xf32>
    %4 = vector.extract_strided_slice %1 {offsets = [1, 0, 0], sizes = [1, 22, 22], strides = [1, 1, 1]} : vector<2x22x22xf32> to vector<1x22x22xf32>
    %5 = vector.shape_cast %4 : vector<1x22x22xf32> to vector<22x22xf32>
    %cst = arith.constant 0.000000e+00 : f32
    %6 = vector.broadcast %cst : f32 to vector<16x16xf32>
    %cst_3 = arith.constant 0.000000e+00 : f32
    %7 = vector.broadcast %cst_3 : f32 to vector<16x16xf32>
    %8 = vector.extract_strided_slice %3 {offsets = [0, 0], sizes = [22, 16], strides = [1, 1]} : vector<22x22xf32> to vector<22x16xf32>
    %9 = vector.extract_strided_slice %5 {offsets = [0, 0], sizes = [22, 16], strides = [1, 1]} : vector<22x22xf32> to vector<22x16xf32>
    %c0_4 = arith.constant 0 : index
    %10 = memref.load %arg1[%c0_4] : memref<98xf32, #tpu.memory_space<smem>>
    %c49 = arith.constant 49 : index
    %11 = memref.load %arg1[%c49] : memref<98xf32, #tpu.memory_space<smem>>
    %12 = vector.extract_strided_slice %8 {offsets = [0, 0], sizes = [16, 16], strides = [1, 1]} : vector<22x16xf32> to vector<16x16xf32>
    %13 = vector.broadcast %10 : f32 to vector<16x16xf32>
    %14 = arith.mulf %13, %12 : vector<16x16xf32>
    %15 = arith.addf %6, %14 : vector<16x16xf32>
    %16 = vector.extract_strided_slice %9 {offsets = [0, 0], sizes = [16, 16], strides = [1, 1]} : vector<22x16xf32> to vector<16x16xf32>
    %17 = vector.broadcast %11 : f32 to vector<16x16xf32>
    %18 = arith.mulf %17, %16 : vector<16x16xf32>
    %19 = arith.addf %7, %18 : vector<16x16xf32>
    %c7 = arith.constant 7 : index
    %20 = memref.load %arg1[%c7] : memref<98xf32, #tpu.memory_space<smem>>
    %c56 = arith.constant 56 : index
    %21 = memref.load %arg1[%c56] : memref<98xf32, #tpu.memory_space<smem>>
    %22 = vector.extract_strided_slice %8 {offsets = [1, 0], sizes = [16, 16], strides = [1, 1]} : vector<22x16xf32> to vector<16x16xf32>
    %23 = vector.broadcast %20 : f32 to vector<16x16xf32>
    %24 = arith.mulf %23, %22 : vector<16x16xf32>
    %25 = arith.addf %15, %24 : vector<16x16xf32>
    %26 = vector.extract_strided_slice %9 {offsets = [1, 0], sizes = [16, 16], strides = [1, 1]} : vector<22x16xf32> to vector<16x16xf32>
    %27 = vector.broadcast %21 : f32 to vector<16x16xf32>
    %28 = arith.mulf %27, %26 : vector<16x16xf32>
    %29 = arith.addf %19, %28 : vector<16x16xf32>
    %c14 = arith.constant 14 : index
    %30 = memref.load %arg1[%c14] : memref<98xf32, #tpu.memory_space<smem>>
    %c63 = arith.constant 63 : index
    %31 = memref.load %arg1[%c63] : memref<98xf32, #tpu.memory_space<smem>>
    %32 = vector.extract_strided_slice %8 {offsets = [2, 0], sizes = [16, 16], strides = [1, 1]} : vector<22x16xf32> to vector<16x16xf32>
    %33 = vector.broadcast %30 : f32 to vector<16x16xf32>
    %34 = arith.mulf %33, %32 : vector<16x16xf32>
    %35 = arith.addf %25, %34 : vector<16x16xf32>
    %36 = vector.extract_strided_slice %9 {offsets = [2, 0], sizes = [16, 16], strides = [1, 1]} : vector<22x16xf32> to vector<16x16xf32>
    %37 = vector.broadcast %31 : f32 to vector<16x16xf32>
    %38 = arith.mulf %37, %36 : vector<16x16xf32>
    %39 = arith.addf %29, %38 : vector<16x16xf32>
    %c21 = arith.constant 21 : index
    %40 = memref.load %arg1[%c21] : memref<98xf32, #tpu.memory_space<smem>>
    %c70 = arith.constant 70 : index
    %41 = memref.load %arg1[%c70] : memref<98xf32, #tpu.memory_space<smem>>
    %42 = vector.extract_strided_slice %8 {offsets = [3, 0], sizes = [16, 16], strides = [1, 1]} : vector<22x16xf32> to vector<16x16xf32>
    %43 = vector.broadcast %40 : f32 to vector<16x16xf32>
    %44 = arith.mulf %43, %42 : vector<16x16xf32>
    %45 = arith.addf %35, %44 : vector<16x16xf32>
    %46 = vector.extract_strided_slice %9 {offsets = [3, 0], sizes = [16, 16], strides = [1, 1]} : vector<22x16xf32> to vector<16x16xf32>
    %47 = vector.broadcast %41 : f32 to vector<16x16xf32>
    %48 = arith.mulf %47, %46 : vector<16x16xf32>
    %49 = arith.addf %39, %48 : vector<16x16xf32>
    %c28 = arith.constant 28 : index
    %50 = memref.load %arg1[%c28] : memref<98xf32, #tpu.memory_space<smem>>
    %c77 = arith.constant 77 : index
    %51 = memref.load %arg1[%c77] : memref<98xf32, #tpu.memory_space<smem>>
    %52 = vector.extract_strided_slice %8 {offsets = [4, 0], sizes = [16, 16], strides = [1, 1]} : vector<22x16xf32> to vector<16x16xf32>
    %53 = vector.broadcast %50 : f32 to vector<16x16xf32>
    %54 = arith.mulf %53, %52 : vector<16x16xf32>
    %55 = arith.addf %45, %54 : vector<16x16xf32>
    %56 = vector.extract_strided_slice %9 {offsets = [4, 0], sizes = [16, 16], strides = [1, 1]} : vector<22x16xf32> to vector<16x16xf32>
    %57 = vector.broadcast %51 : f32 to vector<16x16xf32>
    %58 = arith.mulf %57, %56 : vector<16x16xf32>
    %59 = arith.addf %49, %58 : vector<16x16xf32>
    %c35 = arith.constant 35 : index
    %60 = memref.load %arg1[%c35] : memref<98xf32, #tpu.memory_space<smem>>
    %c84 = arith.constant 84 : index
    %61 = memref.load %arg1[%c84] : memref<98xf32, #tpu.memory_space<smem>>
    %62 = vector.extract_strided_slice %8 {offsets = [5, 0], sizes = [16, 16], strides = [1, 1]} : vector<22x16xf32> to vector<16x16xf32>
    %63 = vector.broadcast %60 : f32 to vector<16x16xf32>
    %64 = arith.mulf %63, %62 : vector<16x16xf32>
    %65 = arith.addf %55, %64 : vector<16x16xf32>
    %66 = vector.extract_strided_slice %9 {offsets = [5, 0], sizes = [16, 16], strides = [1, 1]} : vector<22x16xf32> to vector<16x16xf32>
    %67 = vector.broadcast %61 : f32 to vector<16x16xf32>
    %68 = arith.mulf %67, %66 : vector<16x16xf32>
    %69 = arith.addf %59, %68 : vector<16x16xf32>
    %c42 = arith.constant 42 : index
    %70 = memref.load %arg1[%c42] : memref<98xf32, #tpu.memory_space<smem>>
    %c91 = arith.constant 91 : index
    %71 = memref.load %arg1[%c91] : memref<98xf32, #tpu.memory_space<smem>>
    %72 = vector.extract_strided_slice %8 {offsets = [6, 0], sizes = [16, 16], strides = [1, 1]} : vector<22x16xf32> to vector<16x16xf32>
    %73 = vector.broadcast %70 : f32 to vector<16x16xf32>
    %74 = arith.mulf %73, %72 : vector<16x16xf32>
    %75 = arith.addf %65, %74 : vector<16x16xf32>
    %76 = vector.extract_strided_slice %9 {offsets = [6, 0], sizes = [16, 16], strides = [1, 1]} : vector<22x16xf32> to vector<16x16xf32>
    %77 = vector.broadcast %71 : f32 to vector<16x16xf32>
    %78 = arith.mulf %77, %76 : vector<16x16xf32>
    %79 = arith.addf %69, %78 : vector<16x16xf32>
    %80 = vector.extract_strided_slice %3 {offsets = [0, 1], sizes = [22, 16], strides = [1, 1]} : vector<22x22xf32> to vector<22x16xf32>
    %81 = vector.extract_strided_slice %5 {offsets = [0, 1], sizes = [22, 16], strides = [1, 1]} : vector<22x22xf32> to vector<22x16xf32>
    %c1 = arith.constant 1 : index
    %82 = memref.load %arg1[%c1] : memref<98xf32, #tpu.memory_space<smem>>
    %c50 = arith.constant 50 : index
    %83 = memref.load %arg1[%c50] : memref<98xf32, #tpu.memory_space<smem>>
    %84 = vector.extract_strided_slice %80 {offsets = [0, 0], sizes = [16, 16], strides = [1, 1]} : vector<22x16xf32> to vector<16x16xf32>
    %85 = vector.broadcast %82 : f32 to vector<16x16xf32>
    %86 = arith.mulf %85, %84 : vector<16x16xf32>
    %87 = arith.addf %75, %86 : vector<16x16xf32>
    %88 = vector.extract_strided_slice %81 {offsets = [0, 0], sizes = [16, 16], strides = [1, 1]} : vector<22x16xf32> to vector<16x16xf32>
    %89 = vector.broadcast %83 : f32 to vector<16x16xf32>
    %90 = arith.mulf %89, %88 : vector<16x16xf32>
    %91 = arith.addf %79, %90 : vector<16x16xf32>
    %c8 = arith.constant 8 : index
    %92 = memref.load %arg1[%c8] : memref<98xf32, #tpu.memory_space<smem>>
    %c57 = arith.constant 57 : index
    %93 = memref.load %arg1[%c57] : memref<98xf32, #tpu.memory_space<smem>>
    %94 = vector.extract_strided_slice %80 {offsets = [1, 0], sizes = [16, 16], strides = [1, 1]} : vector<22x16xf32> to vector<16x16xf32>
    %95 = vector.broadcast %92 : f32 to vector<16x16xf32>
    %96 = arith.mulf %95, %94 : vector<16x16xf32>
    %97 = arith.addf %87, %96 : vector<16x16xf32>
    %98 = vector.extract_strided_slice %81 {offsets = [1, 0], sizes = [16, 16], strides = [1, 1]} : vector<22x16xf32> to vector<16x16xf32>
    %99 = vector.broadcast %93 : f32 to vector<16x16xf32>
    %100 = arith.mulf %99, %98 : vector<16x16xf32>
    %101 = arith.addf %91, %100 : vector<16x16xf32>
    %c15 = arith.constant 15 : index
    %102 = memref.load %arg1[%c15] : memref<98xf32, #tpu.memory_space<smem>>
    %c64 = arith.constant 64 : index
    %103 = memref.load %arg1[%c64] : memref<98xf32, #tpu.memory_space<smem>>
    %104 = vector.extract_strided_slice %80 {offsets = [2, 0], sizes = [16, 16], strides = [1, 1]} : vector<22x16xf32> to vector<16x16xf32>
    %105 = vector.broadcast %102 : f32 to vector<16x16xf32>
    %106 = arith.mulf %105, %104 : vector<16x16xf32>
    %107 = arith.addf %97, %106 : vector<16x16xf32>
    %108 = vector.extract_strided_slice %81 {offsets = [2, 0], sizes = [16, 16], strides = [1, 1]} : vector<22x16xf32> to vector<16x16xf32>
    %109 = vector.broadcast %103 : f32 to vector<16x16xf32>
    %110 = arith.mulf %109, %108 : vector<16x16xf32>
    %111 = arith.addf %101, %110 : vector<16x16xf32>
    %c22 = arith.constant 22 : index
    %112 = memref.load %arg1[%c22] : memref<98xf32, #tpu.memory_space<smem>>
    %c71 = arith.constant 71 : index
    %113 = memref.load %arg1[%c71] : memref<98xf32, #tpu.memory_space<smem>>
    %114 = vector.extract_strided_slice %80 {offsets = [3, 0], sizes = [16, 16], strides = [1, 1]} : vector<22x16xf32> to vector<16x16xf32>
    %115 = vector.broadcast %112 : f32 to vector<16x16xf32>
    %116 = arith.mulf %115, %114 : vector<16x16xf32>
    %117 = arith.addf %107, %116 : vector<16x16xf32>
    %118 = vector.extract_strided_slice %81 {offsets = [3, 0], sizes = [16, 16], strides = [1, 1]} : vector<22x16xf32> to vector<16x16xf32>
    %119 = vector.broadcast %113 : f32 to vector<16x16xf32>
    %120 = arith.mulf %119, %118 : vector<16x16xf32>
    %121 = arith.addf %111, %120 : vector<16x16xf32>
    %c29 = arith.constant 29 : index
    %122 = memref.load %arg1[%c29] : memref<98xf32, #tpu.memory_space<smem>>
    %c78 = arith.constant 78 : index
    %123 = memref.load %arg1[%c78] : memref<98xf32, #tpu.memory_space<smem>>
    %124 = vector.extract_strided_slice %80 {offsets = [4, 0], sizes = [16, 16], strides = [1, 1]} : vector<22x16xf32> to vector<16x16xf32>
    %125 = vector.broadcast %122 : f32 to vector<16x16xf32>
    %126 = arith.mulf %125, %124 : vector<16x16xf32>
    %127 = arith.addf %117, %126 : vector<16x16xf32>
    %128 = vector.extract_strided_slice %81 {offsets = [4, 0], sizes = [16, 16], strides = [1, 1]} : vector<22x16xf32> to vector<16x16xf32>
    %129 = vector.broadcast %123 : f32 to vector<16x16xf32>
    %130 = arith.mulf %129, %128 : vector<16x16xf32>
    %131 = arith.addf %121, %130 : vector<16x16xf32>
    %c36 = arith.constant 36 : index
    %132 = memref.load %arg1[%c36] : memref<98xf32, #tpu.memory_space<smem>>
    %c85 = arith.constant 85 : index
    %133 = memref.load %arg1[%c85] : memref<98xf32, #tpu.memory_space<smem>>
    %134 = vector.extract_strided_slice %80 {offsets = [5, 0], sizes = [16, 16], strides = [1, 1]} : vector<22x16xf32> to vector<16x16xf32>
    %135 = vector.broadcast %132 : f32 to vector<16x16xf32>
    %136 = arith.mulf %135, %134 : vector<16x16xf32>
    %137 = arith.addf %127, %136 : vector<16x16xf32>
    %138 = vector.extract_strided_slice %81 {offsets = [5, 0], sizes = [16, 16], strides = [1, 1]} : vector<22x16xf32> to vector<16x16xf32>
    %139 = vector.broadcast %133 : f32 to vector<16x16xf32>
    %140 = arith.mulf %139, %138 : vector<16x16xf32>
    %141 = arith.addf %131, %140 : vector<16x16xf32>
    %c43 = arith.constant 43 : index
    %142 = memref.load %arg1[%c43] : memref<98xf32, #tpu.memory_space<smem>>
    %c92 = arith.constant 92 : index
    %143 = memref.load %arg1[%c92] : memref<98xf32, #tpu.memory_space<smem>>
    %144 = vector.extract_strided_slice %80 {offsets = [6, 0], sizes = [16, 16], strides = [1, 1]} : vector<22x16xf32> to vector<16x16xf32>
    %145 = vector.broadcast %142 : f32 to vector<16x16xf32>
    %146 = arith.mulf %145, %144 : vector<16x16xf32>
    %147 = arith.addf %137, %146 : vector<16x16xf32>
    %148 = vector.extract_strided_slice %81 {offsets = [6, 0], sizes = [16, 16], strides = [1, 1]} : vector<22x16xf32> to vector<16x16xf32>
    %149 = vector.broadcast %143 : f32 to vector<16x16xf32>
    %150 = arith.mulf %149, %148 : vector<16x16xf32>
    %151 = arith.addf %141, %150 : vector<16x16xf32>
    %152 = vector.extract_strided_slice %3 {offsets = [0, 2], sizes = [22, 16], strides = [1, 1]} : vector<22x22xf32> to vector<22x16xf32>
    %153 = vector.extract_strided_slice %5 {offsets = [0, 2], sizes = [22, 16], strides = [1, 1]} : vector<22x22xf32> to vector<22x16xf32>
    %c2 = arith.constant 2 : index
    %154 = memref.load %arg1[%c2] : memref<98xf32, #tpu.memory_space<smem>>
    %c51 = arith.constant 51 : index
    %155 = memref.load %arg1[%c51] : memref<98xf32, #tpu.memory_space<smem>>
    %156 = vector.extract_strided_slice %152 {offsets = [0, 0], sizes = [16, 16], strides = [1, 1]} : vector<22x16xf32> to vector<16x16xf32>
    %157 = vector.broadcast %154 : f32 to vector<16x16xf32>
    %158 = arith.mulf %157, %156 : vector<16x16xf32>
    %159 = arith.addf %147, %158 : vector<16x16xf32>
    %160 = vector.extract_strided_slice %153 {offsets = [0, 0], sizes = [16, 16], strides = [1, 1]} : vector<22x16xf32> to vector<16x16xf32>
    %161 = vector.broadcast %155 : f32 to vector<16x16xf32>
    %162 = arith.mulf %161, %160 : vector<16x16xf32>
    %163 = arith.addf %151, %162 : vector<16x16xf32>
    %c9 = arith.constant 9 : index
    %164 = memref.load %arg1[%c9] : memref<98xf32, #tpu.memory_space<smem>>
    %c58 = arith.constant 58 : index
    %165 = memref.load %arg1[%c58] : memref<98xf32, #tpu.memory_space<smem>>
    %166 = vector.extract_strided_slice %152 {offsets = [1, 0], sizes = [16, 16], strides = [1, 1]} : vector<22x16xf32> to vector<16x16xf32>
    %167 = vector.broadcast %164 : f32 to vector<16x16xf32>
    %168 = arith.mulf %167, %166 : vector<16x16xf32>
    %169 = arith.addf %159, %168 : vector<16x16xf32>
    %170 = vector.extract_strided_slice %153 {offsets = [1, 0], sizes = [16, 16], strides = [1, 1]} : vector<22x16xf32> to vector<16x16xf32>
    %171 = vector.broadcast %165 : f32 to vector<16x16xf32>
    %172 = arith.mulf %171, %170 : vector<16x16xf32>
    %173 = arith.addf %163, %172 : vector<16x16xf32>
    %c16 = arith.constant 16 : index
    %174 = memref.load %arg1[%c16] : memref<98xf32, #tpu.memory_space<smem>>
    %c65 = arith.constant 65 : index
    %175 = memref.load %arg1[%c65] : memref<98xf32, #tpu.memory_space<smem>>
    %176 = vector.extract_strided_slice %152 {offsets = [2, 0], sizes = [16, 16], strides = [1, 1]} : vector<22x16xf32> to vector<16x16xf32>
    %177 = vector.broadcast %174 : f32 to vector<16x16xf32>
    %178 = arith.mulf %177, %176 : vector<16x16xf32>
    %179 = arith.addf %169, %178 : vector<16x16xf32>
    %180 = vector.extract_strided_slice %153 {offsets = [2, 0], sizes = [16, 16], strides = [1, 1]} : vector<22x16xf32> to vector<16x16xf32>
    %181 = vector.broadcast %175 : f32 to vector<16x16xf32>
    %182 = arith.mulf %181, %180 : vector<16x16xf32>
    %183 = arith.addf %173, %182 : vector<16x16xf32>
    %c23 = arith.constant 23 : index
    %184 = memref.load %arg1[%c23] : memref<98xf32, #tpu.memory_space<smem>>
    %c72 = arith.constant 72 : index
    %185 = memref.load %arg1[%c72] : memref<98xf32, #tpu.memory_space<smem>>
    %186 = vector.extract_strided_slice %152 {offsets = [3, 0], sizes = [16, 16], strides = [1, 1]} : vector<22x16xf32> to vector<16x16xf32>
    %187 = vector.broadcast %184 : f32 to vector<16x16xf32>
    %188 = arith.mulf %187, %186 : vector<16x16xf32>
    %189 = arith.addf %179, %188 : vector<16x16xf32>
    %190 = vector.extract_strided_slice %153 {offsets = [3, 0], sizes = [16, 16], strides = [1, 1]} : vector<22x16xf32> to vector<16x16xf32>
    %191 = vector.broadcast %185 : f32 to vector<16x16xf32>
    %192 = arith.mulf %191, %190 : vector<16x16xf32>
    %193 = arith.addf %183, %192 : vector<16x16xf32>
    %c30 = arith.constant 30 : index
    %194 = memref.load %arg1[%c30] : memref<98xf32, #tpu.memory_space<smem>>
    %c79 = arith.constant 79 : index
    %195 = memref.load %arg1[%c79] : memref<98xf32, #tpu.memory_space<smem>>
    %196 = vector.extract_strided_slice %152 {offsets = [4, 0], sizes = [16, 16], strides = [1, 1]} : vector<22x16xf32> to vector<16x16xf32>
    %197 = vector.broadcast %194 : f32 to vector<16x16xf32>
    %198 = arith.mulf %197, %196 : vector<16x16xf32>
    %199 = arith.addf %189, %198 : vector<16x16xf32>
    %200 = vector.extract_strided_slice %153 {offsets = [4, 0], sizes = [16, 16], strides = [1, 1]} : vector<22x16xf32> to vector<16x16xf32>
    %201 = vector.broadcast %195 : f32 to vector<16x16xf32>
    %202 = arith.mulf %201, %200 : vector<16x16xf32>
    %203 = arith.addf %193, %202 : vector<16x16xf32>
    %c37 = arith.constant 37 : index
    %204 = memref.load %arg1[%c37] : memref<98xf32, #tpu.memory_space<smem>>
    %c86 = arith.constant 86 : index
    %205 = memref.load %arg1[%c86] : memref<98xf32, #tpu.memory_space<smem>>
    %206 = vector.extract_strided_slice %152 {offsets = [5, 0], sizes = [16, 16], strides = [1, 1]} : vector<22x16xf32> to vector<16x16xf32>
    %207 = vector.broadcast %204 : f32 to vector<16x16xf32>
    %208 = arith.mulf %207, %206 : vector<16x16xf32>
    %209 = arith.addf %199, %208 : vector<16x16xf32>
    %210 = vector.extract_strided_slice %153 {offsets = [5, 0], sizes = [16, 16], strides = [1, 1]} : vector<22x16xf32> to vector<16x16xf32>
    %211 = vector.broadcast %205 : f32 to vector<16x16xf32>
    %212 = arith.mulf %211, %210 : vector<16x16xf32>
    %213 = arith.addf %203, %212 : vector<16x16xf32>
    %c44 = arith.constant 44 : index
    %214 = memref.load %arg1[%c44] : memref<98xf32, #tpu.memory_space<smem>>
    %c93 = arith.constant 93 : index
    %215 = memref.load %arg1[%c93] : memref<98xf32, #tpu.memory_space<smem>>
    %216 = vector.extract_strided_slice %152 {offsets = [6, 0], sizes = [16, 16], strides = [1, 1]} : vector<22x16xf32> to vector<16x16xf32>
    %217 = vector.broadcast %214 : f32 to vector<16x16xf32>
    %218 = arith.mulf %217, %216 : vector<16x16xf32>
    %219 = arith.addf %209, %218 : vector<16x16xf32>
    %220 = vector.extract_strided_slice %153 {offsets = [6, 0], sizes = [16, 16], strides = [1, 1]} : vector<22x16xf32> to vector<16x16xf32>
    %221 = vector.broadcast %215 : f32 to vector<16x16xf32>
    %222 = arith.mulf %221, %220 : vector<16x16xf32>
    %223 = arith.addf %213, %222 : vector<16x16xf32>
    %224 = vector.extract_strided_slice %3 {offsets = [0, 3], sizes = [22, 16], strides = [1, 1]} : vector<22x22xf32> to vector<22x16xf32>
    %225 = vector.extract_strided_slice %5 {offsets = [0, 3], sizes = [22, 16], strides = [1, 1]} : vector<22x22xf32> to vector<22x16xf32>
    %c3 = arith.constant 3 : index
    %226 = memref.load %arg1[%c3] : memref<98xf32, #tpu.memory_space<smem>>
    %c52 = arith.constant 52 : index
    %227 = memref.load %arg1[%c52] : memref<98xf32, #tpu.memory_space<smem>>
    %228 = vector.extract_strided_slice %224 {offsets = [0, 0], sizes = [16, 16], strides = [1, 1]} : vector<22x16xf32> to vector<16x16xf32>
    %229 = vector.broadcast %226 : f32 to vector<16x16xf32>
    %230 = arith.mulf %229, %228 : vector<16x16xf32>
    %231 = arith.addf %219, %230 : vector<16x16xf32>
    %232 = vector.extract_strided_slice %225 {offsets = [0, 0], sizes = [16, 16], strides = [1, 1]} : vector<22x16xf32> to vector<16x16xf32>
    %233 = vector.broadcast %227 : f32 to vector<16x16xf32>
    %234 = arith.mulf %233, %232 : vector<16x16xf32>
    %235 = arith.addf %223, %234 : vector<16x16xf32>
    %c10 = arith.constant 10 : index
    %236 = memref.load %arg1[%c10] : memref<98xf32, #tpu.memory_space<smem>>
    %c59 = arith.constant 59 : index
    %237 = memref.load %arg1[%c59] : memref<98xf32, #tpu.memory_space<smem>>
    %238 = vector.extract_strided_slice %224 {offsets = [1, 0], sizes = [16, 16], strides = [1, 1]} : vector<22x16xf32> to vector<16x16xf32>
    %239 = vector.broadcast %236 : f32 to vector<16x16xf32>
    %240 = arith.mulf %239, %238 : vector<16x16xf32>
    %241 = arith.addf %231, %240 : vector<16x16xf32>
    %242 = vector.extract_strided_slice %225 {offsets = [1, 0], sizes = [16, 16], strides = [1, 1]} : vector<22x16xf32> to vector<16x16xf32>
    %243 = vector.broadcast %237 : f32 to vector<16x16xf32>
    %244 = arith.mulf %243, %242 : vector<16x16xf32>
    %245 = arith.addf %235, %244 : vector<16x16xf32>
    %c17 = arith.constant 17 : index
    %246 = memref.load %arg1[%c17] : memref<98xf32, #tpu.memory_space<smem>>
    %c66 = arith.constant 66 : index
    %247 = memref.load %arg1[%c66] : memref<98xf32, #tpu.memory_space<smem>>
    %248 = vector.extract_strided_slice %224 {offsets = [2, 0], sizes = [16, 16], strides = [1, 1]} : vector<22x16xf32> to vector<16x16xf32>
    %249 = vector.broadcast %246 : f32 to vector<16x16xf32>
    %250 = arith.mulf %249, %248 : vector<16x16xf32>
    %251 = arith.addf %241, %250 : vector<16x16xf32>
    %252 = vector.extract_strided_slice %225 {offsets = [2, 0], sizes = [16, 16], strides = [1, 1]} : vector<22x16xf32> to vector<16x16xf32>
    %253 = vector.broadcast %247 : f32 to vector<16x16xf32>
    %254 = arith.mulf %253, %252 : vector<16x16xf32>
    %255 = arith.addf %245, %254 : vector<16x16xf32>
    %c24 = arith.constant 24 : index
    %256 = memref.load %arg1[%c24] : memref<98xf32, #tpu.memory_space<smem>>
    %c73 = arith.constant 73 : index
    %257 = memref.load %arg1[%c73] : memref<98xf32, #tpu.memory_space<smem>>
    %258 = vector.extract_strided_slice %224 {offsets = [3, 0], sizes = [16, 16], strides = [1, 1]} : vector<22x16xf32> to vector<16x16xf32>
    %259 = vector.broadcast %256 : f32 to vector<16x16xf32>
    %260 = arith.mulf %259, %258 : vector<16x16xf32>
    %261 = arith.addf %251, %260 : vector<16x16xf32>
    %262 = vector.extract_strided_slice %225 {offsets = [3, 0], sizes = [16, 16], strides = [1, 1]} : vector<22x16xf32> to vector<16x16xf32>
    %263 = vector.broadcast %257 : f32 to vector<16x16xf32>
    %264 = arith.mulf %263, %262 : vector<16x16xf32>
    %265 = arith.addf %255, %264 : vector<16x16xf32>
    %c31 = arith.constant 31 : index
    %266 = memref.load %arg1[%c31] : memref<98xf32, #tpu.memory_space<smem>>
    %c80 = arith.constant 80 : index
    %267 = memref.load %arg1[%c80] : memref<98xf32, #tpu.memory_space<smem>>
    %268 = vector.extract_strided_slice %224 {offsets = [4, 0], sizes = [16, 16], strides = [1, 1]} : vector<22x16xf32> to vector<16x16xf32>
    %269 = vector.broadcast %266 : f32 to vector<16x16xf32>
    %270 = arith.mulf %269, %268 : vector<16x16xf32>
    %271 = arith.addf %261, %270 : vector<16x16xf32>
    %272 = vector.extract_strided_slice %225 {offsets = [4, 0], sizes = [16, 16], strides = [1, 1]} : vector<22x16xf32> to vector<16x16xf32>
    %273 = vector.broadcast %267 : f32 to vector<16x16xf32>
    %274 = arith.mulf %273, %272 : vector<16x16xf32>
    %275 = arith.addf %265, %274 : vector<16x16xf32>
    %c38 = arith.constant 38 : index
    %276 = memref.load %arg1[%c38] : memref<98xf32, #tpu.memory_space<smem>>
    %c87 = arith.constant 87 : index
    %277 = memref.load %arg1[%c87] : memref<98xf32, #tpu.memory_space<smem>>
    %278 = vector.extract_strided_slice %224 {offsets = [5, 0], sizes = [16, 16], strides = [1, 1]} : vector<22x16xf32> to vector<16x16xf32>
    %279 = vector.broadcast %276 : f32 to vector<16x16xf32>
    %280 = arith.mulf %279, %278 : vector<16x16xf32>
    %281 = arith.addf %271, %280 : vector<16x16xf32>
    %282 = vector.extract_strided_slice %225 {offsets = [5, 0], sizes = [16, 16], strides = [1, 1]} : vector<22x16xf32> to vector<16x16xf32>
    %283 = vector.broadcast %277 : f32 to vector<16x16xf32>
    %284 = arith.mulf %283, %282 : vector<16x16xf32>
    %285 = arith.addf %275, %284 : vector<16x16xf32>
    %c45 = arith.constant 45 : index
    %286 = memref.load %arg1[%c45] : memref<98xf32, #tpu.memory_space<smem>>
    %c94 = arith.constant 94 : index
    %287 = memref.load %arg1[%c94] : memref<98xf32, #tpu.memory_space<smem>>
    %288 = vector.extract_strided_slice %224 {offsets = [6, 0], sizes = [16, 16], strides = [1, 1]} : vector<22x16xf32> to vector<16x16xf32>
    %289 = vector.broadcast %286 : f32 to vector<16x16xf32>
    %290 = arith.mulf %289, %288 : vector<16x16xf32>
    %291 = arith.addf %281, %290 : vector<16x16xf32>
    %292 = vector.extract_strided_slice %225 {offsets = [6, 0], sizes = [16, 16], strides = [1, 1]} : vector<22x16xf32> to vector<16x16xf32>
    %293 = vector.broadcast %287 : f32 to vector<16x16xf32>
    %294 = arith.mulf %293, %292 : vector<16x16xf32>
    %295 = arith.addf %285, %294 : vector<16x16xf32>
    %296 = vector.extract_strided_slice %3 {offsets = [0, 4], sizes = [22, 16], strides = [1, 1]} : vector<22x22xf32> to vector<22x16xf32>
    %297 = vector.extract_strided_slice %5 {offsets = [0, 4], sizes = [22, 16], strides = [1, 1]} : vector<22x22xf32> to vector<22x16xf32>
    %c4 = arith.constant 4 : index
    %298 = memref.load %arg1[%c4] : memref<98xf32, #tpu.memory_space<smem>>
    %c53 = arith.constant 53 : index
    %299 = memref.load %arg1[%c53] : memref<98xf32, #tpu.memory_space<smem>>
    %300 = vector.extract_strided_slice %296 {offsets = [0, 0], sizes = [16, 16], strides = [1, 1]} : vector<22x16xf32> to vector<16x16xf32>
    %301 = vector.broadcast %298 : f32 to vector<16x16xf32>
    %302 = arith.mulf %301, %300 : vector<16x16xf32>
    %303 = arith.addf %291, %302 : vector<16x16xf32>
    %304 = vector.extract_strided_slice %297 {offsets = [0, 0], sizes = [16, 16], strides = [1, 1]} : vector<22x16xf32> to vector<16x16xf32>
    %305 = vector.broadcast %299 : f32 to vector<16x16xf32>
    %306 = arith.mulf %305, %304 : vector<16x16xf32>
    %307 = arith.addf %295, %306 : vector<16x16xf32>
    %c11 = arith.constant 11 : index
    %308 = memref.load %arg1[%c11] : memref<98xf32, #tpu.memory_space<smem>>
    %c60 = arith.constant 60 : index
    %309 = memref.load %arg1[%c60] : memref<98xf32, #tpu.memory_space<smem>>
    %310 = vector.extract_strided_slice %296 {offsets = [1, 0], sizes = [16, 16], strides = [1, 1]} : vector<22x16xf32> to vector<16x16xf32>
    %311 = vector.broadcast %308 : f32 to vector<16x16xf32>
    %312 = arith.mulf %311, %310 : vector<16x16xf32>
    %313 = arith.addf %303, %312 : vector<16x16xf32>
    %314 = vector.extract_strided_slice %297 {offsets = [1, 0], sizes = [16, 16], strides = [1, 1]} : vector<22x16xf32> to vector<16x16xf32>
    %315 = vector.broadcast %309 : f32 to vector<16x16xf32>
    %316 = arith.mulf %315, %314 : vector<16x16xf32>
    %317 = arith.addf %307, %316 : vector<16x16xf32>
    %c18 = arith.constant 18 : index
    %318 = memref.load %arg1[%c18] : memref<98xf32, #tpu.memory_space<smem>>
    %c67 = arith.constant 67 : index
    %319 = memref.load %arg1[%c67] : memref<98xf32, #tpu.memory_space<smem>>
    %320 = vector.extract_strided_slice %296 {offsets = [2, 0], sizes = [16, 16], strides = [1, 1]} : vector<22x16xf32> to vector<16x16xf32>
    %321 = vector.broadcast %318 : f32 to vector<16x16xf32>
    %322 = arith.mulf %321, %320 : vector<16x16xf32>
    %323 = arith.addf %313, %322 : vector<16x16xf32>
    %324 = vector.extract_strided_slice %297 {offsets = [2, 0], sizes = [16, 16], strides = [1, 1]} : vector<22x16xf32> to vector<16x16xf32>
    %325 = vector.broadcast %319 : f32 to vector<16x16xf32>
    %326 = arith.mulf %325, %324 : vector<16x16xf32>
    %327 = arith.addf %317, %326 : vector<16x16xf32>
    %c25 = arith.constant 25 : index
    %328 = memref.load %arg1[%c25] : memref<98xf32, #tpu.memory_space<smem>>
    %c74 = arith.constant 74 : index
    %329 = memref.load %arg1[%c74] : memref<98xf32, #tpu.memory_space<smem>>
    %330 = vector.extract_strided_slice %296 {offsets = [3, 0], sizes = [16, 16], strides = [1, 1]} : vector<22x16xf32> to vector<16x16xf32>
    %331 = vector.broadcast %328 : f32 to vector<16x16xf32>
    %332 = arith.mulf %331, %330 : vector<16x16xf32>
    %333 = arith.addf %323, %332 : vector<16x16xf32>
    %334 = vector.extract_strided_slice %297 {offsets = [3, 0], sizes = [16, 16], strides = [1, 1]} : vector<22x16xf32> to vector<16x16xf32>
    %335 = vector.broadcast %329 : f32 to vector<16x16xf32>
    %336 = arith.mulf %335, %334 : vector<16x16xf32>
    %337 = arith.addf %327, %336 : vector<16x16xf32>
    %c32 = arith.constant 32 : index
    %338 = memref.load %arg1[%c32] : memref<98xf32, #tpu.memory_space<smem>>
    %c81 = arith.constant 81 : index
    %339 = memref.load %arg1[%c81] : memref<98xf32, #tpu.memory_space<smem>>
    %340 = vector.extract_strided_slice %296 {offsets = [4, 0], sizes = [16, 16], strides = [1, 1]} : vector<22x16xf32> to vector<16x16xf32>
    %341 = vector.broadcast %338 : f32 to vector<16x16xf32>
    %342 = arith.mulf %341, %340 : vector<16x16xf32>
    %343 = arith.addf %333, %342 : vector<16x16xf32>
    %344 = vector.extract_strided_slice %297 {offsets = [4, 0], sizes = [16, 16], strides = [1, 1]} : vector<22x16xf32> to vector<16x16xf32>
    %345 = vector.broadcast %339 : f32 to vector<16x16xf32>
    %346 = arith.mulf %345, %344 : vector<16x16xf32>
    %347 = arith.addf %337, %346 : vector<16x16xf32>
    %c39 = arith.constant 39 : index
    %348 = memref.load %arg1[%c39] : memref<98xf32, #tpu.memory_space<smem>>
    %c88 = arith.constant 88 : index
    %349 = memref.load %arg1[%c88] : memref<98xf32, #tpu.memory_space<smem>>
    %350 = vector.extract_strided_slice %296 {offsets = [5, 0], sizes = [16, 16], strides = [1, 1]} : vector<22x16xf32> to vector<16x16xf32>
    %351 = vector.broadcast %348 : f32 to vector<16x16xf32>
    %352 = arith.mulf %351, %350 : vector<16x16xf32>
    %353 = arith.addf %343, %352 : vector<16x16xf32>
    %354 = vector.extract_strided_slice %297 {offsets = [5, 0], sizes = [16, 16], strides = [1, 1]} : vector<22x16xf32> to vector<16x16xf32>
    %355 = vector.broadcast %349 : f32 to vector<16x16xf32>
    %356 = arith.mulf %355, %354 : vector<16x16xf32>
    %357 = arith.addf %347, %356 : vector<16x16xf32>
    %c46 = arith.constant 46 : index
    %358 = memref.load %arg1[%c46] : memref<98xf32, #tpu.memory_space<smem>>
    %c95 = arith.constant 95 : index
    %359 = memref.load %arg1[%c95] : memref<98xf32, #tpu.memory_space<smem>>
    %360 = vector.extract_strided_slice %296 {offsets = [6, 0], sizes = [16, 16], strides = [1, 1]} : vector<22x16xf32> to vector<16x16xf32>
    %361 = vector.broadcast %358 : f32 to vector<16x16xf32>
    %362 = arith.mulf %361, %360 : vector<16x16xf32>
    %363 = arith.addf %353, %362 : vector<16x16xf32>
    %364 = vector.extract_strided_slice %297 {offsets = [6, 0], sizes = [16, 16], strides = [1, 1]} : vector<22x16xf32> to vector<16x16xf32>
    %365 = vector.broadcast %359 : f32 to vector<16x16xf32>
    %366 = arith.mulf %365, %364 : vector<16x16xf32>
    %367 = arith.addf %357, %366 : vector<16x16xf32>
    %368 = vector.extract_strided_slice %3 {offsets = [0, 5], sizes = [22, 16], strides = [1, 1]} : vector<22x22xf32> to vector<22x16xf32>
    %369 = vector.extract_strided_slice %5 {offsets = [0, 5], sizes = [22, 16], strides = [1, 1]} : vector<22x22xf32> to vector<22x16xf32>
    %c5 = arith.constant 5 : index
    %370 = memref.load %arg1[%c5] : memref<98xf32, #tpu.memory_space<smem>>
    %c54 = arith.constant 54 : index
    %371 = memref.load %arg1[%c54] : memref<98xf32, #tpu.memory_space<smem>>
    %372 = vector.extract_strided_slice %368 {offsets = [0, 0], sizes = [16, 16], strides = [1, 1]} : vector<22x16xf32> to vector<16x16xf32>
    %373 = vector.broadcast %370 : f32 to vector<16x16xf32>
    %374 = arith.mulf %373, %372 : vector<16x16xf32>
    %375 = arith.addf %363, %374 : vector<16x16xf32>
    %376 = vector.extract_strided_slice %369 {offsets = [0, 0], sizes = [16, 16], strides = [1, 1]} : vector<22x16xf32> to vector<16x16xf32>
    %377 = vector.broadcast %371 : f32 to vector<16x16xf32>
    %378 = arith.mulf %377, %376 : vector<16x16xf32>
    %379 = arith.addf %367, %378 : vector<16x16xf32>
    %c12 = arith.constant 12 : index
    %380 = memref.load %arg1[%c12] : memref<98xf32, #tpu.memory_space<smem>>
    %c61 = arith.constant 61 : index
    %381 = memref.load %arg1[%c61] : memref<98xf32, #tpu.memory_space<smem>>
    %382 = vector.extract_strided_slice %368 {offsets = [1, 0], sizes = [16, 16], strides = [1, 1]} : vector<22x16xf32> to vector<16x16xf32>
    %383 = vector.broadcast %380 : f32 to vector<16x16xf32>
    %384 = arith.mulf %383, %382 : vector<16x16xf32>
    %385 = arith.addf %375, %384 : vector<16x16xf32>
    %386 = vector.extract_strided_slice %369 {offsets = [1, 0], sizes = [16, 16], strides = [1, 1]} : vector<22x16xf32> to vector<16x16xf32>
    %387 = vector.broadcast %381 : f32 to vector<16x16xf32>
    %388 = arith.mulf %387, %386 : vector<16x16xf32>
    %389 = arith.addf %379, %388 : vector<16x16xf32>
    %c19 = arith.constant 19 : index
    %390 = memref.load %arg1[%c19] : memref<98xf32, #tpu.memory_space<smem>>
    %c68 = arith.constant 68 : index
    %391 = memref.load %arg1[%c68] : memref<98xf32, #tpu.memory_space<smem>>
    %392 = vector.extract_strided_slice %368 {offsets = [2, 0], sizes = [16, 16], strides = [1, 1]} : vector<22x16xf32> to vector<16x16xf32>
    %393 = vector.broadcast %390 : f32 to vector<16x16xf32>
    %394 = arith.mulf %393, %392 : vector<16x16xf32>
    %395 = arith.addf %385, %394 : vector<16x16xf32>
    %396 = vector.extract_strided_slice %369 {offsets = [2, 0], sizes = [16, 16], strides = [1, 1]} : vector<22x16xf32> to vector<16x16xf32>
    %397 = vector.broadcast %391 : f32 to vector<16x16xf32>
    %398 = arith.mulf %397, %396 : vector<16x16xf32>
    %399 = arith.addf %389, %398 : vector<16x16xf32>
    %c26 = arith.constant 26 : index
    %400 = memref.load %arg1[%c26] : memref<98xf32, #tpu.memory_space<smem>>
    %c75 = arith.constant 75 : index
    %401 = memref.load %arg1[%c75] : memref<98xf32, #tpu.memory_space<smem>>
    %402 = vector.extract_strided_slice %368 {offsets = [3, 0], sizes = [16, 16], strides = [1, 1]} : vector<22x16xf32> to vector<16x16xf32>
    %403 = vector.broadcast %400 : f32 to vector<16x16xf32>
    %404 = arith.mulf %403, %402 : vector<16x16xf32>
    %405 = arith.addf %395, %404 : vector<16x16xf32>
    %406 = vector.extract_strided_slice %369 {offsets = [3, 0], sizes = [16, 16], strides = [1, 1]} : vector<22x16xf32> to vector<16x16xf32>
    %407 = vector.broadcast %401 : f32 to vector<16x16xf32>
    %408 = arith.mulf %407, %406 : vector<16x16xf32>
    %409 = arith.addf %399, %408 : vector<16x16xf32>
    %c33 = arith.constant 33 : index
    %410 = memref.load %arg1[%c33] : memref<98xf32, #tpu.memory_space<smem>>
    %c82 = arith.constant 82 : index
    %411 = memref.load %arg1[%c82] : memref<98xf32, #tpu.memory_space<smem>>
    %412 = vector.extract_strided_slice %368 {offsets = [4, 0], sizes = [16, 16], strides = [1, 1]} : vector<22x16xf32> to vector<16x16xf32>
    %413 = vector.broadcast %410 : f32 to vector<16x16xf32>
    %414 = arith.mulf %413, %412 : vector<16x16xf32>
    %415 = arith.addf %405, %414 : vector<16x16xf32>
    %416 = vector.extract_strided_slice %369 {offsets = [4, 0], sizes = [16, 16], strides = [1, 1]} : vector<22x16xf32> to vector<16x16xf32>
    %417 = vector.broadcast %411 : f32 to vector<16x16xf32>
    %418 = arith.mulf %417, %416 : vector<16x16xf32>
    %419 = arith.addf %409, %418 : vector<16x16xf32>
    %c40 = arith.constant 40 : index
    %420 = memref.load %arg1[%c40] : memref<98xf32, #tpu.memory_space<smem>>
    %c89 = arith.constant 89 : index
    %421 = memref.load %arg1[%c89] : memref<98xf32, #tpu.memory_space<smem>>
    %422 = vector.extract_strided_slice %368 {offsets = [5, 0], sizes = [16, 16], strides = [1, 1]} : vector<22x16xf32> to vector<16x16xf32>
    %423 = vector.broadcast %420 : f32 to vector<16x16xf32>
    %424 = arith.mulf %423, %422 : vector<16x16xf32>
    %425 = arith.addf %415, %424 : vector<16x16xf32>
    %426 = vector.extract_strided_slice %369 {offsets = [5, 0], sizes = [16, 16], strides = [1, 1]} : vector<22x16xf32> to vector<16x16xf32>
    %427 = vector.broadcast %421 : f32 to vector<16x16xf32>
    %428 = arith.mulf %427, %426 : vector<16x16xf32>
    %429 = arith.addf %419, %428 : vector<16x16xf32>
    %c47 = arith.constant 47 : index
    %430 = memref.load %arg1[%c47] : memref<98xf32, #tpu.memory_space<smem>>
    %c96 = arith.constant 96 : index
    %431 = memref.load %arg1[%c96] : memref<98xf32, #tpu.memory_space<smem>>
    %432 = vector.extract_strided_slice %368 {offsets = [6, 0], sizes = [16, 16], strides = [1, 1]} : vector<22x16xf32> to vector<16x16xf32>
    %433 = vector.broadcast %430 : f32 to vector<16x16xf32>
    %434 = arith.mulf %433, %432 : vector<16x16xf32>
    %435 = arith.addf %425, %434 : vector<16x16xf32>
    %436 = vector.extract_strided_slice %369 {offsets = [6, 0], sizes = [16, 16], strides = [1, 1]} : vector<22x16xf32> to vector<16x16xf32>
    %437 = vector.broadcast %431 : f32 to vector<16x16xf32>
    %438 = arith.mulf %437, %436 : vector<16x16xf32>
    %439 = arith.addf %429, %438 : vector<16x16xf32>
    %440 = vector.extract_strided_slice %3 {offsets = [0, 6], sizes = [22, 16], strides = [1, 1]} : vector<22x22xf32> to vector<22x16xf32>
    %441 = vector.extract_strided_slice %5 {offsets = [0, 6], sizes = [22, 16], strides = [1, 1]} : vector<22x22xf32> to vector<22x16xf32>
    %c6 = arith.constant 6 : index
    %442 = memref.load %arg1[%c6] : memref<98xf32, #tpu.memory_space<smem>>
    %c55 = arith.constant 55 : index
    %443 = memref.load %arg1[%c55] : memref<98xf32, #tpu.memory_space<smem>>
    %444 = vector.extract_strided_slice %440 {offsets = [0, 0], sizes = [16, 16], strides = [1, 1]} : vector<22x16xf32> to vector<16x16xf32>
    %445 = vector.broadcast %442 : f32 to vector<16x16xf32>
    %446 = arith.mulf %445, %444 : vector<16x16xf32>
    %447 = arith.addf %435, %446 : vector<16x16xf32>
    %448 = vector.extract_strided_slice %441 {offsets = [0, 0], sizes = [16, 16], strides = [1, 1]} : vector<22x16xf32> to vector<16x16xf32>
    %449 = vector.broadcast %443 : f32 to vector<16x16xf32>
    %450 = arith.mulf %449, %448 : vector<16x16xf32>
    %451 = arith.addf %439, %450 : vector<16x16xf32>
    %c13 = arith.constant 13 : index
    %452 = memref.load %arg1[%c13] : memref<98xf32, #tpu.memory_space<smem>>
    %c62 = arith.constant 62 : index
    %453 = memref.load %arg1[%c62] : memref<98xf32, #tpu.memory_space<smem>>
    %454 = vector.extract_strided_slice %440 {offsets = [1, 0], sizes = [16, 16], strides = [1, 1]} : vector<22x16xf32> to vector<16x16xf32>
    %455 = vector.broadcast %452 : f32 to vector<16x16xf32>
    %456 = arith.mulf %455, %454 : vector<16x16xf32>
    %457 = arith.addf %447, %456 : vector<16x16xf32>
    %458 = vector.extract_strided_slice %441 {offsets = [1, 0], sizes = [16, 16], strides = [1, 1]} : vector<22x16xf32> to vector<16x16xf32>
    %459 = vector.broadcast %453 : f32 to vector<16x16xf32>
    %460 = arith.mulf %459, %458 : vector<16x16xf32>
    %461 = arith.addf %451, %460 : vector<16x16xf32>
    %c20 = arith.constant 20 : index
    %462 = memref.load %arg1[%c20] : memref<98xf32, #tpu.memory_space<smem>>
    %c69 = arith.constant 69 : index
    %463 = memref.load %arg1[%c69] : memref<98xf32, #tpu.memory_space<smem>>
    %464 = vector.extract_strided_slice %440 {offsets = [2, 0], sizes = [16, 16], strides = [1, 1]} : vector<22x16xf32> to vector<16x16xf32>
    %465 = vector.broadcast %462 : f32 to vector<16x16xf32>
    %466 = arith.mulf %465, %464 : vector<16x16xf32>
    %467 = arith.addf %457, %466 : vector<16x16xf32>
    %468 = vector.extract_strided_slice %441 {offsets = [2, 0], sizes = [16, 16], strides = [1, 1]} : vector<22x16xf32> to vector<16x16xf32>
    %469 = vector.broadcast %463 : f32 to vector<16x16xf32>
    %470 = arith.mulf %469, %468 : vector<16x16xf32>
    %471 = arith.addf %461, %470 : vector<16x16xf32>
    %c27 = arith.constant 27 : index
    %472 = memref.load %arg1[%c27] : memref<98xf32, #tpu.memory_space<smem>>
    %c76 = arith.constant 76 : index
    %473 = memref.load %arg1[%c76] : memref<98xf32, #tpu.memory_space<smem>>
    %474 = vector.extract_strided_slice %440 {offsets = [3, 0], sizes = [16, 16], strides = [1, 1]} : vector<22x16xf32> to vector<16x16xf32>
    %475 = vector.broadcast %472 : f32 to vector<16x16xf32>
    %476 = arith.mulf %475, %474 : vector<16x16xf32>
    %477 = arith.addf %467, %476 : vector<16x16xf32>
    %478 = vector.extract_strided_slice %441 {offsets = [3, 0], sizes = [16, 16], strides = [1, 1]} : vector<22x16xf32> to vector<16x16xf32>
    %479 = vector.broadcast %473 : f32 to vector<16x16xf32>
    %480 = arith.mulf %479, %478 : vector<16x16xf32>
    %481 = arith.addf %471, %480 : vector<16x16xf32>
    %c34 = arith.constant 34 : index
    %482 = memref.load %arg1[%c34] : memref<98xf32, #tpu.memory_space<smem>>
    %c83 = arith.constant 83 : index
    %483 = memref.load %arg1[%c83] : memref<98xf32, #tpu.memory_space<smem>>
    %484 = vector.extract_strided_slice %440 {offsets = [4, 0], sizes = [16, 16], strides = [1, 1]} : vector<22x16xf32> to vector<16x16xf32>
    %485 = vector.broadcast %482 : f32 to vector<16x16xf32>
    %486 = arith.mulf %485, %484 : vector<16x16xf32>
    %487 = arith.addf %477, %486 : vector<16x16xf32>
    %488 = vector.extract_strided_slice %441 {offsets = [4, 0], sizes = [16, 16], strides = [1, 1]} : vector<22x16xf32> to vector<16x16xf32>
    %489 = vector.broadcast %483 : f32 to vector<16x16xf32>
    %490 = arith.mulf %489, %488 : vector<16x16xf32>
    %491 = arith.addf %481, %490 : vector<16x16xf32>
    %c41 = arith.constant 41 : index
    %492 = memref.load %arg1[%c41] : memref<98xf32, #tpu.memory_space<smem>>
    %c90 = arith.constant 90 : index
    %493 = memref.load %arg1[%c90] : memref<98xf32, #tpu.memory_space<smem>>
    %494 = vector.extract_strided_slice %440 {offsets = [5, 0], sizes = [16, 16], strides = [1, 1]} : vector<22x16xf32> to vector<16x16xf32>
    %495 = vector.broadcast %492 : f32 to vector<16x16xf32>
    %496 = arith.mulf %495, %494 : vector<16x16xf32>
    %497 = arith.addf %487, %496 : vector<16x16xf32>
    %498 = vector.extract_strided_slice %441 {offsets = [5, 0], sizes = [16, 16], strides = [1, 1]} : vector<22x16xf32> to vector<16x16xf32>
    %499 = vector.broadcast %493 : f32 to vector<16x16xf32>
    %500 = arith.mulf %499, %498 : vector<16x16xf32>
    %501 = arith.addf %491, %500 : vector<16x16xf32>
    %c48 = arith.constant 48 : index
    %502 = memref.load %arg1[%c48] : memref<98xf32, #tpu.memory_space<smem>>
    %c97 = arith.constant 97 : index
    %503 = memref.load %arg1[%c97] : memref<98xf32, #tpu.memory_space<smem>>
    %504 = vector.extract_strided_slice %440 {offsets = [6, 0], sizes = [16, 16], strides = [1, 1]} : vector<22x16xf32> to vector<16x16xf32>
    %505 = vector.broadcast %502 : f32 to vector<16x16xf32>
    %506 = arith.mulf %505, %504 : vector<16x16xf32>
    %507 = arith.addf %497, %506 : vector<16x16xf32>
    %508 = vector.extract_strided_slice %441 {offsets = [6, 0], sizes = [16, 16], strides = [1, 1]} : vector<22x16xf32> to vector<16x16xf32>
    %509 = vector.broadcast %503 : f32 to vector<16x16xf32>
    %510 = arith.mulf %509, %508 : vector<16x16xf32>
    %511 = arith.addf %501, %510 : vector<16x16xf32>
    %512 = arith.addf %507, %511 : vector<16x16xf32>
    %513 = arith.negf %512 : vector<16x16xf32>
    %514 = math.exp %513 : vector<16x16xf32>
    %cst_5 = arith.constant 1.000000e+00 : f32
    %515 = vector.broadcast %cst_5 : f32 to vector<16x16xf32>
    %516 = arith.addf %515, %514 : vector<16x16xf32>
    %517 = arith.divf %515, %516 : vector<16x16xf32>
    %c0_6 = arith.constant 0 : index
    %c0_7 = arith.constant 0 : index
    %c0_8 = arith.constant 0 : index
    %c0_9 = arith.constant 0 : index
    %518 = vector.load %arg3[%c0_6, %c0_7, %c0_8, %c0_9] : memref<1x1x16x16xf32, #tpu.memory_space<vmem>>, vector<1x1x16x16xf32>
    %519 = vector.shape_cast %518 : vector<1x1x16x16xf32> to vector<16x16xf32>
    %520 = vector.shape_cast %517 : vector<16x16xf32> to vector<1x1x16x16xf32>
    tpu.vector_store %arg3[%c0_6, %c0_7, %c0_8, %c0_9], %520 {strides = array<i32>} : memref<1x1x16x16xf32, #tpu.memory_space<vmem>>, vector<1x1x16x16xf32>,
    return
  }
  func.func @transform_0(%arg0: i32, %arg1: memref<98xf32, #tpu.memory_space<smem>>) -> (i32, i32, i32, i32) {
    %c0_i32 = arith.constant 0 : i32
    %c0_i32_0 = arith.constant 0 : i32
    %c0_i32_1 = arith.constant 0 : i32
    %c0_i32_2 = arith.constant 0 : i32
    return %arg0, %c0_i32, %c0_i32_0, %c0_i32_1 : i32, i32, i32, i32
  }
  func.func @transform_1(%arg0: i32, %arg1: memref<98xf32, #tpu.memory_space<smem>>) -> (i32, i32, i32, i32) {
    %c0_i32 = arith.constant 0 : i32
    %c0_i32_0 = arith.constant 0 : i32
    %c0_i32_1 = arith.constant 0 : i32
    %c0_i32_2 = arith.constant 0 : i32
    return %arg0, %c0_i32, %c0_i32_0, %c0_i32_1 : i32, i32, i32, i32
  }
}

</mosaic_0001>

<bundles_post_ra>
// kernel: spatial_attention.2
= control target key start
LH: loop header
LB: loop body
LE: loop exit
PB: predicated region body
PF: predicated region fallthrough
CT: control target
= control target key end

     0   :  { %s441_s6 = smov 0   ;;  %s443_s7 = smov 0   ;;  %s521_s0 = inlined_call_operand.vmem [shape: f32[2,20,256], index: 0, kind: input, shape index: {}]   ;;  %s522_s1 = inlined_call_operand.vmem [shape: f32[2,2,256], index: 1, kind: output, shape index: {}]  }
   0x1   :  { %s445_s8 = smov 0   ;;  %s447_s9 = smov 0  }
   0x2   :  { %s449_s10 = smov 0   ;;  %s451_s11 = smov 0  }
   0x3   :  { %s453_s12 = smov 0  }
   0x4 LB: > { %s23_s13 = sadd.s32 1, %s417_s9  ;;  %s26_s14 = sadd.s32 1, %s421_s10  ;;  %s429_s12 = sphi %s453_s12, %s11_s12   ;;  %s425_s11 = sphi %s451_s11, %s528_s11   ;;  %s421_s10 = sphi %s449_s10, %s527_s10   ;;  %s417_s9 = sphi %s447_s9, %s526_s9   ;;  %s413_s8 = sphi %s445_s8, %s525_s8   ;;  %s409_s7 = sphi %s443_s7, %s524_s7   ;;  %s405_s6 = sphi %s441_s6, %s523_s6  }
   0x5   : > { %p24_p0 = scmp.ge.s32.totalorder %s23_s13, 3  ;;  %p308_p1 = scmp.ge.s32.totalorder %s429_s12, 1 }
   0x6   : > { %p119_p2 = scmp.lt.s32.totalorder %s429_s12, 13  ;;  %s30_s15 = sadd.s32 1, %s425_s11 }
   0x7   : > { %s530_s13 = smov (%p24_p0, %s23_s13), 0  ;;  %s532_s14 = smov (!%p24_p0, %s26_s14), %s421_s10 }
   0x8   : > { %p120_p3 = pnand %p308_p1, %p119_p2  ;;  %p28_p4 = scmp.ge.s32.totalorder %s532_s14, 2 }
   0x9   : > { %p149_p6 = scmp.lt.s32.totalorder (!%p120_p3), %s413_s8, 1  ;;  %p151_p7 = scmp.lt.s32.totalorder (!%p120_p3), %s405_s6, 2 }
   0xa   : > { %s534_s14 = smov (%p28_p4, %s532_s14), 0  ;;  %s536_s15 = smov (!%p28_p4, %s30_s15), %s425_s11 }
   0xb   : > { %p32_p5 = scmp.ge.s32.totalorder %s536_s15, 2  ;;  %123 = sbr.rel (%p120_p3) target bundleno = 50 (0x32), region = 24 }
   0xc   : > { %p153_p8 = scmp.lt.s32.totalorder (!%p120_p3), %s409_s7, 1  ;;  %s313_s16 = sshll.u32 (!%p120_p3), %s405_s6, 3 }
   0xd   : > { %s538_s15 = smov (%p32_p5, %s536_s15), 0  ;;  %p314_p9 = scmp.ne.s32.totalorder (!%p120_p3), %s405_s6, 0 }
  0x10   : > { %v171_v0 = vlaneseq  ;;  %s540_s8 = smov (!%p149_p6, %s413_s8), 1  ;;  %v173_v2 = vstv %s313_s16  ;;  %s542_s7 = smov (!%p153_p8, %s409_s7), 1 }
  0x11   : > { %s152_s17 = scalar_select %p151_p7, %s405_s6, 2 }
  0x12   : > { %v172_v1 = vshrl.u32 %v171_v0, 7  ;;  %s318_s19 = smul.u32 6, %s540_s8  ;;  %s311_s21 = sshll.u32 %s540_s8, 1 }
  0x13   : > { %s309_s18 = sshll.u32 %s152_s17, 1  ;;  %s166_s23 = sadd.s32 %s311_s21, %s542_s7 }
  0x14   : > { %v174_v3 = vadd.s32 %v173_v2, %v172_v1  ;;  %s156_s20 = sadd.s32 %s309_s18, %s542_s7  ;;  %s312_s25 = sshll.u32 %s166_s23, 1 }
  0x15   : > { %s158_s22 = sadd.s32 %s318_s19, %s156_s20  ;;  %s168_s2 = scalar_lea.vmem %s522_s1, %s312_s25 }
  0x16   : > { %s310_s24 = sshll.u32 %s158_s22, 3  ;;  %vm175_vm0 = vcmp.lt.s32.totalorder %v174_v3, 20 }
  0x17   : > { %s160_s28 = scalar_lea.vmem %s521_s0, %s310_s24 }
  0x18   : > { %v169_v4 = vld [vmem:[%s160_s28] sm:$0xff] }
  0x19   : > { %v176_v5 = vsel %vm175_vm0, %v169_v4, 0.0  ;;  %v177_v6 = vsel %vm175_vm0, %v169_v4, -inf }
  0x1a   : > { %v178_v7 = vrot.slane %v176_v5, 4  ;;  %v184_v8 = vrot.slane %v177_v6, 4 }
  0x1c   : > { %v179_v9 = vadd.f32 %v178_v7, %v176_v5  ;;  %v185_v10 = vmax.f32 %v177_v6, %v184_v8 }
  0x1e   : > { %v180_v11 = vrot.slane %v179_v9, 2  ;;  %v186_v12 = vrot.slane %v185_v10, 2 }
  0x20   : > { %v181_v13 = vadd.f32 %v180_v11, %v179_v9  ;;  %v187_v14 = vmax.f32 %v185_v10, %v186_v12  ;;  %193 = sbr.rel (%p314_p9) target bundleno = 39 (0x27), region = 28 }
  0x22   : > { %v182_v15 = vrot.slane %v181_v13, 1  ;;  %v188_v16 = vrot.slane %v187_v14, 1 }
  0x24   : > { %v183_v17 = vadd.f32 %v182_v15, %v181_v13  ;;  %v189_v18 = vmax.f32 %v187_v14, %v188_v16 }
  0x26   : > { %194 = vst [vmem:[%s168_s2] sm:$0x1] %v183_v17  ;;  %195 = vst [vmem:[%s168_s2 + $0x1] sm:$0x1] %v189_v18 }
  0x27 PF: > { %p315_p10 = scmp.le.s32.totalorder %s405_s6, 0 }
  0x29   : > { %199 = sbr.rel (%p315_p10) target bundleno = 50 (0x32), region = 32 }
  0x2e   : > { %v200_v19 = vld [vmem:[%s168_s2] sm:$0x1]  ;;  %v203_v20 = vld [vmem:[%s168_s2 + $0x1] sm:$0x1] }
  0x2f   : > { %v201_v21 = vadd.f32 %v200_v19, %v183_v17  ;;  %v204_v22 = vmax.f32 %v203_v20, %v189_v18 }
  0x31   : > { %202 = vst [vmem:[%s168_s2] sm:$0x1] %v201_v21  ;;  %205 = vst [vmem:[%s168_s2 + $0x1] sm:$0x1] %v204_v22 }
  0x32 PF: > { %s11_s12 = sadd.s32 1, %s429_s12   ;;  %s523_s6 = smov %s417_s9 }
  0x33   : > { %p8_p11 = scmp.ge.s32.totalorder %s11_s12, 14   ;;  %s524_s7 = smov %s421_s10 }
  0x34   : > { %s525_s8 = smov %s425_s11  ;;  %s526_s9 = smov %s530_s13 }
  0x35   : > { %s527_s10 = smov %s534_s14  ;;  %s528_s11 = smov %s538_s15 }
  0x36   :  { %10 = sbr.rel (!%p8_p11) target bundleno = 4 (0x4), region = 62 }

// kernel: spatial_attention.3
= control target key start
LH: loop header
LB: loop body
LE: loop exit
PB: predicated region body
PF: predicated region fallthrough
CT: control target
= control target key end

     0   :  { %s3759_s0 = inlined_call_operand.vmem [shape: f32[98], index: 0, kind: input, shape index: {}]   ;;  %s3760_s1 = inlined_call_operand.vmem [shape: f32[2,2,22,22], index: 1, kind: input, shape index: {}]   ;;  %s3761_s2 = inlined_call_operand.hbm [shape: f32[2,1,16,16], index: 2, kind: output, shape index: {}]  }
   0x1   :  { %s7_s11 = sshll.u32 %s3759_s0, 4  ;;  %s8_s11 = int_to_ptr.vmem [resolvable:$true] %s7_s11 }
   0x2   :  { %s2303_s12 = scalar_lea.vmem %s8_s11, 16  ;;  %p2308_p1 = scmp.lt.s32.totalorder %s8_s11, %s8_s11 }
   0x3   :  { %p2304_p0 = scmp.ne.s32.totalorder %s8_s11, %s2303_s12  ;;  %p2309_p2 = scmp.lt.s32.totalorder %s2303_s12, %s2303_s12 }
   0x5   :  { %p2310_p3 = por %p2309_p2, %p2308_p1 }
   0x7   :  { %p2311_p4 = pnand %p2310_p3, %p2304_p0 }
   0x9   :  { %2314 = shalt.err (!%p2311_p4)  }
   0xa   :  { %s2379_s13 = smov [#allocation3]  }
   0xb   :  { %10 = dma.vmem_to_smem %s8_s11, 16, %s2379_s13, [#allocation2] }
   0xc   :  { %2357 = dma.done.wait [#allocation2], 16 }
   0xd   :  { %2358 = vsyncadd [#allocation2], 4294967280 }
   0xe   :  { %12 = sfence }
   0xf   :  { %13 = vsyncpa [#allocation5], 0 }
  0x10   :  { %15 = vsyncpa [#allocation5 + $0x1], 0  ;;  %s2407_s14 = smov 0   ;;  %s2409_s15 = smov 0  }
  0x11   :  { %s2411_s0 = smov 0   ;;  %s2413_s16 = smov 0  }
  0x12 LB: > { %s2428_s17 = sadd.s32 4294967295, %s2377_s16   ;;  %s2123_s18 = sadd.s32 4294967294, %s2377_s16   ;;  %s2377_s16 = sphi %s2413_s16, %s3864_s16   ;;  %s2373_s0 = sphi %s2411_s0, %s3863_s0   ;;  %s2369_s15 = sphi %s2409_s15, %s3862_s15   ;;  %s2365_s14 = sphi %s2407_s14, %s3861_s14  }
  0x13   : > { %s2432_s19 = sadd.s32 1, %s2377_s16   ;;  %s54_s20 = sadd.s32 1, %s2373_s0 }
  0x14   : > { %s51_s21 = ssub.s32 %s2377_s16, %s2432_s19  ;;  %p64_p5 = scmp.ne.s32.totalorder %s2373_s0, %s2369_s15 }
  0x15   : > { %p52_p6 = scmp.eq.s32.totalorder %s51_s21, 0  ;;  %p65_p7 = scmp.eq.s32.totalorder %s2428_s17, 1 }
  0x16   : > { %p70_p8 = scmp.ne.s32.totalorder %s2369_s15, %s2365_s14  ;;  %p71_p9 = scmp.eq.s32.totalorder %s2123_s18, 1 }
  0x17   : > { %s2443_s22 = scalar_select %p52_p6, %s2373_s0, %s54_s20  }
  0x18   : > { %p2445_p10 = por %p65_p7, %p64_p5  ;;  %p2449_p11 = por %p71_p9, %p70_p8 }
  0x19   : > { %p2126_p12 = scmp.ge.s32.totalorder %s2377_s16, 1  ;;  %p97_p13 = scmp.lt.s32.totalorder %s2377_s16, 3 }
  0x1b   : > { %p98_p0 = pnand %p2126_p12, %p97_p13 }
  0x1d   : > { %101 = sbr.rel (%p98_p0) target bundleno = 542 (0x21e), region = 24 }
  0x22   : > { %p117_p1 = scmp.lt.s32.totalorder %s2428_s17, 1  ;;  %s2143_s25 = sld [smem:[#allocation3 + $0x32]]  ;;  %vm149_vm0 = vcmask 1046528   ;;  %vm184_vm1 = vcmask 1045504   ;;  %vm219_vm2 = vcmask 1044480   ;;  %vm254_vm3 = vcmask 1043456  }
  0x23   : > { %s2142_s26 = sld [smem:[#allocation3 + $0x1]]  ;;  %s2380_s8 = smov 127   ;;  %vm289_vm4 = vcmask 1042432   ;;  %vm324_vm5 = vcmask 1041408   ;;  %vm2044_vm6 = vcmask 130048  }
  0x24   : > { %s118_s27 = scalar_select %p117_p1, %s2428_s17, 1 }
  0x25   : > { %s2144_s28 = sld [smem:[#allocation3 + $0x8]] }
  0x26   : > { %s2234_s29 = smul.u32 48, %s118_s27  ;;  %s2145_s30 = sld [smem:[#allocation3 + $0x39]] }
  0x27   : > { %s2146_s3 = sld [smem:[#allocation3 + $0xf]] }
  0x28   : > { %s2460_s6 = scalar_lea.vmem %s3760_s1, %s2234_s29  ;;  %v365_v0 = vstv %s2143_s25  ;;  %s2471_s7 = sld [smem:[#allocation3 + $0x40]] }
  0x29   : > { %v2463_v1 = vld [vmem:[%s2460_s6 + $0x18] sm:$0xff]  ;;  %v2466_v2 = vld [vmem:[%s2460_s6 + $0x20] sm:$0xff]  ;;  %v352_v4 = vstv %s2142_s26  ;;  %v2475_v6 = vld [vmem:[%s2460_s6 + $0x8] sm:$0xff]  ;;  %s2148_s9 = sld [smem:[#allocation3 + $0x16]] }
  0x2a   : > { %v2469_v3 = vld [vmem:[%s2460_s6] sm:$0xff]  ;;  %v366_v5 = vmul.f32 %v365_v0, %v2463_v1  ;;  %v2479_v8 = vld [vmem:[%s2460_s6 + $0x10] sm:$0x3f]  ;;  %v2482_v9 = vld [vmem:[%s2460_s6 + $0x28] sm:$0x3f]  ;;  %v367_v10 = vmul.f32 %v365_v0, %v2466_v2  ;;  %v354_v11 = vmul.f32 %v352_v4, %v2475_v6  ;;  %s2149_s10 = sld [smem:[#allocation3 + $0x47]] }
  0x2b   : > { %v353_v7 = vmul.f32 %v352_v4, %v2469_v3  ;;  %v380_v12 = vstv %s2144_s28  ;;  %s2150_s11 = sld [smem:[#allocation3 + $0x1d]] }
  0x2c   : > { %370 = vrot.lane.b32.xlu1 %v366_v5, %s2380_s8  ;;  %v382_v13 = vmul.f32 %v380_v12, %v2475_v6  ;;  %v383_v14 = vmul.f32 %v380_v12, %v2479_v8  ;;  %v381_v15 = vmul.f32 %v380_v12, %v2469_v3  ;;  %v400_v16 = vstv %s2145_s30  ;;  %s2151_s12 = sld [smem:[#allocation3 + $0x4e]] }
  0x2d   : > { %357 = vrot.lane.b32.xlu0 %v353_v7, %s2380_s8  ;;  %v402_v17 = vmul.f32 %v400_v16, %v2466_v2  ;;  %v403_v18 = vmul.f32 %v400_v16, %v2482_v9  ;;  %v401_v19 = vmul.f32 %v400_v16, %v2463_v1  ;;  %v422_v20 = vstv %s2146_s3  ;;  %s2152_s13 = sld [smem:[#allocation3 + $0x24]]  ;;  %s2381_s3 = smov 126  }
  0x2e   : > { %v388_v21 = vrot.slane %v382_v13, 1  ;;  %v390_v22 = vrot.slane %v383_v14, 1  ;;  %v387_v23 = vrot.slane %v381_v15, 1  ;;  %v424_v24 = vmul.f32 %v422_v20, %v2475_v6  ;;  %s2153_s18 = sld [smem:[#allocation3 + $0x55]] }
  0x2f   : > { %v425_v25 = vmul.f32 %v422_v20, %v2479_v8  ;;  %v408_v26 = vrot.slane %v402_v17, 1  ;;  %v410_v27 = vrot.slane %v403_v18, 1  ;;  %v407_v28 = vrot.slane %v401_v19, 1  ;;  %s2154_s20 = sld [smem:[#allocation3 + $0x2b]] }
  0x30   : > { %372 = vrot.lane.b32.xlu1 %v367_v10, %s2380_s8  ;;  %v391_v29 = vsel %vm149_vm0, %v388_v21, %v390_v22  ;;  %v389_v30 = vsel %vm149_vm0, %v387_v23, %v388_v21  ;;  %v423_v31 = vmul.f32 %v422_v20, %v2469_v3  ;;  %v442_v32 = vstv %s2471_s7  ;;  %s2155_s21 = sld [smem:[#allocation3 + $0x5c]] }
  0x31   : > { %359 = vrot.lane.b32.xlu0 %v354_v11, %s2380_s8  ;;  %v430_v33 = vrot.slane %v424_v24, 2  ;;  %v432_v34 = vrot.slane %v425_v25, 2  ;;  %v444_v35 = vmul.f32 %v442_v32, %v2466_v2  ;;  %v445_v36 = vmul.f32 %v442_v32, %v2482_v9  ;;  %s2156_s25 = sld [smem:[#allocation3 + $0x2]] }
  0x32   : > { %v443_v37 = vmul.f32 %v442_v32, %v2463_v1  ;;  %v411_v38 = vsel %vm149_vm0, %v408_v26, %v410_v27  ;;  %v409_v39 = vsel %vm149_vm0, %v407_v28, %v408_v26  ;;  %v429_v40 = vrot.slane %v423_v31, 2  ;;  %s2158_s26 = sld [smem:[#allocation3 + $0x9]] }
  0x33   : > { %v464_v41 = vstv %s2148_s9  ;;  %v433_v42 = vsel %vm184_vm1, %v430_v33, %v432_v34  ;;  %v450_v43 = vrot.slane %v444_v35, 2  ;;  %v452_v44 = vrot.slane %v445_v36, 2  ;;  %s2565_s27 = sld [smem:[#allocation3 + $0x33]] }
  0x34   : > { %394 = vrot.lane.b32.xlu1 %v391_v29, %s2380_s8  ;;  %v449_v45 = vrot.slane %v443_v37, 2  ;;  %v484_v46 = vstv %s2149_s10  ;;  %v431_v47 = vsel %vm184_vm1, %v429_v40, %v430_v33  ;;  %v466_v48 = vmul.f32 %v464_v41, %v2475_v6  ;;  %s2159_s28 = sld [smem:[#allocation3 + $0x3a]] }
  0x35   : > { %392 = vrot.lane.b32.xlu0 %v389_v30, %s2380_s8  ;;  %v467_v49 = vmul.f32 %v464_v41, %v2479_v8  ;;  %v465_v50 = vmul.f32 %v464_v41, %v2469_v3  ;;  %v486_v51 = vmul.f32 %v484_v46, %v2466_v2  ;;  %v453_v52 = vsel %vm184_vm1, %v450_v43, %v452_v44  ;;  %s2160_s29 = sld [smem:[#allocation3 + $0x10]] }
  0x36   : > { %v451_v53 = vsel %vm184_vm1, %v449_v45, %v450_v43  ;;  %v487_v54 = vmul.f32 %v484_v46, %v2482_v9  ;;  %v506_v55 = vstv %s2150_s11  ;;  %v472_v56 = vrot.slane %v466_v48, 3  ;;  %s2161_s30 = sld [smem:[#allocation3 + $0x41]] }
  0x37   : > { %v474_v57 = vrot.slane %v467_v49, 3  ;;  %v471_v58 = vrot.slane %v465_v50, 3  ;;  %v485_v59 = vmul.f32 %v484_v46, %v2463_v1  ;;  %v492_v60 = vrot.slane %v486_v51, 3  ;;  %s2162_s4 = sld [smem:[#allocation3 + $0x17]] }
  0x38   : > { %414 = vrot.lane.b32.xlu1 %v411_v38, %s2380_s8  ;;  %v494_v61 = vrot.slane %v487_v54, 3  ;;  %v508_v62 = vmul.f32 %v506_v55, %v2475_v6  ;;  %v509_v63 = vmul.f32 %v506_v55, %v2479_v8  ;;  %v526_v0 = vstv %s2151_s12  ;;  %s2163_s5 = sld [smem:[#allocation3 + $0x48]] }
  0x39   : > { %412 = vrot.lane.b32.xlu0 %v409_v39, %s2380_s8  ;;  %v475_v4 = vsel %vm219_vm2, %v472_v56, %v474_v57  ;;  %v473_v5 = vsel %vm219_vm2, %v471_v58, %v472_v56  ;;  %v491_v7 = vrot.slane %v485_v59, 3  ;;  %v507_v10 = vmul.f32 %v506_v55, %v2469_v3  ;;  %s2164_s7 = sld [smem:[#allocation3 + $0x1e]] }
  0x3a   : > { %v528_v11 = vmul.f32 %v526_v0, %v2466_v2  ;;  %v529_v12 = vmul.f32 %v526_v0, %v2482_v9  ;;  %v514_v13 = vrot.slane %v508_v62, 4  ;;  %v516_v14 = vrot.slane %v509_v63, 4  ;;  %s2166_s9 = sld [smem:[#allocation3 + $0x25]] }
  0x3b   : > { %v527_v15 = vmul.f32 %v526_v0, %v2463_v1  ;;  %v495_v16 = vsel %vm219_vm2, %v492_v60, %v494_v61  ;;  %v493_v17 = vsel %vm219_vm2, %v491_v7, %v492_v60  ;;  %v513_v18 = vrot.slane %v507_v10, 4  ;;  %s2167_s10 = sld [smem:[#allocation3 + $0x56]] }
  0x3c   : > { %436 = vrot.lane.b32.xlu1 %v433_v42, %s2380_s8  ;;  %v548_v19 = vstv %s2152_s13  ;;  %v534_v20 = vrot.slane %v528_v11, 4  ;;  %v536_v21 = vrot.slane %v529_v12, 4  ;;  %v517_v22 = vsel %vm254_vm3, %v514_v13, %v516_v14  ;;  %s2168_s11 = sld [smem:[#allocation3 + $0x2c]] }
  0x3d   : > { %434 = vrot.lane.b32.xlu0 %v431_v47, %s2380_s8  ;;  %v533_v23 = vrot.slane %v527_v15, 4  ;;  %v568_v24 = vstv %s2153_s18  ;;  %v515_v25 = vsel %vm254_vm3, %v513_v18, %v514_v13  ;;  %v550_v26 = vmul.f32 %v548_v19, %v2475_v6  ;;  %s2169_s12 = sld [smem:[#allocation3 + $0x5d]] }
  0x3e   : > { %v551_v27 = vmul.f32 %v548_v19, %v2479_v8  ;;  %v549_v28 = vmul.f32 %v548_v19, %v2469_v3  ;;  %v537_v29 = vsel %vm254_vm3, %v534_v20, %v536_v21  ;;  %v570_v30 = vmul.f32 %v568_v24, %v2466_v2  ;;  %s2172_s13 = sld [smem:[#allocation3 + $0xa]] }
  0x3f   : > { %v535_v31 = vsel %vm254_vm3, %v533_v23, %v534_v20  ;;  %v571_v32 = vmul.f32 %v568_v24, %v2482_v9  ;;  %v569_v33 = vmul.f32 %v568_v24, %v2463_v1  ;;  %v556_v34 = vrot.slane %v550_v26, 5  ;;  %s2170_s18 = sld [smem:[#allocation3 + $0x3]] }
  0x40   : > { %456 = vrot.lane.b32.xlu1 %v453_v52, %s2380_s8  ;;  %v558_v35 = vrot.slane %v551_v27, 5  ;;  %v555_v36 = vrot.slane %v549_v28, 5  ;;  %v590_v37 = vstv %s2154_s20  ;;  %v576_v38 = vrot.slane %v570_v30, 5  ;;  %s2171_s20 = sld [smem:[#allocation3 + $0x34]] }
  0x41   : > { %454 = vrot.lane.b32.xlu0 %v451_v53, %s2380_s8  ;;  %v578_v39 = vrot.slane %v571_v32, 5  ;;  %v575_v40 = vrot.slane %v569_v33, 5  ;;  %v592_v41 = vmul.f32 %v590_v37, %v2475_v6  ;;  %v610_v42 = vstv %s2155_s21  ;;  %s2173_s21 = sld [smem:[#allocation3 + $0x3b]] }
  0x42   : > { %v559_v43 = vsel %vm289_vm4, %v556_v34, %v558_v35  ;;  %v557_v44 = vsel %vm289_vm4, %v555_v36, %v556_v34  ;;  %v593_v45 = vmul.f32 %v590_v37, %v2479_v8  ;;  %v591_v46 = vmul.f32 %v590_v37, %v2469_v3 }
  0x43   : > { %v579_v47 = vsel %vm289_vm4, %v576_v38, %v578_v39  ;;  %v577_v48 = vsel %vm289_vm4, %v575_v40, %v576_v38  ;;  %v598_v49 = vrot.slane %v592_v41, 6  ;;  %v612_v50 = vmul.f32 %v610_v42, %v2466_v2 }
  0x44   : > { %478 = vrot.lane.b32.xlu1 %v475_v4, %s2380_s8  ;;  %v600_v51 = vrot.slane %v593_v45, 6  ;;  %v597_v52 = vrot.slane %v591_v46, 6  ;;  %v613_v53 = vmul.f32 %v610_v42, %v2482_v9  ;;  %v611_v54 = vmul.f32 %v610_v42, %v2463_v1 }
  0x45   : > { %476 = vrot.lane.b32.xlu0 %v473_v5, %s2380_s8  ;;  %v618_v55 = vrot.slane %v612_v50, 6  ;;  %v632_v62 = vstv %s2156_s25  ;;  %v660_v63 = vstv %s2158_s26  ;;  %v645_v5 = vstv %s2565_s27  ;;  %s2174_s25 = sld [smem:[#allocation3 + $0x11]]  ;;  %s2382_s27 = smov 125  }
  0x46   : > { %v601_v56 = vsel %vm324_vm5, %v598_v49, %v600_v51  ;;  %v599_v57 = vsel %vm324_vm5, %v597_v52, %v598_v49  ;;  %v620_v58 = vrot.slane %v613_v53, 6  ;;  %v617_v59 = vrot.slane %v611_v54, 6  ;;  %s2175_s26 = sld [smem:[#allocation3 + $0x42]] }
  0x47   : > { %v634_v0 = vmul.f32 %v632_v62, %v2475_v6  ;;  %v633_v4 = vmul.f32 %v632_v62, %v2469_v3  ;;  %v680_v7 = vstv %s2159_s28  ;;  %v662_v10 = vmul.f32 %v660_v63, %v2475_v6  ;;  %s2176_s28 = sld [smem:[#allocation3 + $0x18]] }
  0x48   : > { %498 = vrot.lane.b32.xlu1 %v495_v16, %s2380_s8  ;;  %v621_v60 = vsel %vm324_vm5, %v618_v55, %v620_v58  ;;  %v619_v61 = vsel %vm324_vm5, %v617_v59, %v618_v55  ;;  %v663_v11 = vmul.f32 %v660_v63, %v2479_v8  ;;  %v661_v12 = vmul.f32 %v660_v63, %v2469_v3 }
  0x49   : > { %496 = vrot.lane.b32.xlu0 %v493_v17, %s2380_s8  ;;  %v647_v13 = vmul.f32 %v645_v5, %v2466_v2  ;;  %v682_v14 = vmul.f32 %v680_v7, %v2466_v2  ;;  %v646_v15 = vmul.f32 %v645_v5, %v2463_v1  ;;  %v683_v16 = vmul.f32 %v680_v7, %v2482_v9 }
  0x4a   : > { %v681_v17 = vmul.f32 %v680_v7, %v2463_v1  ;;  %v668_v18 = vrot.slane %v662_v10, 1  ;;  %v670_v19 = vrot.slane %v663_v11, 1  ;;  %v667_v20 = vrot.slane %v661_v12, 1 }
  0x4b   : > { %v702_v21 = vstv %s2160_s29  ;;  %v722_v23 = vstv %s2161_s30  ;;  %v690_v24 = vrot.slane %v683_v16, 1  ;;  %v744_v39 = vstv %s2162_s4  ;;  %s2177_s29 = sld [smem:[#allocation3 + $0x49]] }
  0x4c   : > { %520 = vrot.lane.b32.xlu1 %v517_v22, %s2380_s8  ;;  %v688_v22 = vrot.slane %v682_v14, 1  ;;  %v704_v26 = vmul.f32 %v702_v21, %v2475_v6  ;;  %v705_v27 = vmul.f32 %v702_v21, %v2479_v8  ;;  %v671_v28 = vsel %vm149_vm0, %v668_v18, %v670_v19  ;;  %s2178_s30 = sld [smem:[#allocation3 + $0x1f]] }
  0x4d   : > { %518 = vrot.lane.b32.xlu0 %v515_v25, %s2380_s8  ;;  %v687_v25 = vrot.slane %v681_v17, 1  ;;  %v703_v30 = vmul.f32 %v702_v21, %v2469_v3  ;;  %v725_v37 = vmul.f32 %v722_v23, %v2482_v9  ;;  %v723_v38 = vmul.f32 %v722_v23, %v2463_v1  ;;  %s2724_s4 = sld [smem:[#allocation3 + $0x26]] }
  0x4e   : > { %v691_v32 = vsel %vm149_vm0, %v688_v22, %v690_v24  ;;  %v710_v34 = vrot.slane %v704_v26, 2  ;;  %v712_v35 = vrot.slane %v705_v27, 2  ;;  %v746_v42 = vmul.f32 %v744_v39, %v2475_v6 }
  0x4f   : > { %v689_v33 = vsel %vm149_vm0, %v687_v25, %v688_v22  ;;  %v709_v36 = vrot.slane %v703_v30, 2  ;;  %v732_v46 = vrot.slane %v725_v37, 2  ;;  %v848_v26 = vstv %s2167_s10  ;;  %s2751_s10 = sld [smem:[#allocation3 + $0x46]] }
  0x50   : > { %540 = vrot.lane.b32.xlu1 %v537_v29, %s2380_s8  ;;  %v669_v29 = vsel %vm149_vm0, %v667_v20, %v668_v18  ;;  %v713_v41 = vsel %vm184_vm1, %v710_v34, %v712_v35  ;;  %v752_v51 = vrot.slane %v746_v42, 3  ;;  %v870_v35 = vstv %s2168_s11  ;;  %s2761_s11 = sld [smem:[#allocation3 + $0x2d]] }
  0x51   : > { %538 = vrot.lane.b32.xlu0 %v535_v31, %s2380_s8  ;;  %v724_v31 = vmul.f32 %v722_v23, %v2466_v2  ;;  %v711_v45 = vsel %vm184_vm1, %v709_v36, %v710_v34  ;;  %v849_v34 = vmul.f32 %v848_v26, %v2463_v1 }
  0x53   : > { %v730_v40 = vrot.slane %v724_v31, 2  ;;  %v850_v31 = vmul.f32 %v848_v26, %v2466_v2  ;;  %v855_v42 = vrot.slane %v849_v34, 5 }
  0x54   : > { %562 = vrot.lane.b32.xlu1 %v559_v43, %s2380_s8  ;;  %v747_v43 = vmul.f32 %v744_v39, %v2479_v8 }
  0x55   : > { %560 = vrot.lane.b32.xlu0 %v557_v44, %s2380_s8  ;;  %v764_v44 = vstv %s2163_s5  ;;  %v733_v54 = vsel %vm184_vm1, %v730_v40, %v732_v46  ;;  %s2736_s5 = sld [smem:[#allocation3 + $0x57]] }
  0x56   : > { %v766_v49 = vmul.f32 %v764_v44, %v2466_v2  ;;  %v767_v50 = vmul.f32 %v764_v44, %v2482_v9  ;;  %v754_v52 = vrot.slane %v747_v43, 3  ;;  %v765_v53 = vmul.f32 %v764_v44, %v2463_v1 }
  0x57   : > { %v871_v43 = vmul.f32 %v870_v35, %v2469_v3  ;;  %v890_v44 = vstv %s2169_s12  ;;  %s2763_s12 = sld [smem:[#allocation3 + $0x4d]] }
  0x58   : > { %582 = vrot.lane.b32.xlu1 %v579_v47, %s2380_s8  ;;  %v729_v47 = vrot.slane %v723_v38, 2  ;;  %v772_v58 = vrot.slane %v766_v49, 3  ;;  %v774_v59 = vrot.slane %v767_v50, 3  ;;  %v856_v38 = vrot.slane %v850_v31, 5 }
  0x59   : > { %580 = vrot.lane.b32.xlu0 %v577_v48, %s2380_s8  ;;  %v745_v48 = vmul.f32 %v744_v39, %v2469_v3  ;;  %v872_v39 = vmul.f32 %v870_v35, %v2475_v6 }
  0x5a   : > { %v731_v55 = vsel %vm184_vm1, %v729_v47, %v730_v40  ;;  %v775_v7 = vsel %vm219_vm2, %v772_v58, %v774_v59  ;;  %v873_v40 = vmul.f32 %v870_v35, %v2479_v8  ;;  %v892_v47 = vmul.f32 %v890_v44, %v2466_v2 }
  0x5b   : > { %v857_v50 = vsel %vm289_vm4, %v855_v42, %v856_v38 }
  0x5c   : > { %604 = vrot.lane.b32.xlu1 %v601_v56, %s2380_s8  ;;  %v751_v56 = vrot.slane %v745_v48, 3  ;;  %v880_v46 = vrot.slane %v873_v40, 6  ;;  %v893_v48 = vmul.f32 %v890_v44, %v2482_v9 }
  0x5d   : > { %602 = vrot.lane.b32.xlu0 %v599_v57, %s2380_s8  ;;  %v786_v57 = vstv %s2164_s7  ;;  %s2738_s7 = sld [smem:[#allocation3 + $0x31]] }
  0x5e   : > { %v753_v63 = vsel %vm219_vm2, %v751_v56, %v752_v51  ;;  %v787_v5 = vmul.f32 %v786_v57, %v2469_v3  ;;  %v900_v56 = vrot.slane %v893_v48, 6 }
  0x60   : > { %624 = vrot.lane.b32.xlu1 %v621_v60, %s2380_s8  ;;  %v755_v60 = vsel %vm219_vm2, %v752_v51, %v754_v52  ;;  %v793_v16 = vrot.slane %v787_v5, 4  ;;  %v877_v51 = vrot.slane %v871_v43, 6  ;;  %v891_v52 = vmul.f32 %v890_v44, %v2463_v1 }
  0x61   : > { %622 = vrot.lane.b32.xlu0 %v619_v61, %s2380_s8  ;;  %s2165_s8 = sld [smem:[#allocation3 + $0x4f]]  ;;  %v771_v61 = vrot.slane %v765_v53, 3 }
  0x63   : > { %v773_v10 = vsel %vm219_vm2, %v771_v61, %v772_v58  ;;  %v940_v58 = vstv %s2172_s13  ;;  %v912_v61 = vstv %s2170_s18  ;;  %s2769_s13 = sld [smem:[#allocation3 + $0x54]] }
  0x64   : > { %639 = vrot.lane.b32.xlu1 %v634_v0, %s2381_s3  ;;  %v788_v0 = vmul.f32 %v786_v57, %v2475_v6  ;;  %v943_v5 = vmul.f32 %v940_v58, %v2479_v8  ;;  %s2783_s18 = sld [smem:[#allocation3 + $0x5e]] }
  0x65   : > { %637 = vrot.lane.b32.xlu0 %v633_v4, %s2381_s3  ;;  %v789_v4 = vmul.f32 %v786_v57, %v2479_v8  ;;  %v897_v57 = vrot.slane %v891_v52, 6  ;;  %v1044_v52 = vstv %s2177_s29  ;;  %s2864_s29 = sld [smem:[#allocation3 + $0x1c]] }
  0x66   : > { %v794_v14 = vrot.slane %v788_v0, 4  ;;  %v913_v0 = vmul.f32 %v912_v61, %v2469_v3 }
  0x67   : > { %v806_v62 = vstv %s2165_s8  ;;  %s2743_s8 = sld [smem:[#allocation3 + $0x38]] }
  0x68   : > { %652 = vrot.lane.b32.xlu1 %v647_v13, %s2381_s3  ;;  %v808_v11 = vmul.f32 %v806_v62, %v2466_v2  ;;  %v809_v12 = vmul.f32 %v806_v62, %v2482_v9  ;;  %v828_v13 = vstv %s2166_s9  ;;  %v807_v17 = vmul.f32 %v806_v62, %v2463_v1  ;;  %s2749_s9 = sld [smem:[#allocation3 + $0x3f]] }
  0x69   : > { %650 = vrot.lane.b32.xlu0 %v646_v15, %s2381_s3  ;;  %v796_v15 = vrot.slane %v789_v4, 4  ;;  %v830_v18 = vmul.f32 %v828_v13, %v2475_v6  ;;  %v831_v19 = vmul.f32 %v828_v13, %v2479_v8  ;;  %v829_v22 = vmul.f32 %v828_v13, %v2469_v3 }
  0x6a   : > { %v814_v20 = vrot.slane %v808_v11, 4  ;;  %v816_v21 = vrot.slane %v809_v12, 4  ;;  %v795_v24 = vsel %vm254_vm3, %v793_v16, %v794_v14  ;;  %v813_v25 = vrot.slane %v807_v17, 4 }
  0x6b   : > { %v797_v23 = vsel %vm254_vm3, %v794_v14, %v796_v15  ;;  %v836_v27 = vrot.slane %v830_v18, 5  ;;  %v835_v30 = vrot.slane %v829_v22, 5  ;;  %v942_v62 = vmul.f32 %v940_v58, %v2475_v6 }
  0x6c   : > { %674 = vrot.lane.b32.xlu1 %v671_v28, %s2381_s3  ;;  %v838_v28 = vrot.slane %v831_v19, 5  ;;  %v925_v4 = vstv %s2171_s20  ;;  %v950_v14 = vrot.slane %v943_v5, 1  ;;  %v982_v17 = vstv %s2174_s25  ;;  %s2791_s20 = sld [smem:[#allocation3 + $0x5b]] }
  0x6d   : > { %672 = vrot.lane.b32.xlu0 %v669_v29, %s2381_s3  ;;  %v817_v29 = vsel %vm254_vm3, %v814_v20, %v816_v21  ;;  %v837_v37 = vsel %vm289_vm4, %v835_v30, %v836_v27  ;;  %v927_v11 = vmul.f32 %v925_v4, %v2466_v2  ;;  %v926_v12 = vmul.f32 %v925_v4, %v2463_v1  ;;  %s2836_s25 = sld [smem:[#allocation3]] }
  0x6e   : > { %v839_v36 = vsel %vm289_vm4, %v836_v27, %v838_v28  ;;  %v948_v13 = vrot.slane %v942_v62, 1  ;;  %v984_v22 = vmul.f32 %v982_v17, %v2475_v6  ;;  %v1002_v30 = vstv %s2175_s26  ;;  %s2849_s26 = sld [smem:[#allocation3 + $0xe]] }
  0x6f   : > { %v1005_v40 = vmul.f32 %v1002_v30, %v2482_v9 }
  0x70   : > { %694 = vrot.lane.b32.xlu1 %v691_v32, %s2381_s3  ;;  %v815_v32 = vsel %vm254_vm3, %v813_v25, %v814_v20 }
  0x71   : > { %692 = vrot.lane.b32.xlu0 %v689_v33, %s2381_s3  ;;  %v851_v33 = vmul.f32 %v848_v26, %v2482_v9  ;;  %v985_v26 = vmul.f32 %v982_v17, %v2479_v8 }
  0x73   : > { %v992_v35 = vrot.slane %v985_v26, 2 }
  0x74   : > { %716 = vrot.lane.b32.xlu1 %v713_v41, %s2381_s3  ;;  %v858_v41 = vrot.slane %v851_v33, 5  ;;  %v990_v33 = vrot.slane %v984_v22, 2 }
  0x75   : > { %714 = vrot.lane.b32.xlu0 %v711_v45, %s2381_s3  ;;  %v878_v45 = vrot.slane %v872_v39, 6 }
  0x76   : > { %v859_v49 = vsel %vm289_vm4, %v856_v38, %v858_v41  ;;  %v1003_v41 = vmul.f32 %v1002_v30, %v2463_v1 }
  0x77   : > { %v881_v53 = vsel %vm324_vm5, %v878_v45, %v880_v46 }
  0x78   : > { %736 = vrot.lane.b32.xlu1 %v733_v54, %s2381_s3  ;;  %v879_v54 = vsel %vm324_vm5, %v877_v51, %v878_v45  ;;  %v993_v45 = vsel %vm184_vm1, %v990_v33, %v992_v35  ;;  %v1009_v51 = vrot.slane %v1003_v41, 2 }
  0x79   : > { %734 = vrot.lane.b32.xlu0 %v731_v55, %s2381_s3  ;;  %v898_v55 = vrot.slane %v892_v47, 6 }
  0x7b   : > { %v901_v59 = vsel %vm324_vm5, %v898_v55, %v900_v56  ;;  %v1046_v56 = vmul.f32 %v1044_v52, %v2466_v2 }
  0x7c   : > { %758 = vrot.lane.b32.xlu1 %v755_v60, %s2381_s3  ;;  %v899_v60 = vsel %vm324_vm5, %v897_v57, %v898_v55  ;;  %v1047_v57 = vmul.f32 %v1044_v52, %v2482_v9 }
  0x7d   : > { %756 = vrot.lane.b32.xlu0 %v753_v63, %s2381_s3  ;;  %v914_v63 = vmul.f32 %v912_v61, %v2475_v6 }
  0x80   : > { %778 = vrot.lane.b32.xlu1 %v775_v7, %s2381_s3  ;;  %v941_v7 = vmul.f32 %v940_v58, %v2469_v3  ;;  %v1045_v58 = vmul.f32 %v1044_v52, %v2463_v1 }
  0x81   : > { %776 = vrot.lane.b32.xlu0 %v773_v10, %s2381_s3  ;;  %v960_v10 = vstv %s2173_s21  ;;  %s2825_s21 = sld [smem:[#allocation3 + $0x7]] }
  0x82   : > { %v962_v15 = vmul.f32 %v960_v10, %v2466_v2  ;;  %v963_v16 = vmul.f32 %v960_v10, %v2482_v9  ;;  %v947_v18 = vrot.slane %v941_v7, 1  ;;  %v961_v19 = vmul.f32 %v960_v10, %v2463_v1 }
  0x83   : > { %v1052_v10 = vrot.slane %v1046_v56, 3 }
  0x84   : > { %800 = vrot.lane.b32.xlu1 %v797_v23, %s2381_s3  ;;  %v951_v23 = vsel %vm149_vm0, %v948_v13, %v950_v14  ;;  %v970_v25 = vrot.slane %v963_v16, 1  ;;  %v949_v27 = vsel %vm149_vm0, %v947_v18, %v948_v13  ;;  %v967_v28 = vrot.slane %v961_v19, 1 }
  0x85   : > { %798 = vrot.lane.b32.xlu0 %v795_v24, %s2381_s3  ;;  %v968_v24 = vrot.slane %v962_v15, 1 }
  0x87   : > { %v971_v34 = vsel %vm149_vm0, %v968_v24, %v970_v25  ;;  %v969_v38 = vsel %vm149_vm0, %v967_v28, %v968_v24  ;;  %v1108_v25 = vstv %s2724_s4  ;;  %s2902_s4 = sld [smem:[#allocation3 + $0x23]] }
  0x88   : > { %820 = vrot.lane.b32.xlu1 %v817_v29, %s2381_s3  ;;  %v983_v29 = vmul.f32 %v982_v17, %v2469_v3  ;;  %v1110_v35 = vmul.f32 %v1108_v25, %v2475_v6 }
  0x89   : > { %818 = vrot.lane.b32.xlu0 %v815_v32, %s2381_s3 }
  0x8a   : > { %v989_v39 = vrot.slane %v983_v29, 2 }
  0x8c   : > { %842 = vrot.lane.b32.xlu1 %v839_v36, %s2381_s3  ;;  %v1004_v36 = vmul.f32 %v1002_v30, %v2466_v2 }
  0x8d   : > { %840 = vrot.lane.b32.xlu0 %v837_v37, %s2381_s3  ;;  %v1024_v37 = vstv %s2176_s28  ;;  %s2862_s28 = sld [smem:[#allocation3 + $0x15]] }
  0x8e   : > { %v1026_v44 = vmul.f32 %v1024_v37, %v2475_v6  ;;  %v1010_v46 = vrot.slane %v1004_v36, 2  ;;  %v1027_v47 = vmul.f32 %v1024_v37, %v2479_v8  ;;  %v1025_v48 = vmul.f32 %v1024_v37, %v2469_v3 }
  0x8f   : > { %v1111_v36 = vmul.f32 %v1108_v25, %v2479_v8  ;;  %v1109_v37 = vmul.f32 %v1108_v25, %v2469_v3 }
  0x90   : > { %862 = vrot.lane.b32.xlu1 %v859_v49, %s2381_s3  ;;  %v991_v49 = vsel %vm184_vm1, %v989_v39, %v990_v33  ;;  %v1032_v55 = vrot.slane %v1026_v44, 3  ;;  %v1011_v61 = vsel %vm184_vm1, %v1009_v51, %v1010_v46  ;;  %v1034_v62 = vrot.slane %v1027_v47, 3 }
  0x91   : > { %860 = vrot.lane.b32.xlu0 %v857_v50, %s2381_s3  ;;  %v1012_v50 = vrot.slane %v1005_v40, 2  ;;  %v2786_v47 = vstv %s2743_s8  ;;  %v1118_v51 = vrot.slane %v1111_v36, 5  ;;  %v1115_v52 = vrot.slane %v1109_v37, 5  ;;  %s2920_s8 = sld [smem:[#allocation3 + $0x3c]] }
  0x92   : > { %v1035_v13 = vsel %vm219_vm2, %v1032_v55, %v1034_v62 }
  0x94   : > { %884 = vrot.lane.b32.xlu1 %v881_v53, %s2381_s3 }
  0x95   : > { %882 = vrot.lane.b32.xlu0 %v879_v54, %s2381_s3 }
  0x98   : > { %904 = vrot.lane.b32.xlu1 %v901_v59, %s2381_s3  ;;  %v1066_v59 = vstv %s2178_s30  ;;  %s2876_s30 = sld [smem:[#allocation3 + $0x4]] }
  0x99   : > { %902 = vrot.lane.b32.xlu0 %v899_v60, %s2381_s3  ;;  %s2179_s3 = sld [smem:[#allocation3 + $0x50]]  ;;  %v1013_v60 = vsel %vm184_vm1, %v1010_v46, %v1012_v50  ;;  %v1068_v5 = vmul.f32 %v1066_v59, %v2475_v6  ;;  %v1069_v7 = vmul.f32 %v1066_v59, %v2479_v8  ;;  %v1067_v15 = vmul.f32 %v1066_v59, %v2469_v3 }
  0x9a   : > { %v1116_v50 = vrot.slane %v1110_v35, 5  ;;  %v1150_v59 = vstv %s2761_s11  ;;  %s2993_s11 = sld [smem:[#allocation3 + $0x43]] }
  0x9b   : > { %v1074_v19 = vrot.slane %v1068_v5, 4  ;;  %v1076_v22 = vrot.slane %v1069_v7, 4  ;;  %v1073_v26 = vrot.slane %v1067_v15, 4  ;;  %v1152_v15 = vmul.f32 %v1150_v59, %v2475_v6 }
  0x9c   : > { %919 = vrot.lane.b32.xlu1 %v914_v63, %s2382_s27  ;;  %v1031_v63 = vrot.slane %v1025_v48, 3  ;;  %v2789_v48 = vstv %s2749_s9  ;;  %s2923_s9 = sld [smem:[#allocation3 + $0x2a]] }
  0x9d   : > { %917 = vrot.lane.b32.xlu0 %v913_v0, %s2382_s27  ;;  %v1075_v39 = vsel %vm254_vm3, %v1073_v26, %v1074_v19  ;;  %v2808_v62 = vmul.f32 %v2789_v48, %v2466_v2  ;;  %v195_v36 = vmul.f32 %v2789_v48, %v2463_v1 }
  0x9e   : > { %v2682_v20 = vpop.permute.xlu1 %370  ;;  %v1033_v14 = vsel %vm219_vm2, %v1031_v63, %v1032_v55  ;;  %v2811_v63 = vstv %s2751_s10  ;;  %s2947_s10 = sld [smem:[#allocation3 + $0x12]] }
  0x9f   : > { %v2684_v21 = vpop.permute.xlu0 %357  ;;  %v1086_v18 = vstv %s2179_s3  ;;  %s2889_s3 = sld [smem:[#allocation3 + $0xb]] }
  0xa0   : > { %932 = vrot.lane.b32.xlu1 %v927_v11, %s2382_s27  ;;  %v1054_v11 = vrot.slane %v1047_v57, 3  ;;  %v1089_v28 = vmul.f32 %v1086_v18, %v2482_v9  ;;  %v1087_v29 = vmul.f32 %v1086_v18, %v2463_v1 }
  0xa1   : > { %930 = vrot.lane.b32.xlu0 %v926_v12, %s2382_s27  ;;  %v1051_v12 = vrot.slane %v1045_v58, 3 }
  0xa2   : > { %v2693_v31 = vpop.permute.xlu1 %372  ;;  %v1096_v41 = vrot.slane %v1089_v28, 4  ;;  %v1093_v44 = vrot.slane %v1087_v29, 4  ;;  %v1170_v28 = vstv %s2783_s18  ;;  %v3763_v29 = vrot.slane %v2808_v62, 2  ;;  %s3087_s18 = sld [smem:[#allocation3 + $0x20]] }
  0xa3   : > { %v2695_v32 = vpop.permute.xlu0 %359  ;;  %v1053_v24 = vsel %vm219_vm2, %v1051_v12, %v1052_v10  ;;  %v160_v12 = vmul.f32 %v2786_v47, %v2463_v1 }
  0xa4   : > { %954 = vrot.lane.b32.xlu1 %v951_v23, %s2382_s27  ;;  %v1055_v23 = vsel %vm219_vm2, %v1052_v10, %v1054_v11  ;;  %v2818_v10 = vstv %s2763_s12  ;;  %v2821_v11 = vstv %s2769_s13  ;;  %s3034_s12 = sld [smem:[#allocation3 + $0x19]] }
  0xa5   : > { %952 = vrot.lane.b32.xlu0 %v949_v27, %s2382_s27  ;;  %v1088_v27 = vmul.f32 %v1086_v18, %v2466_v2  ;;  %v1153_v18 = vmul.f32 %v1150_v59, %v2479_v8  ;;  %v2843_v6 = vmul.f32 %v2818_v10, %v2466_v2  ;;  %v166_v35 = vrot.slane %v160_v12, 1  ;;  %s3063_s13 = sld [smem:[#allocation3 + $0x4a]] }
  0xa6   : > { %v2704_v42 = vpop.permute.xlu1 %394 }
  0xa7   : > { %v2706_v43 = vpop.permute.xlu0 %392  ;;  %v1094_v40 = vrot.slane %v1088_v27, 4 }
  0xa8   : > { %3770 = vst [vmem:[#allocation8_spill] sm:$0xff] %v2706_v43  ;;  %974 = vrot.lane.b32.xlu1 %v971_v34, %s2382_s27  ;;  %v1077_v34 = vsel %vm254_vm3, %v1074_v19, %v1076_v22  ;;  %v1151_v19 = vmul.f32 %v1150_v59, %v2469_v3  ;;  %v2834_v22 = vmul.f32 %v2811_v63, %v2466_v2 }
  0xa9   : > { %972 = vrot.lane.b32.xlu0 %v969_v38, %s2382_s27  ;;  %v1128_v38 = vstv %s2736_s5  ;;  %v1097_v56 = vsel %vm254_vm3, %v1094_v40, %v1096_v41  ;;  %v1095_v57 = vsel %vm254_vm3, %v1093_v44, %v1094_v40  ;;  %v2847_v3 = vmul.f32 %v2821_v11, %v2466_v2  ;;  %s2917_s5 = sld [smem:[#allocation3 + $0x35]] }
  0xaa   : > { %v2715_v53 = vpop.permute.xlu1 %414  ;;  %v1131_v55 = vmul.f32 %v1128_v38, %v2482_v9  ;;  %v1129_v58 = vmul.f32 %v1128_v38, %v2463_v1  ;;  %v1157_v40 = vrot.slane %v1151_v19, 6  ;;  %v1172_v44 = vmul.f32 %v1170_v28, %v2466_v2 }
  0xab   : > { %3771 = vst [vmem:[#allocation9_spill] sm:$0xff] %v2715_v53  ;;  %v2717_v54 = vpop.permute.xlu0 %412  ;;  %v1173_v1 = vmul.f32 %v1170_v28, %v2482_v9 }
  0xac   : > { %3772 = vst [vmem:[#allocation10_spill] sm:$0xff] %v2717_v54  ;;  %996 = vrot.lane.b32.xlu1 %v993_v45, %s2382_s27  ;;  %v1135_v25 = vrot.slane %v1129_v58, 5  ;;  %v2893_v58 = vld [vmem:[%s2460_s6 + $0x20] sm:$0xff] }
  0xad   : > { %994 = vrot.lane.b32.xlu0 %v991_v49, %s2382_s27  ;;  %v1130_v49 = vmul.f32 %v1128_v38, %v2466_v2  ;;  %v1158_v38 = vrot.slane %v1152_v15, 6 }
  0xae   : > { %v2728_v0 = vpop.permute.xlu1 %436 }
  0xaf   : > { %3773 = vst [vmem:[#allocation11_spill] sm:$0xff] %v2728_v0  ;;  %v2730_v4 = vpop.permute.xlu0 %434 }
  0xb0   : > { %3774 = vst [vmem:[#allocation12_spill] sm:$0xff] %v2730_v4  ;;  %1016 = vrot.lane.b32.xlu1 %v1013_v60, %s2382_s27  ;;  %v3767_v60 = vstv %s2738_s7 }
  0xb1   : > { %1014 = vrot.lane.b32.xlu0 %v1011_v61, %s2382_s27  ;;  %v2804_v61 = vmul.f32 %v2786_v47, %v2466_v2 }
  0xb2   : > { %v2745_v16 = vpop.permute.xlu1 %456 }
  0xb3   : > { %3775 = vst [vmem:[#allocation13_spill] sm:$0xff] %v2745_v16  ;;  %v2747_v17 = vpop.permute.xlu0 %454  ;;  %v3762_v26 = vrot.slane %v2804_v61, 1  ;;  %v1282_v16 = vstv %s2993_s11  ;;  %s3401_s11 = sld [smem:[#allocation3 + $0x21]] }
  0xb4   : > { %3776 = vst [vmem:[#allocation14_spill] sm:$0xff] %v2747_v17  ;;  %1038 = vrot.lane.b32.xlu1 %v1035_v13, %s2382_s27  ;;  %v1136_v13 = vrot.slane %v1130_v49, 5  ;;  %v2873_v49 = vld [vmem:[%s2460_s6 + $0x18] sm:$0xff] }
  0xb5   : > { %1036 = vrot.lane.b32.xlu0 %v1033_v14, %s2382_s27  ;;  %v1138_v14 = vrot.slane %v1131_v55, 5  ;;  %v265_v55 = vmul.f32 %v2873_v49, %v2818_v10  ;;  %v300_v2 = vmul.f32 %v2873_v49, %v2821_v11  ;;  %v136_v12 = vmul.f32 %v2873_v49, %v3767_v60 }
  0xb6   : > { %v2765_v30 = vpop.permute.xlu1 %478  ;;  %v1137_v41 = vsel %vm289_vm4, %v1135_v25, %v1136_v13  ;;  %v1180_v25 = vrot.slane %v1173_v1, 6 }
  0xb7   : > { %3777 = vst [vmem:[#allocation15_spill] sm:$0xff] %v2765_v30  ;;  %v2767_v33 = vpop.permute.xlu0 %476  ;;  %v1139_v37 = vsel %vm289_vm4, %v1136_v13, %v1138_v14  ;;  %v201_v13 = vrot.slane %v195_v36, 2  ;;  %v168_v14 = vsel %vm149_vm0, %v166_v35, %v3762_v26  ;;  %v3765_v35 = vrot.slane %v2847_v3, 5 }
  0xb8   : > { %3778 = vst [vmem:[#allocation16_spill] sm:$0xff] %v2767_v33  ;;  %1058 = vrot.lane.b32.xlu1 %v1055_v23, %s2382_s27  ;;  %v1119_v23 = vsel %vm289_vm4, %v1116_v50, %v1118_v51  ;;  %v3764_v51 = vrot.slane %v2834_v22, 3 }
  0xb9   : > { %1056 = vrot.lane.b32.xlu0 %v1053_v24, %s2382_s27  ;;  %v1117_v24 = vsel %vm289_vm4, %v1115_v52, %v1116_v50  ;;  %v1171_v50 = vmul.f32 %v2873_v49, %v1170_v28  ;;  %v230_v52 = vmul.f32 %v2873_v49, %v2811_v63 }
  0xba   : > { %v2779_v45 = vpop.permute.xlu1 %498 }
  0xbb   : > { %3779 = vst [vmem:[#allocation17_spill] sm:$0xff] %v2779_v45  ;;  %v2781_v46 = vpop.permute.xlu0 %496  ;;  %v1177_v28 = vrot.slane %v1171_v50, 6  ;;  %v236_v36 = vrot.slane %v230_v52, 3  ;;  %v203_v50 = vsel %vm184_vm1, %v201_v13, %v3763_v29  ;;  %v1192_v13 = vstv %s2876_s30  ;;  %s3326_s30 = sld [smem:[#allocation3 + $0x36]] }
  0xbc   : > { %3780 = vst [vmem:[#allocation18_spill] sm:$0xff] %v2781_v46  ;;  %1080 = vrot.lane.b32.xlu1 %v1077_v34, %s2382_s27  ;;  %v2858_v34 = vstv %s2791_s20  ;;  %s3117_s20 = sld [smem:[#allocation3 + $0x51]] }
  0xbd   : > { %1078 = vrot.lane.b32.xlu0 %v1075_v39, %s2382_s27  ;;  %v1160_v39 = vrot.slane %v1153_v18, 6  ;;  %v2897_v59 = vmul.f32 %v2893_v58, %v2858_v34  ;;  %v2909_v15 = vmul.f32 %v2873_v49, %v2858_v34  ;;  %v2912_v18 = vstv %s2825_s21  ;;  %s3176_s21 = sld [smem:[#allocation3 + $0x58]] }
  0xbe   : > { %v2813_v5 = vpop.permute.xlu1 %520  ;;  %v238_v52 = vsel %vm219_vm2, %v236_v36, %v3764_v51  ;;  %v2997_v36 = vld [vmem:[%s2460_s6 + $0x10] sm:$0x3f] }
  0xbf   : > { %3781 = vst [vmem:[#allocation19_spill] sm:$0xff] %v2813_v5  ;;  %v2815_v7 = vpop.permute.xlu0 %518  ;;  %v1161_v19 = vsel %vm324_vm5, %v1158_v38, %v1160_v39 }
  0xc0   : > { %3782 = vst [vmem:[#allocation20_spill] sm:$0xff] %v2815_v7  ;;  %1100 = vrot.lane.b32.xlu1 %v1097_v56, %s2382_s27 }
  0xc1   : > { %1098 = vrot.lane.b32.xlu0 %v1095_v57, %s2382_s27  ;;  %v3766_v57 = vrot.slane %v2843_v6, 4 }
  0xc2   : > { %v2851_v8 = vpop.permute.xlu1 %540 }
  0xc3   : > { %3783 = vst [vmem:[#allocation21_spill] sm:$0xff] %v2851_v8  ;;  %v2853_v27 = vpop.permute.xlu0 %538 }
  0xc4   : > { %3784 = vst [vmem:[#allocation22_spill] sm:$0xff] %v2853_v27  ;;  %1122 = vrot.lane.b32.xlu1 %v1119_v23, %s2382_s27  ;;  %v1159_v23 = vsel %vm324_vm5, %v1157_v40, %v1158_v38  ;;  %v173_v40 = vadd.f32 %v168_v14, %v136_v12  ;;  %v2950_v12 = vstv %s2862_s28  ;;  %s3293_s28 = sld [smem:[#allocation3 + $0x5]] }
  0xc5   : > { %1120 = vrot.lane.b32.xlu0 %v1117_v24, %s2382_s27  ;;  %v1178_v24 = vrot.slane %v1172_v44, 6  ;;  %v2931_v44 = vld [vmem:[%s2460_s6 + $0x8] sm:$0xff] }
  0xc6   : > { %v2885_v56 = vpop.permute.xlu1 %562  ;;  %v2935_v1 = vmul.f32 %v2931_v44, %v2912_v18  ;;  %v208_v29 = vadd.f32 %v203_v50, %v173_v40  ;;  %v1194_v40 = vmul.f32 %v2931_v44, %v1192_v13  ;;  %v2989_v50 = vld [vmem:[%s2460_s6] sm:$0xff] }
  0xc7   : > { %3785 = vst [vmem:[#allocation23_spill] sm:$0xff] %v2885_v56  ;;  %v2887_v9 = vpop.permute.xlu0 %560  ;;  %v1181_v14 = vsel %vm324_vm5, %v1178_v24, %v1180_v25  ;;  %v1179_v38 = vsel %vm324_vm5, %v1177_v28, %v1178_v24  ;;  %v1220_v28 = vstv %s2889_s3  ;;  %v143_v8 = vmul.f32 %v2989_v50, %v2912_v18  ;;  %s3329_s3 = sld [smem:[#allocation3 + $0x3d]] }
  0xc8   : > { %3786 = vst [vmem:[#allocation24_spill] sm:$0xff] %v2887_v9  ;;  %1142 = vrot.lane.b32.xlu1 %v1139_v37, %s2382_s27  ;;  %v271_v37 = vrot.slane %v265_v55, 4  ;;  %v1222_v60 = vmul.f32 %v2931_v44, %v1220_v28  ;;  %v1223_v55 = vmul.f32 %v2997_v36, %v1220_v28 }
  0xc9   : > { %1140 = vrot.lane.b32.xlu0 %v1137_v41, %s2382_s27  ;;  %v306_v41 = vrot.slane %v300_v2, 5  ;;  %v2943_v2 = vstv %s2849_s26  ;;  %s3238_s26 = sld [smem:[#allocation3 + $0x5f]] }
  0xca   : > { %v2925_v39 = vpop.permute.xlu1 %582  ;;  %v2976_v51 = vmul.f32 %v2931_v44, %v2943_v2  ;;  %v1228_v27 = vrot.slane %v1222_v60, 1  ;;  %v178_v33 = vmul.f32 %v2989_v50, %v2943_v2 }
  0xcb   : > { %3787 = vst [vmem:[#allocation25_spill] sm:$0xff] %v2925_v39  ;;  %v2927_v26 = vpop.permute.xlu0 %580 }
  0xcc   : > { %3788 = vst [vmem:[#allocation26_spill] sm:$0xff] %v2927_v26  ;;  %1164 = vrot.lane.b32.xlu1 %v1161_v19, %s2382_s27  ;;  %v2961_v19 = vsel %vm254_vm3, %v271_v37, %v3766_v57  ;;  %v2979_v37 = vstv %s2864_s29  ;;  %v1205_v57 = vstv %s2917_s5  ;;  %v3791_v26 = vstv %s2836_s25  ;;  %s3299_s29 = sld [smem:[#allocation3 + $0xc]] }
  0xcd   : > { %1162 = vrot.lane.b32.xlu0 %v1159_v23, %s2382_s27  ;;  %v2966_v23 = vsel %vm289_vm4, %v306_v41, %v3765_v35  ;;  %v2983_v41 = vmul.f32 %v2931_v44, %v2950_v12  ;;  %v1193_v35 = vmul.f32 %v2989_v50, %v1192_v13  ;;  %v3010_v13 = vstv %s2923_s9  ;;  %s3352_s5 = sld [smem:[#allocation3 + $0x44]]  ;;  %s2384_s9 = smov 123  }
  0xce   : > { %v2968_v25 = vpop.permute.xlu1 %604  ;;  %v3015_v39 = vmul.f32 %v2989_v50, %v3791_v26  ;;  %v1207_v7 = vmul.f32 %v2893_v58, %v1205_v57  ;;  %v1206_v26 = vmul.f32 %v2873_v49, %v1205_v57  ;;  %v3051_v60 = vmul.f32 %v2931_v44, %v3010_v13 }
  0xcf   : > { %3789 = vst [vmem:[#allocation27_spill] sm:$0xff] %v2968_v25  ;;  %v2970_v24 = vpop.permute.xlu0 %602  ;;  %v3007_v25 = vstv %s2902_s4  ;;  %s3341_s4 = sld [smem:[#allocation3 + $0x13]] }
  0xd0   : > { %3790 = vst [vmem:[#allocation28_spill] sm:$0xff] %v2970_v24  ;;  %1184 = vrot.lane.b32.xlu1 %v1181_v14, %s2382_s27  ;;  %v1221_v24 = vmul.f32 %v2989_v50, %v1220_v28  ;;  %v1240_v14 = vstv %s2920_s8  ;;  %v243_v28 = vadd.f32 %v238_v52, %v208_v29  ;;  %v1262_v52 = vstv %s2947_s10  ;;  %s3374_s8 = sld [smem:[#allocation3 + $0x1a]] }
  0xd1   : > { %1182 = vrot.lane.b32.xlu0 %v1179_v38, %s2382_s27  ;;  %v3004_v38 = vmul.f32 %v2931_v44, %v2979_v37  ;;  %s2383_s27 = smov 124   ;;  %v1242_v5 = vmul.f32 %v2893_v58, %v1240_v14  ;;  %v1241_v45 = vmul.f32 %v2873_v49, %v1240_v14  ;;  %v3041_v57 = vmul.f32 %v2931_v44, %v3007_v25  ;;  %s3383_s10 = sld [smem:[#allocation3 + $0x4b]] }
  0xd2   : > { %v3017_v9 = vpop.permute.xlu1 %624  ;;  %v1227_v46 = vrot.slane %v1221_v24, 1  ;;  %v213_v24 = vmul.f32 %v2989_v50, %v2950_v12  ;;  %v3066_v54 = vadd.f32 %v2961_v19, %v243_v28  ;;  %v1284_v28 = vmul.f32 %v2893_v58, %v1282_v16 }
  0xd3   : > { %3792 = vst [vmem:[#allocation29_spill] sm:$0xff] %v3017_v9  ;;  %v3019_v56 = vpop.permute.xlu0 %622  ;;  %v3030_v9 = vld [vmem:[%s2460_s6 + $0x28] sm:$0x3f]  ;;  %v1247_v0 = vrot.slane %v1241_v45, 1  ;;  %v3798_v45 = vrot.slane %v2935_v1, 1 }
  0xd4   : > { %3793 = vst [vmem:[#allocation30_spill] sm:$0xff] %v3019_v56  ;;  %1199 = vrot.lane.b32.xlu1 %v1194_v40, %s2383_s27  ;;  %v1243_v29 = vmul.f32 %v3030_v9, %v1240_v14  ;;  %v1230_v56 = vrot.slane %v1223_v55, 1  ;;  %v150_v55 = vrot.slane %v143_v8, 1  ;;  %v1264_v14 = vmul.f32 %v2931_v44, %v1262_v52 }
  0xd5   : > { %1197 = vrot.lane.b32.xlu0 %v1193_v35, %s2383_s27  ;;  %v1248_v35 = vrot.slane %v1242_v5, 1  ;;  %v1229_v4 = vsel %vm149_vm0, %v1227_v46, %v1228_v27  ;;  %v1263_v8 = vmul.f32 %v2989_v50, %v1262_v52  ;;  %v185_v5 = vrot.slane %v178_v33, 2 }
  0xd6   : > { %v3045_v30 = vpop.permute.xlu1 %639  ;;  %v1250_v40 = vrot.slane %v1243_v29, 1  ;;  %v152_v46 = vsel %vm149_vm0, %v150_v55, %v3798_v45  ;;  %v1270_v19 = vrot.slane %v1264_v14, 2 }
  0xd7   : > { %3794 = vst [vmem:[#allocation31_spill] sm:$0xff] %v3045_v30  ;;  %v3047_v17 = vpop.permute.xlu0 %637  ;;  %v1265_v30 = vmul.f32 %v2997_v36, %v1262_v52  ;;  %v3080_v52 = vmul.f32 %v2989_v50, %v3007_v25  ;;  %v1269_v45 = vrot.slane %v1263_v8, 2 }
  0xd8   : > { %3795 = vst [vmem:[#allocation32_spill] sm:$0xff] %v3047_v17  ;;  %1212 = vrot.lane.b32.xlu1 %v1207_v7, %s2383_s27  ;;  %v1231_v17 = vsel %vm149_vm0, %v1228_v27, %v1230_v56  ;;  %v220_v27 = vrot.slane %v213_v24, 3  ;;  %v1285_v7 = vmul.f32 %v3030_v9, %v1282_v16  ;;  %v1251_v55 = vsel %vm149_vm0, %v1248_v35, %v1250_v40 }
  0xd9   : > { %1210 = vrot.lane.b32.xlu0 %v1206_v26, %s2383_s27  ;;  %v248_v26 = vmul.f32 %v2989_v50, %v2979_v37  ;;  %v1272_v33 = vrot.slane %v1265_v30, 2  ;;  %v1249_v24 = vsel %vm149_vm0, %v1247_v0, %v1248_v35  ;;  %v3096_v30 = vmul.f32 %v2989_v50, %v3010_v13 }
  0xda   : > { %v3071_v29 = vpop.permute.xlu1 %652  ;;  %v3801_v40 = vrot.slane %v2976_v51, 2  ;;  %v1292_v14 = vrot.slane %v1285_v7, 2 }
  0xdb   : > { %3796 = vst [vmem:[#allocation33_spill] sm:$0xff] %v3071_v29  ;;  %v3073_v56 = vpop.permute.xlu0 %650  ;;  %v1283_v29 = vmul.f32 %v2873_v49, %v1282_v16  ;;  %v3802_v16 = vrot.slane %v2983_v41, 3 }
  0xdc   : > { %3797 = vst [vmem:[#allocation34_spill] sm:$0xff] %v3073_v56  ;;  %1234 = vrot.lane.b32.xlu1 %v1231_v17, %s2383_s27  ;;  %v1304_v56 = vstv %s3034_s12  ;;  %v157_v17 = vadd.f32 %v152_v46, %v3015_v39  ;;  %v187_v0 = vsel %vm184_vm1, %v185_v5, %v3801_v40  ;;  %v1290_v46 = vrot.slane %v1284_v28, 2  ;;  %s3447_s12 = sld [smem:[#allocation3 + $0x28]] }
  0xdd   : > { %1232 = vrot.lane.b32.xlu0 %v1229_v4, %s2383_s27  ;;  %v255_v4 = vrot.slane %v248_v26, 4  ;;  %v222_v35 = vsel %vm219_vm2, %v220_v27, %v3802_v16  ;;  %v1306_v8 = vmul.f32 %v2931_v44, %v1304_v56  ;;  %v1273_v26 = vsel %vm184_vm1, %v1270_v19, %v1272_v33 }
  0xde   : > { %v3098_v53 = vpop.permute.xlu1 %674  ;;  %v1271_v5 = vsel %vm184_vm1, %v1269_v45, %v1270_v19  ;;  %v1289_v40 = vrot.slane %v1283_v29, 2  ;;  %v1305_v27 = vmul.f32 %v2989_v50, %v1304_v56  ;;  %v1324_v16 = vstv %s3063_s13  ;;  %s3470_s13 = sld [smem:[#allocation3 + $0x59]] }
  0xdf   : > { %3799 = vst [vmem:[#allocation35_spill] sm:$0xff] %v3098_v53  ;;  %v3100_v43 = vpop.permute.xlu0 %672  ;;  %v192_v39 = vadd.f32 %v187_v0, %v157_v17  ;;  %v3804_v33 = vstv %s2738_s7  ;;  %v162_v28 = vmul.f32 %v3030_v9, %v2786_v47  ;;  %v3137_v45 = vmul.f32 %v3030_v9, %v2811_v63  ;;  %s3163_s7 = sld [smem:[#allocation3 + $0x27]] }
  0xe0   : > { %3800 = vst [vmem:[#allocation36_spill] sm:$0xff] %v3100_v43  ;;  %1254 = vrot.lane.b32.xlu1 %v1251_v55, %s2383_s27  ;;  %v1307_v43 = vmul.f32 %v2997_v36, %v1304_v56  ;;  %v3803_v55 = vrot.slane %v3004_v38, 4  ;;  %v137_v7 = vmul.f32 %v2893_v58, %v3804_v33  ;;  %v197_v56 = vmul.f32 %v3030_v9, %v2789_v48 }
  0xe1   : > { %1252 = vrot.lane.b32.xlu0 %v1249_v24, %s2383_s27  ;;  %v145_v17 = vmul.f32 %v2997_v36, %v2912_v18  ;;  %v1326_v0 = vmul.f32 %v2893_v58, %v1324_v16  ;;  %v1346_v33 = vstv %s3087_s18  ;;  %v1293_v48 = vsel %vm184_vm1, %v1290_v46, %v1292_v14  ;;  %s3481_s18 = sld [smem:[#allocation3 + $0x2f]] }
  0xe2   : > { %v3122_v24 = vsel %vm254_vm3, %v255_v4, %v3803_v55  ;;  %v3129_v19 = vpop.permute.xlu1 %694  ;;  %v1312_v4 = vrot.slane %v1306_v8, 3  ;;  %v1314_v47 = vrot.slane %v1307_v43, 3  ;;  %v1327_v55 = vmul.f32 %v3030_v9, %v1324_v16 }
  0xe3   : > { %3805 = vst [vmem:[#allocation37_spill] sm:$0xff] %v3129_v19  ;;  %v3131_v29 = vpop.permute.xlu0 %692  ;;  %v1291_v53 = vsel %vm184_vm1, %v1289_v40, %v1290_v46  ;;  %v1311_v63 = vrot.slane %v1305_v27, 3  ;;  %v3149_v19 = vadd.f32 %v222_v35, %v192_v39  ;;  %v169_v18 = vrot.slane %v162_v28, 1 }
  0xe4   : > { %3806 = vst [vmem:[#allocation38_spill] sm:$0xff] %v3131_v29  ;;  %1276 = vrot.lane.b32.xlu1 %v1273_v26, %s2383_s27  ;;  %v1325_v29 = vmul.f32 %v2873_v49, %v1324_v16  ;;  %v3153_v8 = vmul.f32 %v3030_v9, %v2818_v10  ;;  %v3157_v43 = vmul.f32 %v3030_v9, %v2821_v11  ;;  %v153_v14 = vrot.slane %v145_v17, 1 }
  0xe5   : > { %1274 = vrot.lane.b32.xlu0 %v1271_v5, %s2383_s27  ;;  %v180_v35 = vmul.f32 %v2997_v36, %v2943_v2  ;;  %v1348_v39 = vmul.f32 %v2931_v44, %v1346_v33  ;;  %v1349_v10 = vmul.f32 %v2997_v36, %v1346_v33  ;;  %v3171_v11 = vmul.f32 %v3030_v9, %v2858_v34 }
  0xe6   : > { %v3159_v26 = vpop.permute.xlu1 %716  ;;  %v1315_v46 = vsel %vm219_vm2, %v1312_v4, %v1314_v47  ;;  %v1332_v40 = vrot.slane %v1326_v0, 3  ;;  %v1334_v27 = vrot.slane %v1327_v55, 3  ;;  %v1313_v2 = vsel %vm219_vm2, %v1311_v63, %v1312_v4 }
  0xe7   : > { %3807 = vst [vmem:[#allocation39_spill] sm:$0xff] %v3159_v26  ;;  %v3161_v5 = vpop.permute.xlu0 %714  ;;  %v1331_v16 = vrot.slane %v1325_v29, 3  ;;  %v1347_v28 = vmul.f32 %v2989_v50, %v1346_v33  ;;  %v1366_v17 = vstv %s3117_s20  ;;  %v204_v26 = vrot.slane %v197_v56, 2  ;;  %s3502_s20 = sld [smem:[#allocation3 + $0x60]] }
  0xe8   : > { %3808 = vst [vmem:[#allocation40_spill] sm:$0xff] %v3161_v5  ;;  %1296 = vrot.lane.b32.xlu1 %v1293_v48, %s2383_s27  ;;  %v3809_v5 = vrot.slane %v2804_v61, 1  ;;  %v3810_v48 = vstv %s2836_s25  ;;  %v215_v47 = vmul.f32 %v2997_v36, %v2950_v12  ;;  %v3811_v29 = vrot.slane %v2935_v1, 1  ;;  %s3202_s25 = sld [smem:[#allocation3 + $0x2e]] }
  0xe9   : > { %1294 = vrot.lane.b32.xlu0 %v1291_v53, %s2383_s27  ;;  %v132_v53 = vmul.f32 %v2931_v44, %v3810_v48  ;;  %v188_v33 = vrot.slane %v180_v35, 2  ;;  %v1354_v63 = vrot.slane %v1348_v39, 4  ;;  %v1356_v61 = vrot.slane %v1349_v10, 4 }
  0xea   : > { %v170_v34 = vsel %vm149_vm0, %v3809_v5, %v169_v18  ;;  %v3189_v0 = vpop.permute.xlu1 %736  ;;  %v154_v4 = vsel %vm149_vm0, %v3811_v29, %v153_v14  ;;  %v1368_v12 = vmul.f32 %v2893_v58, %v1366_v17  ;;  %v1369_v56 = vmul.f32 %v3030_v9, %v1366_v17 }
  0xeb   : > { %v3191_v55 = vpop.permute.xlu0 %734  ;;  %v1367_v5 = vmul.f32 %v2873_v49, %v1366_v17  ;;  %v239_v1 = vrot.slane %v3137_v45, 3  ;;  %v1335_v14 = vsel %vm219_vm2, %v1332_v40, %v1334_v27  ;;  %v1333_v35 = vsel %vm219_vm2, %v1331_v16, %v1332_v40 }
  0xec   : > { %1318 = vrot.lane.b32.xlu1 %v1315_v46, %s2383_s27  ;;  %v1353_v39 = vrot.slane %v1347_v28, 4  ;;  %v174_v10 = vadd.f32 %v170_v34, %v137_v7  ;;  %v3812_v46 = vrot.slane %v2808_v62, 2  ;;  %v250_v48 = vmul.f32 %v2997_v36, %v2979_v37 }
  0xed   : > { %1316 = vrot.lane.b32.xlu0 %v1313_v2, %s2383_s27  ;;  %v1388_v18 = vstv %s3163_s7  ;;  %v158_v45 = vadd.f32 %v154_v4, %v132_v53  ;;  %v3813_v27 = vrot.slane %v2976_v51, 2  ;;  %v223_v16 = vrot.slane %v215_v47, 3  ;;  %s3566_s7 = sld [smem:[#allocation3 + $0x6]] }
  0xee   : > { %v205_v2 = vsel %vm184_vm1, %v3812_v46, %v204_v26  ;;  %v3212_v29 = vpop.permute.xlu1 %758  ;;  %v1357_v7 = vsel %vm254_vm3, %v1354_v63, %v1356_v61  ;;  %v1374_v62 = vrot.slane %v1368_v12, 4  ;;  %v1376_v26 = vrot.slane %v1369_v56, 4 }
  0xef   : > { %v3214_v17 = vpop.permute.xlu0 %756  ;;  %v189_v40 = vsel %vm184_vm1, %v3813_v27, %v188_v33  ;;  %v1373_v37 = vrot.slane %v1367_v5, 4  ;;  %v1408_v28 = vstv %s3176_s21  ;;  %v1355_v34 = vsel %vm254_vm3, %v1353_v39, %v1354_v63  ;;  %s2214_s21 = sld [smem:[#allocation3 + $0xd]] }
  0xf0   : > { %1338 = vrot.lane.b32.xlu1 %v1335_v14, %s2383_s27  ;;  %v1390_v46 = vmul.f32 %v2931_v44, %v1388_v18  ;;  %v1391_v53 = vmul.f32 %v2997_v36, %v1388_v18  ;;  %v1389_v51 = vmul.f32 %v2989_v50, %v1388_v18  ;;  %v209_v4 = vadd.f32 %v205_v2, %v174_v10 }
  0xf1   : > { %1336 = vrot.lane.b32.xlu0 %v1333_v35, %s2383_s27  ;;  %v3814_v47 = vrot.slane %v2834_v22, 3  ;;  %v274_v61 = vrot.slane %v3153_v8, 4  ;;  %v285_v12 = vmul.f32 %v2997_v36, %v3007_v25  ;;  %v193_v5 = vadd.f32 %v189_v40, %v158_v45 }
  0xf2   : > { %v3234_v56 = vpop.permute.xlu1 %778  ;;  %v3815_v18 = vrot.slane %v2983_v41, 3  ;;  %v258_v22 = vrot.slane %v250_v48, 4  ;;  %v1410_v35 = vmul.f32 %v2893_v58, %v1408_v28  ;;  %v1377_v25 = vsel %vm254_vm3, %v1374_v62, %v1376_v26 }
  0xf3   : > { %v240_v33 = vsel %vm219_vm2, %v3814_v47, %v239_v1  ;;  %v3236_v63 = vpop.permute.xlu0 %776  ;;  %v1375_v8 = vsel %vm254_vm3, %v1373_v37, %v1374_v62  ;;  %v1411_v1 = vmul.f32 %v3030_v9, %v1408_v28  ;;  %v1430_v39 = vstv %s3202_s25  ;;  %s3574_s25 = sld [smem:[#allocation3 + $0x37]] }
  0xf4   : > { %v224_v14 = vsel %vm219_vm2, %v3815_v18, %v223_v16  ;;  %1360 = vrot.lane.b32.xlu1 %v1357_v7, %s2383_s27  ;;  %v1396_v10 = vrot.slane %v1390_v46, 5  ;;  %v1398_v2 = vrot.slane %v1391_v53, 5  ;;  %v1395_v45 = vrot.slane %v1389_v51, 5 }
  0xf5   : > { %1358 = vrot.lane.b32.xlu0 %v1355_v34, %s2383_s27  ;;  %v1409_v41 = vmul.f32 %v2873_v49, %v1408_v28  ;;  %v244_v27 = vadd.f32 %v240_v33, %v209_v4  ;;  %v3816_v48 = vrot.slane %v2843_v6, 4  ;;  %v309_v16 = vrot.slane %v3157_v43, 5 }
  0xf6   : > { %v320_v7 = vmul.f32 %v2997_v36, %v3010_v13  ;;  %v3257_v26 = vpop.permute.xlu1 %800  ;;  %v228_v37 = vadd.f32 %v224_v14, %v193_v5  ;;  %v3817_v34 = vrot.slane %v3004_v38, 4  ;;  %v293_v28 = vrot.slane %v285_v12, 5 }
  0xf7   : > { %v275_v40 = vsel %vm254_vm3, %v3816_v48, %v274_v61  ;;  %v3259_v62 = vpop.permute.xlu0 %798  ;;  %v1416_v53 = vrot.slane %v1410_v35, 5  ;;  %v1418_v6 = vrot.slane %v1411_v1, 5  ;;  %v1432_v43 = vmul.f32 %v2931_v44, %v1430_v39 }
  0xf8   : > { %v259_v46 = vsel %vm254_vm3, %v3817_v34, %v258_v22  ;;  %1380 = vrot.lane.b32.xlu1 %v1377_v25, %s2383_s27  ;;  %v1433_v13 = vmul.f32 %v2997_v36, %v1430_v39  ;;  %v1431_v51 = vmul.f32 %v2989_v50, %v1430_v39  ;;  %v3818_v4 = vrot.slane %v3041_v57, 5 }
  0xf9   : > { %1378 = vrot.lane.b32.xlu0 %v1375_v8, %s2383_s27  ;;  %v3819_v38 = vrot.slane %v3080_v52, 5  ;;  %v1399_v33 = vsel %vm289_vm4, %v1396_v10, %v1398_v2  ;;  %v1397_v61 = vsel %vm289_vm4, %v1395_v45, %v1396_v10  ;;  %v1415_v12 = vrot.slane %v1409_v41, 5 }
  0xfa   : > { %v262_v5 = vadd.f32 %v3122_v24, %v3149_v19  ;;  %v3820_v18 = vrot.slane %v2847_v3, 5  ;;  %v344_v22 = vrot.slane %v3171_v11, 6  ;;  %v3282_v35 = vpop.permute.xlu1 %820  ;;  %v1450_v52 = vstv %s3238_s26  ;;  %s2215_s26 = sld [smem:[#allocation3 + $0x3e]] }
  0xfb   : > { %v292_v47 = vsel %vm289_vm4, %v3819_v38, %v3818_v4  ;;  %v3284_v25 = vpop.permute.xlu0 %818  ;;  %v279_v8 = vadd.f32 %v275_v40, %v244_v27  ;;  %v263_v1 = vadd.f32 %v259_v46, %v228_v37  ;;  %v3821_v39 = vmov %v3818_v4 }
  0xfc   : > { %v310_v14 = vsel %vm289_vm4, %v3820_v18, %v309_v16  ;;  %v294_v10 = vsel %vm289_vm4, %v3821_v39, %v293_v28  ;;  %v328_v2 = vrot.slane %v320_v7, 6  ;;  %1402 = vrot.lane.b32.xlu1 %v1399_v33, %s2383_s27  ;;  %v1419_v3 = vsel %vm289_vm4, %v1416_v53, %v1418_v6 }
  0xfd   : > { %1400 = vrot.lane.b32.xlu0 %v1397_v61, %s2383_s27  ;;  %v1438_v24 = vrot.slane %v1432_v43, 6  ;;  %v1440_v19 = vrot.slane %v1433_v13, 6  ;;  %v1437_v11 = vrot.slane %v1431_v51, 6  ;;  %v1417_v45 = vsel %vm289_vm4, %v1415_v12, %v1416_v53 }
  0xfe   : > { %v1452_v41 = vmul.f32 %v2893_v58, %v1450_v52  ;;  %v1453_v57 = vmul.f32 %v3030_v9, %v1450_v52  ;;  %v1451_v27 = vmul.f32 %v2873_v49, %v1450_v52  ;;  %v313_v48 = vadd.f32 %v2966_v23, %v3066_v54  ;;  %v3308_v37 = vpop.permute.xlu1 %842 }
  0xff   : > { %v3822_v40 = vrot.slane %v2897_v59, 6  ;;  %v3823_v16 = vrot.slane %v2909_v15, 6  ;;  %v3310_v34 = vpop.permute.xlu0 %840  ;;  %v297_v46 = vadd.f32 %v292_v47, %v262_v5  ;;  %v3824_v28 = vrot.slane %v3051_v60, 6 }
 0x100   : > { %v3825_v53 = vrot.slane %v3096_v30, 6  ;;  %v314_v43 = vadd.f32 %v310_v14, %v279_v8  ;;  %v298_v13 = vadd.f32 %v294_v10, %v263_v1  ;;  %1422 = vrot.lane.b32.xlu1 %v1419_v3, %s2383_s27  ;;  %v1441_v4 = vsel %vm324_vm5, %v1438_v24, %v1440_v19 }
 0x101   : > { %v343_v7 = vsel %vm324_vm5, %v3823_v16, %v3822_v40  ;;  %v3826_v54 = vmov %v3822_v40  ;;  %v3827_v15 = vmov %v3824_v28  ;;  %1420 = vrot.lane.b32.xlu0 %v1417_v45, %s2383_s27  ;;  %v1439_v30 = vsel %vm324_vm5, %v1437_v11, %v1438_v24  ;;  %v3830_v16 = vld [vmem:[#allocation10_spill] sm:$0xff] }
 0x102   : > { %v327_v6 = vsel %vm324_vm5, %v3825_v53, %v3824_v28  ;;  %v345_v23 = vsel %vm324_vm5, %v3826_v54, %v344_v22  ;;  %v329_v51 = vsel %vm324_vm5, %v3827_v15, %v328_v2  ;;  %v1458_v38 = vrot.slane %v1452_v41, 6  ;;  %v3331_v33 = vpop.permute.xlu1 %862  ;;  %v3831_v53 = vld [vmem:[#allocation11_spill] sm:$0xff] }
 0x103   : > { %v1460_v59 = vrot.slane %v1453_v57, 6  ;;  %v1457_v47 = vrot.slane %v1451_v27, 6  ;;  %v348_v60 = vadd.f32 %v343_v7, %v313_v48  ;;  %v3333_v61 = vpop.permute.xlu0 %860  ;;  %v332_v12 = vadd.f32 %v327_v6, %v297_v46  ;;  %v3829_v48 = vld [vmem:[#allocation9_spill] sm:$0xff] }
 0x104   : > { %v349_v5 = vadd.f32 %v345_v23, %v314_v43  ;;  %v333_v18 = vadd.f32 %v329_v51, %v298_v13  ;;  %1444 = vrot.lane.b32.xlu1 %v1441_v4, %s2383_s27  ;;  %v1472_v14 = vstv %s3293_s28  ;;  %v1500_v8 = vstv %s3299_s29  ;;  %v3832_v43 = vld [vmem:[#allocation12_spill] sm:$0xff]  ;;  %s2216_s28 = sld [smem:[#allocation3 + $0x14]] }
 0x105   : > { %1442 = vrot.lane.b32.xlu0 %v1439_v30, %s2383_s27  ;;  %v1461_v22 = vsel %vm324_vm5, %v1458_v38, %v1460_v59  ;;  %v1459_v52 = vsel %vm324_vm5, %v1457_v47, %v1458_v38  ;;  %v376_v1 = vadd.f32 %v2682_v20, %v348_v60  ;;  %v363_v2 = vadd.f32 %v2684_v21, %v332_v12  ;;  %v3833_v30 = vld [vmem:[#allocation13_spill] sm:$0xff]  ;;  %v3834_v12 = vld [vmem:[#allocation14_spill] sm:$0xff]  ;;  %s3602_s29 = sld [smem:[#allocation3 + $0x45]] }
 0x106   : > { %v3344_v39 = vpop.permute.xlu1 %884  ;;  %v377_v3 = vadd.f32 %v2693_v31, %v349_v5  ;;  %v364_v24 = vadd.f32 %v2695_v32, %v333_v18  ;;  %v1474_v19 = vmul.f32 %v2931_v44, %v1472_v14  ;;  %v1473_v20 = vmul.f32 %v2989_v50, %v1472_v14  ;;  %v3828_v31 = vld [vmem:[#allocation8_spill] sm:$0xff] }
 0x107   : > { %v3346_v10 = vpop.permute.xlu0 %882  ;;  %v1485_v11 = vstv %s3326_s30  ;;  %v1502_v45 = vmul.f32 %v2931_v44, %v1500_v8  ;;  %v1503_v41 = vmul.f32 %v2997_v36, %v1500_v8  ;;  %v398_v57 = vadd.f32 %v3828_v31, %v363_v2  ;;  %v3837_v2 = vld [vmem:[#allocation17_spill] sm:$0xff]  ;;  %s2385_s30 = smov 122  }
 0x108   : > { %1464 = vrot.lane.b32.xlu1 %v1461_v22, %s2383_s27  ;;  %v399_v21 = vadd.f32 %v2704_v42, %v364_v24  ;;  %v1501_v32 = vmul.f32 %v2989_v50, %v1500_v8  ;;  %v1520_v27 = vstv %s3329_s3  ;;  %v419_v40 = vadd.f32 %v3829_v48, %v377_v3  ;;  %v3835_v22 = vld [vmem:[#allocation15_spill] sm:$0xff]  ;;  %v3836_v8 = vld [vmem:[#allocation16_spill] sm:$0xff]  ;;  %s2218_s3 = sld [smem:[#allocation3 + $0x1b]] }
 0x109   : > { %1462 = vrot.lane.b32.xlu0 %v1459_v52, %s2383_s27  ;;  %v418_v7 = vadd.f32 %v3830_v16, %v376_v1  ;;  %v440_v13 = vadd.f32 %v3832_v43, %v398_v57  ;;  %v1487_v42 = vmul.f32 %v2893_v58, %v1485_v11  ;;  %v1486_v54 = vmul.f32 %v2873_v49, %v1485_v11  ;;  %v3839_v48 = vld [vmem:[#allocation19_spill] sm:$0xff]  ;;  %v3840_v16 = vld [vmem:[#allocation20_spill] sm:$0xff]  ;;  %v3841_v43 = vld [vmem:[#allocation21_spill] sm:$0xff]  ;;  %s3421_s27 = sld [smem:[#allocation3 + $0x52]] }
 0x10a   : > { %v3366_v46 = vpop.permute.xlu1 %904  ;;  %v441_v6 = vadd.f32 %v3831_v53, %v399_v21  ;;  %v1508_v23 = vrot.slane %v1502_v45, 1  ;;  %v1510_v15 = vrot.slane %v1503_v41, 1  ;;  %v1522_v51 = vmul.f32 %v2893_v58, %v1520_v27 }
 0x10b   : > { %v3368_v28 = vpop.permute.xlu0 %902  ;;  %v1523_v4 = vmul.f32 %v3030_v9, %v1520_v27  ;;  %v461_v38 = vadd.f32 %v3833_v30, %v419_v40  ;;  %v1507_v59 = vrot.slane %v1501_v32, 1  ;;  %v1521_v47 = vmul.f32 %v2873_v49, %v1520_v27  ;;  %v3838_v32 = vld [vmem:[#allocation18_spill] sm:$0xff] }
 0x10c   : > { %1479 = vrot.lane.b32.xlu1 %v1474_v19, %s2384_s9  ;;  %v1542_v60 = vstv %s3341_s4  ;;  %v460_v5 = vadd.f32 %v3834_v12, %v418_v7  ;;  %v483_v52 = vadd.f32 %v3835_v22, %v441_v6  ;;  %v482_v1 = vadd.f32 %v3836_v8, %v440_v13  ;;  %s3631_s4 = sld [smem:[#allocation3 + $0x22]] }
 0x10d   : > { %1477 = vrot.lane.b32.xlu0 %v1473_v20, %s2384_s9  ;;  %v503_v3 = vadd.f32 %v3837_v2, %v461_v38  ;;  %v1562_v24 = vstv %s3352_s5  ;;  %v1511_v19 = vsel %vm149_vm0, %v1508_v23, %v1510_v15  ;;  %v1528_v20 = vrot.slane %v1522_v51, 1  ;;  %v3842_v15 = vld [vmem:[#allocation22_spill] sm:$0xff]  ;;  %s3634_s5 = sld [smem:[#allocation3 + $0x53]] }
 0x10e   : > { %v3386_v18 = vpop.permute.xlu1 %919  ;;  %v1530_v11 = vrot.slane %v1523_v4, 1  ;;  %v1544_v45 = vmul.f32 %v2931_v44, %v1542_v60  ;;  %v1509_v41 = vsel %vm149_vm0, %v1507_v59, %v1508_v23  ;;  %v1527_v21 = vrot.slane %v1521_v47, 1 }
 0x10f   : > { %v3388_v14 = vpop.permute.xlu0 %917  ;;  %v1545_v31 = vmul.f32 %v2997_v36, %v1542_v60  ;;  %v1543_v57 = vmul.f32 %v2989_v50, %v1542_v60  ;;  %v502_v27 = vadd.f32 %v3838_v32, %v460_v5  ;;  %v525_v40 = vadd.f32 %v3839_v48, %v483_v52  ;;  %v3843_v5 = vld [vmem:[#allocation23_spill] sm:$0xff] }
 0x110   : > { %1492 = vrot.lane.b32.xlu1 %v1487_v42, %s2384_s9  ;;  %v524_v7 = vadd.f32 %v3840_v16, %v482_v1  ;;  %v545_v13 = vadd.f32 %v3841_v43, %v503_v3  ;;  %v1564_v42 = vmul.f32 %v2893_v58, %v1562_v24  ;;  %v1584_v23 = vstv %s3374_s8  ;;  %s3651_s8 = sld [smem:[#allocation3 + $0x29]] }
 0x111   : > { %1490 = vrot.lane.b32.xlu0 %v1486_v54, %s2384_s9  ;;  %v1565_v54 = vmul.f32 %v3030_v9, %v1562_v24  ;;  %v544_v51 = vadd.f32 %v3842_v15, %v502_v27  ;;  %v1531_v4 = vsel %vm149_vm0, %v1528_v20, %v1530_v11  ;;  %v1550_v30 = vrot.slane %v1544_v45, 2 }
 0x112   : > { %v3406_v53 = vpop.permute.xlu1 %932  ;;  %v1563_v38 = vmul.f32 %v2873_v49, %v1562_v24  ;;  %v1529_v59 = vsel %vm149_vm0, %v1527_v21, %v1528_v20  ;;  %v1552_v47 = vrot.slane %v1545_v31, 2  ;;  %v1549_v60 = vrot.slane %v1543_v57, 2  ;;  %v3844_v24 = vld [vmem:[#allocation24_spill] sm:$0xff]  ;;  %v3845_v20 = vld [vmem:[#allocation25_spill] sm:$0xff]  ;;  %v3846_v21 = vld [vmem:[#allocation26_spill] sm:$0xff] }
 0x113   : > { %v3408_v6 = vpop.permute.xlu0 %930  ;;  %v1604_v12 = vstv %s3383_s10  ;;  %v567_v22 = vadd.f32 %v3843_v5, %v525_v40  ;;  %v1586_v1 = vmul.f32 %v2931_v44, %v1584_v23  ;;  %v1587_v2 = vmul.f32 %v2997_v36, %v1584_v23  ;;  %v3847_v57 = vld [vmem:[#allocation27_spill] sm:$0xff]  ;;  %s3669_s10 = sld [smem:[#allocation3 + $0x30]] }
 0x114   : > { %1514 = vrot.lane.b32.xlu1 %v1511_v19, %s2384_s9  ;;  %v1585_v3 = vmul.f32 %v2989_v50, %v1584_v23  ;;  %v566_v19 = vadd.f32 %v3844_v24, %v524_v7  ;;  %v587_v11 = vadd.f32 %v3845_v20, %v545_v13  ;;  %v1570_v45 = vrot.slane %v1564_v42, 2 }
 0x115   : > { %1512 = vrot.lane.b32.xlu0 %v1509_v41, %s2384_s9  ;;  %v1572_v41 = vrot.slane %v1565_v54, 2  ;;  %v586_v31 = vadd.f32 %v3846_v21, %v544_v51  ;;  %v609_v32 = vadd.f32 %v3847_v57, %v567_v22  ;;  %v1569_v27 = vrot.slane %v1563_v38, 2 }
 0x116   : > { %v3424_v52 = vpop.permute.xlu1 %954  ;;  %v1606_v48 = vmul.f32 %v2893_v58, %v1604_v12  ;;  %v1553_v40 = vsel %vm184_vm1, %v1550_v30, %v1552_v47  ;;  %v1551_v16 = vsel %vm184_vm1, %v1549_v60, %v1550_v30  ;;  %v1607_v7 = vmul.f32 %v3030_v9, %v1604_v12  ;;  %v3850_v30 = vld [vmem:[#allocation30_spill] sm:$0xff] }
 0x117   : > { %v3426_v8 = vpop.permute.xlu0 %952  ;;  %v1626_v43 = vstv %s3401_s11  ;;  %v1592_v54 = vrot.slane %v1586_v1, 3  ;;  %v1594_v23 = vrot.slane %v1587_v2, 3  ;;  %v1591_v15 = vrot.slane %v1585_v3, 3  ;;  %v3851_v3 = vld [vmem:[#allocation33_spill] sm:$0xff]  ;;  %s2225_s11 = sld [smem:[#allocation3 + $0x61]] }
 0x118   : > { %1534 = vrot.lane.b32.xlu1 %v1531_v4, %s2384_s9  ;;  %v1605_v51 = vmul.f32 %v2873_v49, %v1604_v12  ;;  %v3848_v4 = vld [vmem:[#allocation28_spill] sm:$0xff]  ;;  %v628_v60 = vadd.f32 %v3850_v30, %v586_v31  ;;  %v1573_v5 = vsel %vm184_vm1, %v1570_v45, %v1572_v41  ;;  %v1571_v22 = vsel %vm184_vm1, %v1569_v27, %v1570_v45  ;;  %v3856_v30 = vld [vmem:[#allocation38_spill] sm:$0xff] }
 0x119   : > { %1532 = vrot.lane.b32.xlu0 %v1529_v59, %s2384_s9  ;;  %v608_v38 = vadd.f32 %v3848_v4, %v566_v19  ;;  %v3849_v59 = vld [vmem:[#allocation29_spill] sm:$0xff]  ;;  %v1612_v1 = vrot.slane %v1606_v48, 3  ;;  %v3457_v2 = vmul.f32 %v2931_v44, %v1626_v43  ;;  %v1629_v12 = vmul.f32 %v2997_v36, %v1626_v43  ;;  %v3852_v19 = vld [vmem:[#allocation34_spill] sm:$0xff]  ;;  %v3854_v4 = vld [vmem:[#allocation32_spill] sm:$0xff] }
 0x11a   : > { %v3442_v13 = vpop.permute.xlu1 %974  ;;  %v629_v47 = vadd.f32 %v3849_v59, %v587_v11  ;;  %v656_v20 = vadd.f32 %v3852_v19, %v628_v60  ;;  %v1614_v11 = vrot.slane %v1607_v7, 3  ;;  %v1646_v21 = vstv %s3421_s27  ;;  %s114_s27 = sand.u32 1, %s2369_s15  }
 0x11b   : > { %v3444_v42 = vpop.permute.xlu0 %972  ;;  %v1595_v57 = vsel %vm219_vm2, %v1592_v54, %v1594_v23  ;;  %v1593_v45 = vsel %vm219_vm2, %v1591_v15, %v1592_v54  ;;  %v1611_v27 = vrot.slane %v1605_v51, 3  ;;  %v1627_v48 = vmul.f32 %v2989_v50, %v1626_v43 }
 0x11c   : > { %1556 = vrot.lane.b32.xlu1 %v1553_v40, %s2384_s9  ;;  %v657_v24 = vadd.f32 %v3851_v3, %v629_v47  ;;  %v3853_v40 = vld [vmem:[#allocation31_spill] sm:$0xff]  ;;  %v643_v59 = vadd.f32 %v3854_v4, %v608_v38  ;;  %v3855_v47 = vld [vmem:[#allocation37_spill] sm:$0xff]  ;;  %v698_v60 = vadd.f32 %v3856_v30, %v656_v20  ;;  %v1634_v54 = vrot.slane %v3457_v2, 4  ;;  %v3858_v38 = vld [vmem:[#allocation36_spill] sm:$0xff] }
 0x11d   : > { %1554 = vrot.lane.b32.xlu0 %v1551_v16, %s2384_s9  ;;  %v644_v16 = vadd.f32 %v3853_v40, %v609_v32  ;;  %v1636_v23 = vrot.slane %v1629_v12, 4  ;;  %v1648_v43 = vmul.f32 %v2893_v58, %v1646_v21  ;;  %v1649_v15 = vmul.f32 %v3030_v9, %v1646_v21  ;;  %v3857_v32 = vld [vmem:[#allocation35_spill] sm:$0xff] }
 0x11e   : > { %v3463_v31 = vpop.permute.xlu1 %996  ;;  %v699_v7 = vadd.f32 %v3855_v47, %v657_v24  ;;  %v678_v3 = vadd.f32 %v3858_v38, %v643_v59  ;;  %v1615_v2 = vsel %vm219_vm2, %v1612_v1, %v1614_v11  ;;  %v1613_v12 = vsel %vm219_vm2, %v1611_v27, %v1612_v1  ;;  %v3859_v4 = vld [vmem:[#allocation39_spill] sm:$0xff] }
 0x11f   : > { %v3465_v41 = vpop.permute.xlu0 %994  ;;  %v679_v51 = vadd.f32 %v3857_v32, %v644_v16  ;;  %v1647_v20 = vmul.f32 %v2873_v49, %v1646_v21  ;;  %v1668_v40 = vstv %s3447_s12  ;;  %v3860_v16 = vld [vmem:[#allocation40_spill] sm:$0xff]  ;;  %v1633_v11 = vrot.slane %v1627_v48, 4  ;;  %s2127_s12 = sshll.u32 %s114_s27, 4 }
 0x120   : > { %1576 = vrot.lane.b32.xlu1 %v1573_v5, %s2384_s9  ;;  %v741_v24 = vadd.f32 %v3189_v0, %v699_v7  ;;  %v740_v5 = vadd.f32 %v3191_v55, %v698_v60  ;;  %v720_v30 = vadd.f32 %v3860_v16, %v678_v3  ;;  %v1637_v55 = vsel %vm254_vm3, %v1634_v54, %v1636_v23 }
 0x121   : > { %1574 = vrot.lane.b32.xlu0 %v1571_v22, %s2384_s9  ;;  %v721_v47 = vadd.f32 %v3859_v4, %v679_v51  ;;  %v1654_v1 = vrot.slane %v1648_v43, 4  ;;  %v1656_v27 = vrot.slane %v1649_v15, 4  ;;  %v1670_v48 = vmul.f32 %v2931_v44, %v1668_v40 }
 0x122   : > { %v3487_v19 = vpop.permute.xlu1 %1016  ;;  %v783_v59 = vadd.f32 %v3234_v56, %v741_v24  ;;  %v782_v0 = vadd.f32 %v3236_v63, %v740_v5  ;;  %v762_v21 = vadd.f32 %v3214_v17, %v720_v30  ;;  %v1671_v60 = vmul.f32 %v2997_v36, %v1668_v40 }
 0x123   : > { %v3489_v22 = vpop.permute.xlu0 %1014  ;;  %v763_v49 = vadd.f32 %v3212_v29, %v721_v47  ;;  %v1688_v23 = vstv %s3470_s13  ;;  %v1657_v15 = vsel %vm254_vm3, %v1654_v1, %v1656_v27  ;;  %v1669_v32 = vmul.f32 %v2989_v50, %v1668_v40  ;;  %v3539_v40 = vld [vmem:[%s2460_s6 + $0x18] sm:$0xff]  ;;  %s2233_s13 = sshll.u32 %s2428_s17, 8 }
 0x124   : > { %1598 = vrot.lane.b32.xlu1 %v1595_v57, %s2384_s9  ;;  %v825_v56 = vadd.f32 %v3282_v35, %v783_v59  ;;  %v824_v63 = vadd.f32 %v3284_v25, %v782_v0  ;;  %v804_v29 = vadd.f32 %v3259_v62, %v762_v21  ;;  %v1635_v25 = vsel %vm254_vm3, %v1633_v11, %v1634_v54 }
 0x125   : > { %1596 = vrot.lane.b32.xlu0 %v1593_v45, %s2384_s9  ;;  %v1653_v45 = vrot.slane %v1647_v20, 4  ;;  %v805_v43 = vadd.f32 %v3257_v26, %v763_v49  ;;  %v1710_v51 = vstv %s3481_s18  ;;  %v1676_v54 = vrot.slane %v1670_v48, 5  ;;  %s116_s18 = scalar_lea.vmem [#allocation4], %s2127_s12 }
 0x126   : > { %v3508_v57 = vpop.permute.xlu1 %1038  ;;  %v867_v17 = vadd.f32 %v3331_v33, %v825_v56  ;;  %v866_v35 = vadd.f32 %v3333_v61, %v824_v63  ;;  %v846_v26 = vadd.f32 %v3310_v34, %v804_v29  ;;  %v1678_v5 = vrot.slane %v1671_v60, 5 }
 0x127   : > { %v3510_v7 = vpop.permute.xlu0 %1036  ;;  %v847_v38 = vadd.f32 %v3308_v37, %v805_v43  ;;  %v1655_v24 = vsel %vm254_vm3, %v1653_v45, %v1654_v1  ;;  %v1691_v20 = vmul.f32 %v3030_v9, %v1688_v23  ;;  %v1689_v4 = vmul.f32 %v3539_v40, %v1688_v23 }
 0x128   : > { %1618 = vrot.lane.b32.xlu1 %v1615_v2, %s2384_s9  ;;  %v909_v62 = vadd.f32 %v3366_v46, %v867_v17  ;;  %v908_v33 = vadd.f32 %v3368_v28, %v866_v35  ;;  %v1690_v2 = vmul.f32 %v2893_v58, %v1688_v23  ;;  %v888_v37 = vadd.f32 %v3346_v10, %v846_v26 }
 0x129   : > { %1616 = vrot.lane.b32.xlu0 %v1613_v12, %s2384_s9  ;;  %v889_v12 = vadd.f32 %v3344_v39, %v847_v38  ;;  %v1675_v28 = vrot.slane %v1669_v32, 5  ;;  %v1730_v58 = vstv %s3502_s20  ;;  %v1679_v30 = vsel %vm289_vm4, %v1676_v54, %v1678_v5  ;;  %s2061_s20 = sshll.u32 %s116_s18, 4  ;;  %s3717_s20 = int_to_ptr.vmem [resolvable:$true] %s2061_s20 }
 0x12a   : > { %v1059_v61 = vpop.permute.xlu1 %1058  ;;  %v937_v34 = vadd.f32 %v3406_v53, %v909_v62  ;;  %v936_v46 = vadd.f32 %v3408_v6, %v908_v33  ;;  %v923_v10 = vadd.f32 %v3388_v14, %v888_v37  ;;  %v1696_v59 = vrot.slane %v1690_v2, 5  ;;  %s2315_s17 = scalar_lea.vmem %s3717_s20, 256 }
 0x12b   : > { %v1057_v3 = vpop.permute.xlu0 %1056  ;;  %v924_v39 = vadd.f32 %v3386_v18, %v889_v12  ;;  %v1712_v0 = vmul.f32 %v2931_v44, %v1710_v51  ;;  %v1695_v27 = vrot.slane %v1689_v4, 5  ;;  %v1711_v44 = vmul.f32 %v2989_v50, %v1710_v51  ;;  %p2316_p2 = scmp.ne.s32.totalorder %s3717_s20, %s2315_s17 }
 0x12c   : > { %1640 = vrot.lane.b32.xlu1 %v1637_v55, %s2384_s9  ;;  %v979_v53 = vadd.f32 %v3442_v13, %v937_v34  ;;  %v978_v6 = vadd.f32 %v3444_v42, %v936_v46  ;;  %v1713_v55 = vmul.f32 %v2997_v36, %v1710_v51  ;;  %v958_v1 = vadd.f32 %v3426_v8, %v923_v10  ;;  %v3586_v46 = vld [vmem:[%s2460_s6 + $0x8] sm:$0xff] }
 0x12d   : > { %1638 = vrot.lane.b32.xlu0 %v1635_v25, %s2384_s9  ;;  %v959_v11 = vadd.f32 %v3424_v52, %v924_v39  ;;  %v1677_v13 = vsel %vm289_vm4, %v1675_v28, %v1676_v54  ;;  %v1698_v42 = vrot.slane %v1691_v20, 5  ;;  %v1718_v56 = vrot.slane %v1712_v0, 6  ;;  %p2317_p3 = pnand %p2316_p2, %p2445_p10 }
 0x12e   : > { %v1081_v47 = vpop.permute.xlu1 %1080  ;;  %v1021_v18 = vadd.f32 %v3487_v19, %v979_v53  ;;  %v1020_v14 = vadd.f32 %v3489_v22, %v978_v6  ;;  %v1000_v52 = vadd.f32 %v3465_v41, %v958_v1  ;;  %v3561_v22 = vld [vmem:[%s2460_s6 + $0x20] sm:$0xff]  ;;  %v1720_v41 = vrot.slane %v1713_v55, 6  ;;  %v3598_v6 = vld [vmem:[%s2460_s6 + $0x10] sm:$0x3f] }
 0x12f   : > { %v1079_v16 = vpop.permute.xlu0 %1078  ;;  %v1001_v36 = vadd.f32 %v3463_v31, %v959_v11  ;;  %v1732_v63 = vmul.f32 %v3561_v22, %v1730_v58  ;;  %v1699_v50 = vsel %vm289_vm4, %v1696_v59, %v1698_v42  ;;  %v1697_v31 = vsel %vm289_vm4, %v1695_v27, %v1696_v59  ;;  %p2318_p4 = pneg %p2317_p3 }
 0x130   : > { %1660 = vrot.lane.b32.xlu1 %v1657_v15, %s2384_s9  ;;  %v1063_v8 = vadd.f32 %v1059_v61, %v1021_v18  ;;  %v1062_v49 = vadd.f32 %v1057_v3, %v1020_v14  ;;  %v1042_v48 = vadd.f32 %v3510_v7, %v1000_v52  ;;  %v1733_v43 = vmul.f32 %v3030_v9, %v1730_v58 }
 0x131   : > { %1658 = vrot.lane.b32.xlu0 %v1655_v24, %s2384_s9  ;;  %v1043_v45 = vadd.f32 %v3508_v57, %v1001_v36  ;;  %v1717_v57 = vrot.slane %v1711_v44, 6  ;;  %v1731_v7 = vmul.f32 %v3539_v40, %v1730_v58  ;;  %v1721_v51 = vsel %vm324_vm5, %v1718_v56, %v1720_v41  ;;  %v3590_v58 = vld [vmem:[%s2460_s6] sm:$0xff]  ;;  %v3610_v36 = vld [vmem:[%s2460_s6 + $0x28] sm:$0x3f]  ;;  %s3620_s6 = sld [smem:[#allocation3 + $0x4c]] }
 0x132   : > { %v1101_v21 = vpop.permute.xlu1 %1100  ;;  %v1084_v17 = vadd.f32 %v1079_v16, %v1042_v48  ;;  %v1738_v38 = vrot.slane %v1732_v63, 6  ;;  %v1740_v26 = vrot.slane %v1733_v43, 6  ;;  %v1752_v54 = vstv %s3566_s7 }
 0x133   : > { %v1099_v19 = vpop.permute.xlu0 %1098  ;;  %v1105_v60 = vadd.f32 %v1101_v21, %v1063_v8  ;;  %v1085_v29 = vadd.f32 %v1081_v47, %v1043_v45  ;;  %v1719_v9 = vsel %vm324_vm5, %v1717_v57, %v1718_v56  ;;  %v1737_v62 = vrot.slane %v1731_v7, 6 }
 0x134   : > { %v1104_v23 = vadd.f32 %v1099_v19, %v1062_v49  ;;  %1682 = vrot.lane.b32.xlu1 %v1679_v30, %s2384_s9  ;;  %v1741_v5 = vsel %vm324_vm5, %v1738_v38, %v1740_v26  ;;  %v1780_v12 = vstv %s2214_s21  ;;  %v1754_v28 = vmul.f32 %v3586_v46, %v1752_v54 }
 0x135   : > { %1680 = vrot.lane.b32.xlu0 %v1677_v13, %s2384_s9  ;;  %v1739_v2 = vsel %vm324_vm5, %v1737_v62, %v1738_v38  ;;  %v1753_v39 = vmul.f32 %v3590_v58, %v1752_v54  ;;  %v1765_v10 = vstv %s3574_s25  ;;  %v1782_v53 = vmul.f32 %v3586_v46, %v1780_v12  ;;  %s3715_s25 = scalar_lea.hbm %s3761_s2, %s2233_s13 }
 0x136   : > { %v1123_v35 = vpop.permute.xlu1 %1122  ;;  %v1783_v47 = vmul.f32 %v3598_v6, %v1780_v12  ;;  %v1781_v16 = vmul.f32 %v3590_v58, %v1780_v12  ;;  %v1800_v30 = vstv %s2215_s26  ;;  %v1767_v55 = vmul.f32 %v3561_v22, %v1765_v10  ;;  %s3719_s26 = scalar_lea.sflag [#allocation5], %s114_s27 }
 0x137   : > { %v1121_v25 = vpop.permute.xlu0 %1120  ;;  %v1127_v15 = vadd.f32 %v1123_v35, %v1085_v29  ;;  %v1766_v18 = vmul.f32 %v3539_v40, %v1765_v10  ;;  %v1822_v14 = vstv %s2216_s28  ;;  %v1788_v13 = vrot.slane %v1782_v53, 1  ;;  %s2386_s28 = smov [#allocation4]  }
 0x138   : > { %v1126_v32 = vadd.f32 %v1121_v25, %v1084_v17  ;;  %1702 = vrot.lane.b32.xlu1 %v1699_v50, %s2384_s9  ;;  %v1790_v42 = vrot.slane %v1783_v47, 1  ;;  %v1787_v27 = vrot.slane %v1781_v16, 1  ;;  %v1802_v44 = vmul.f32 %v3561_v22, %v1800_v30 }
 0x139   : > { %1700 = vrot.lane.b32.xlu0 %v1697_v31, %s2384_s9  ;;  %v1803_v52 = vmul.f32 %v3610_v36, %v1800_v30  ;;  %v1801_v8 = vmul.f32 %v3539_v40, %v1800_v30  ;;  %v1824_v63 = vmul.f32 %v3586_v46, %v1822_v14  ;;  %v1825_v45 = vmul.f32 %v3598_v6, %v1822_v14 }
 0x13a   : > { %v1143_v33 = vpop.permute.xlu1 %1142  ;;  %v1791_v48 = vsel %vm149_vm0, %v1788_v13, %v1790_v42  ;;  %v1823_v41 = vmul.f32 %v3590_v58, %v1822_v14  ;;  %v1842_v43 = vstv %s3602_s29  ;;  %v1906_v14 = vstv %s3631_s4  ;;  %s2319_s29 = sshll.u32 %s2386_s28, 4  ;;  %s2320_s29 = int_to_ptr.vmem [resolvable:$false] %s2319_s29 }
 0x13b   : > { %v1141_v61 = vpop.permute.xlu0 %1140  ;;  %v1147_v3 = vadd.f32 %v1143_v33, %v1105_v60  ;;  %v1789_v60 = vsel %vm149_vm0, %v1787_v27, %v1788_v13  ;;  %v1810_v50 = vrot.slane %v1803_v52, 1  ;;  %v1807_v31 = vrot.slane %v1801_v8, 1  ;;  %p2322_p5 = scmp.lt.s32.totalorder %s3717_s20, %s2320_s29 }
 0x13c   : > { %v1146_v24 = vadd.f32 %v1141_v61, %v1104_v23  ;;  %1724 = vrot.lane.b32.xlu1 %v1721_v51, %s2384_s9  ;;  %v1808_v23 = vrot.slane %v1802_v44, 1  ;;  %v1830_v35 = vrot.slane %v1824_v63, 2  ;;  %v1832_v25 = vrot.slane %v1825_v45, 2 }
 0x13d   : > { %1722 = vrot.lane.b32.xlu0 %v1719_v9, %s2384_s9  ;;  %v1864_v51 = vstv %s2218_s3  ;;  %v1829_v26 = vrot.slane %v1823_v41, 2  ;;  %v1843_v62 = vmul.f32 %v3539_v40, %v1842_v43  ;;  %v1926_v8 = vstv %s3634_s5 }
 0x13e   : > { %v1165_v37 = vpop.permute.xlu1 %1164  ;;  %v1811_v9 = vsel %vm149_vm0, %v1808_v23, %v1810_v50  ;;  %v1809_v38 = vsel %vm149_vm0, %v1807_v31, %v1808_v23  ;;  %v1833_v54 = vsel %vm184_vm1, %v1830_v35, %v1832_v25  ;;  %v1866_v12 = vmul.f32 %v3586_v46, %v1864_v51 }
 0x13f   : > { %v1163_v34 = vpop.permute.xlu0 %1162  ;;  %v1169_v20 = vadd.f32 %v1165_v37, %v1127_v15  ;;  %v1844_v15 = vmul.f32 %v3561_v22, %v1842_v43  ;;  %v1884_v37 = vstv %s3620_s6  ;;  %v1928_v41 = vmul.f32 %v3561_v22, %v1926_v8 }
 0x140   : > { %v1168_v4 = vadd.f32 %v1163_v34, %v1126_v32  ;;  %1744 = vrot.lane.b32.xlu1 %v1741_v5, %s2384_s9  ;;  %v1845_v32 = vmul.f32 %v3610_v36, %v1842_v43  ;;  %v1831_v34 = vsel %vm184_vm1, %v1829_v26, %v1830_v35  ;;  %v1886_v16 = vmul.f32 %v3561_v22, %v1884_v37 }
 0x141   : > { %1742 = vrot.lane.b32.xlu0 %v1739_v2, %s2384_s9  ;;  %v1850_v5 = vrot.slane %v1844_v15, 2  ;;  %s2223_s9 = sld [smem:[#allocation3 + $0x5a]]  ;;  %v1929_v35 = vmul.f32 %v3610_v36, %v1926_v8  ;;  %v1927_v25 = vmul.f32 %v3539_v40, %v1926_v8  ;;  %v1948_v15 = vstv %s3651_s8 }
 0x142   : > { %v1185_v59 = vpop.permute.xlu1 %1184  ;;  %v1852_v2 = vrot.slane %v1845_v32, 2  ;;  %v1892_v52 = vrot.slane %v1886_v16, 3  ;;  %v1934_v26 = vrot.slane %v1928_v41, 4 }
 0x143   : > { %v1183_v0 = vpop.permute.xlu0 %1182  ;;  %v1189_v11 = vadd.f32 %v1185_v59, %v1147_v3  ;;  %v1872_v59 = vrot.slane %v1866_v12, 3 }
 0x144   : > { %v1188_v1 = vadd.f32 %v1183_v0, %v1146_v24  ;;  %1759 = vrot.lane.b32.xlu1 %v1754_v28, %s2385_s30  ;;  %v1849_v28 = vrot.slane %v1843_v62, 2  ;;  %v1853_v30 = vsel %vm184_vm1, %v1850_v5, %v1852_v2  ;;  %v1887_v0 = vmul.f32 %v3610_v36, %v1884_v37 }
 0x145   : > { %1757 = vrot.lane.b32.xlu0 %v1753_v39, %s2385_s30  ;;  %v1949_v2 = vmul.f32 %v3590_v58, %v1948_v15 }
 0x146   : > { %v1200_v49 = vpop.permute.xlu1 %1199 }
 0x147   : > { %v1198_v21 = vpop.permute.xlu0 %1197  ;;  %v1204_v19 = vadd.f32 %v1200_v49, %v1169_v20  ;;  %v1867_v20 = vmul.f32 %v3598_v6, %v1864_v51  ;;  %v1894_v49 = vrot.slane %v1887_v0, 3 }
 0x148   : > { %v1203_v56 = vadd.f32 %v1198_v21, %v1168_v4  ;;  %1772 = vrot.lane.b32.xlu1 %v1767_v55, %s2385_s30  ;;  %v1865_v4 = vmul.f32 %v3590_v58, %v1864_v51  ;;  %v1885_v55 = vmul.f32 %v3539_v40, %v1884_v37 }
 0x149   : > { %1770 = vrot.lane.b32.xlu0 %v1766_v18, %s2385_s30  ;;  %v1895_v43 = vsel %vm219_vm2, %v1892_v52, %v1894_v49  ;;  %v2010_v49 = vstv %s2225_s11 }
 0x14a   : > { %v1213_v29 = vpop.permute.xlu1 %1212  ;;  %v1871_v18 = vrot.slane %v1865_v4, 3  ;;  %v1891_v21 = vrot.slane %v1885_v55, 3 }
 0x14b   : > { %v1211_v17 = vpop.permute.xlu0 %1210  ;;  %v1217_v57 = vadd.f32 %v1213_v29, %v1189_v11  ;;  %v1851_v11 = vsel %vm184_vm1, %v1849_v28, %v1850_v5  ;;  %v1933_v5 = vrot.slane %v1927_v25, 4 }
 0x14c   : > { %v1216_v7 = vadd.f32 %v1211_v17, %v1188_v1  ;;  %1794 = vrot.lane.b32.xlu1 %v1791_v48, %s2385_s30  ;;  %v1874_v1 = vrot.slane %v1867_v20, 3  ;;  %v1873_v45 = vsel %vm219_vm2, %v1871_v18, %v1872_v59  ;;  %v1907_v48 = vmul.f32 %v3590_v58, %v1906_v14 }
 0x14d   : > { %1792 = vrot.lane.b32.xlu0 %v1789_v60, %s2385_s30  ;;  %v1893_v29 = vsel %vm219_vm2, %v1891_v21, %v1892_v52  ;;  %v1935_v16 = vsel %vm254_vm3, %v1933_v5, %v1934_v26 }
 0x14e   : > { %v1235_v33 = vpop.permute.xlu1 %1234  ;;  %v1875_v63 = vsel %vm219_vm2, %v1872_v59, %v1874_v1  ;;  %v1990_v59 = vstv %s3669_s10 }
 0x14f   : > { %v1233_v61 = vpop.permute.xlu0 %1232  ;;  %v1239_v3 = vadd.f32 %v1235_v33, %v1204_v19  ;;  %v1908_v19 = vmul.f32 %v3586_v46, %v1906_v14  ;;  %v1950_v33 = vmul.f32 %v3586_v46, %v1948_v15  ;;  %v1993_v52 = vmul.f32 %v3598_v6, %v1990_v59 }
 0x150   : > { %v1238_v24 = vadd.f32 %v1233_v61, %v1203_v56  ;;  %1814 = vrot.lane.b32.xlu1 %v1811_v9, %s2385_s30  ;;  %v1909_v56 = vmul.f32 %v3598_v6, %v1906_v14  ;;  %v1951_v61 = vmul.f32 %v3598_v6, %v1948_v15  ;;  %v1991_v8 = vmul.f32 %v3590_v58, %v1990_v59 }
 0x151   : > { %1812 = vrot.lane.b32.xlu0 %v1809_v38, %s2385_s30  ;;  %v1914_v17 = vrot.slane %v1908_v19, 4  ;;  %v1956_v4 = vrot.slane %v1950_v33, 5  ;;  %v2013_v58 = vmul.f32 %v3610_v36, %v2010_v49 }
 0x152   : > { %v1255_v39 = vpop.permute.xlu1 %1254  ;;  %v1997_v6 = vrot.slane %v1991_v8, 6 }
 0x153   : > { %v1253_v10 = vpop.permute.xlu0 %1252  ;;  %v1259_v53 = vadd.f32 %v1255_v39, %v1217_v57  ;;  %v1916_v57 = vrot.slane %v1909_v56, 4  ;;  %v1958_v39 = vrot.slane %v1951_v61, 5 }
 0x154   : > { %v1258_v47 = vadd.f32 %v1253_v10, %v1216_v7  ;;  %1836 = vrot.lane.b32.xlu1 %v1833_v54, %s2385_s30  ;;  %v1913_v7 = vrot.slane %v1907_v48, 4  ;;  %v1936_v54 = vrot.slane %v1929_v35, 4 }
 0x155   : > { %1834 = vrot.lane.b32.xlu0 %v1831_v34, %s2385_s30  ;;  %v1917_v62 = vsel %vm254_vm3, %v1914_v17, %v1916_v57  ;;  %v1959_v14 = vsel %vm289_vm4, %v1956_v4, %v1958_v39 }
 0x156   : > { %v1277_v13 = vpop.permute.xlu1 %1276 }
 0x157   : > { %v1275_v42 = vpop.permute.xlu0 %1274  ;;  %v1281_v27 = vadd.f32 %v1277_v13, %v1239_v3  ;;  %v1968_v3 = vstv %s2223_s9 }
 0x158   : > { %v1280_v44 = vadd.f32 %v1275_v42, %v1238_v24  ;;  %1856 = vrot.lane.b32.xlu1 %v1853_v30, %s2385_s30  ;;  %v1915_v24 = vsel %vm254_vm3, %v1913_v7, %v1914_v17  ;;  %v1970_v20 = vmul.f32 %v3561_v22, %v1968_v3  ;;  %v1971_v10 = vmul.f32 %v3610_v36, %v1968_v3 }
 0x159   : > { %1854 = vrot.lane.b32.xlu0 %v1851_v11, %s2385_s30  ;;  %v1955_v30 = vrot.slane %v1949_v2, 5 }
 0x15a   : > { %v1297_v60 = vpop.permute.xlu1 %1296  ;;  %v1976_v18 = vrot.slane %v1970_v20, 5  ;;  %v1978_v13 = vrot.slane %v1971_v10, 5 }
 0x15b   : > { %v1295_v23 = vpop.permute.xlu0 %1294  ;;  %v1301_v50 = vadd.f32 %v1297_v60, %v1259_v53  ;;  %v1969_v53 = vmul.f32 %v3539_v40, %v1968_v3  ;;  %v2012_v60 = vmul.f32 %v3561_v22, %v2010_v49  ;;  %v2020_v22 = vrot.slane %v2013_v58, 6 }
 0x15c   : > { %v1300_v31 = vadd.f32 %v1295_v23, %v1258_v47  ;;  %1878 = vrot.lane.b32.xlu1 %v1875_v63, %s2385_s30  ;;  %v1937_v47 = vsel %vm254_vm3, %v1934_v26, %v1936_v54  ;;  %v2000_v23 = vrot.slane %v1993_v52, 6 }
 0x15d   : > { %1876 = vrot.lane.b32.xlu0 %v1873_v45, %s2385_s30  ;;  %v1975_v42 = vrot.slane %v1969_v53, 5  ;;  %v1979_v45 = vsel %vm289_vm4, %v1976_v18, %v1978_v13  ;;  %v2018_v17 = vrot.slane %v2012_v60, 6 }
 0x15e   : > { %v1319_v32 = vpop.permute.xlu1 %1318 }
 0x15f   : > { %v1317_v51 = vpop.permute.xlu0 %1316  ;;  %v1323_v9 = vadd.f32 %v1319_v32, %v1281_v27  ;;  %v1992_v27 = vmul.f32 %v3586_v46, %v1990_v59  ;;  %v1977_v48 = vsel %vm289_vm4, %v1975_v42, %v1976_v18 }
 0x160   : > { %v1322_v38 = vadd.f32 %v1317_v51, %v1280_v44  ;;  %1898 = vrot.lane.b32.xlu1 %v1895_v43, %s2385_s30  ;;  %v1957_v44 = vsel %vm289_vm4, %v1955_v30, %v1956_v4 }
 0x161   : > { %1896 = vrot.lane.b32.xlu0 %v1893_v29, %s2385_s30  ;;  %v1998_v46 = vrot.slane %v1992_v27, 6 }
 0x162   : > { %v1339_v12 = vpop.permute.xlu1 %1338 }
 0x163   : > { %v1337_v37 = vpop.permute.xlu0 %1336  ;;  %v1343_v34 = vadd.f32 %v1339_v12, %v1301_v50  ;;  %v2011_v50 = vmul.f32 %v3539_v40, %v2010_v49  ;;  %v2001_v57 = vsel %vm324_vm5, %v1998_v46, %v2000_v23  ;;  %v1999_v7 = vsel %vm324_vm5, %v1997_v6, %v1998_v46 }
 0x164   : > { %v1342_v28 = vadd.f32 %v1337_v37, %v1300_v31  ;;  %1920 = vrot.lane.b32.xlu1 %v1917_v62, %s2385_s30  ;;  %v2021_v40 = vsel %vm324_vm5, %v2018_v17, %v2020_v22 }
 0x165   : > { %1918 = vrot.lane.b32.xlu0 %v1915_v24, %s2385_s30  ;;  %v2017_v35 = vrot.slane %v2011_v50, 6 }
 0x166   : > { %v1361_v0 = vpop.permute.xlu1 %1360 }
 0x167   : > { %v1359_v55 = vpop.permute.xlu0 %1358  ;;  %v1365_v11 = vadd.f32 %v1361_v0, %v1323_v9  ;;  %v2019_v51 = vsel %vm324_vm5, %v2017_v35, %v2018_v17 }
 0x168   : > { %v1364_v1 = vadd.f32 %v1359_v55, %v1322_v38  ;;  %1940 = vrot.lane.b32.xlu1 %v1937_v47, %s2385_s30 }
 0x169   : > { %1938 = vrot.lane.b32.xlu0 %v1935_v16, %s2385_s30 }
 0x16a   : > { %v1381_v21 = vpop.permute.xlu1 %1380 }
 0x16b   : > { %v1379_v19 = vpop.permute.xlu0 %1378  ;;  %v1385_v56 = vadd.f32 %v1381_v21, %v1343_v34 }
 0x16c   : > { %v1384_v63 = vadd.f32 %v1379_v19, %v1342_v28  ;;  %1962 = vrot.lane.b32.xlu1 %v1959_v14, %s2385_s30 }
 0x16d   : > { %1960 = vrot.lane.b32.xlu0 %v1957_v44, %s2385_s30 }
 0x16e   : > { %v1403_v31 = vpop.permute.xlu1 %1402 }
 0x16f   : > { %v1401_v41 = vpop.permute.xlu0 %1400  ;;  %v1407_v43 = vadd.f32 %v1403_v31, %v1365_v11 }
 0x170   : > { %v1406_v29 = vadd.f32 %v1401_v41, %v1364_v1  ;;  %1982 = vrot.lane.b32.xlu1 %v1979_v45, %s2385_s30 }
 0x171   : > { %1980 = vrot.lane.b32.xlu0 %v1977_v48, %s2385_s30 }
 0x172   : > { %v1423_v25 = vpop.permute.xlu1 %1422 }
 0x173   : > { %v1421_v15 = vpop.permute.xlu0 %1420  ;;  %v1427_v36 = vadd.f32 %v1423_v25, %v1385_v56 }
 0x174   : > { %v1426_v32 = vadd.f32 %v1421_v15, %v1384_v63  ;;  %2004 = vrot.lane.b32.xlu1 %v2001_v57, %s2385_s30 }
 0x175   : > { %2002 = vrot.lane.b32.xlu0 %v1999_v7, %s2385_s30 }
 0x176   : > { %v1445_v9 = vpop.permute.xlu1 %1444 }
 0x177   : > { %v1443_v38 = vpop.permute.xlu0 %1442  ;;  %v1449_v26 = vadd.f32 %v1445_v9, %v1407_v43 }
 0x178   : > { %v1448_v62 = vadd.f32 %v1443_v38, %v1406_v29  ;;  %2024 = vrot.lane.b32.xlu1 %v2021_v40, %s2385_s30 }
 0x179   : > { %2022 = vrot.lane.b32.xlu0 %v2019_v51, %s2385_s30  ;;  %s2321_s30 = scalar_lea.vmem %s2320_s29, 512 }
 0x17a   : > { %v1465_v33 = vpop.permute.xlu1 %1464  ;;  %p2323_p6 = scmp.lt.s32.totalorder %s2321_s30, %s2315_s17 }
 0x17b   : > { %v1463_v61 = vpop.permute.xlu0 %1462  ;;  %v1469_v3 = vadd.f32 %v1465_v33, %v1427_v36 }
 0x17c   : > { %v1468_v24 = vadd.f32 %v1463_v61, %v1426_v32  ;;  %p2324_p7 = por %p2323_p6, %p2322_p5 }
 0x17e   : > { %v1480_v54 = vpop.permute.xlu1 %1479  ;;  %p2325_p8 = pnand %p2324_p7, %p2318_p4 }
 0x17f   : > { %v1478_v5 = vpop.permute.xlu0 %1477  ;;  %v1484_v2 = vadd.f32 %v1480_v54, %v1449_v26 }
 0x180   : > { %v1483_v12 = vadd.f32 %v1478_v5, %v1448_v62 }
 0x182   : > { %v1493_v37 = vpop.permute.xlu1 %1492 }
 0x183   : > { %v1491_v34 = vpop.permute.xlu0 %1490  ;;  %v1497_v28 = vadd.f32 %v1493_v37, %v1469_v3 }
 0x184   : > { %v1496_v20 = vadd.f32 %v1491_v34, %v1468_v24 }
 0x186   : > { %v1515_v4 = vpop.permute.xlu1 %1514 }
 0x187   : > { %v1513_v39 = vpop.permute.xlu0 %1512  ;;  %v1519_v10 = vadd.f32 %v1515_v4, %v1484_v2 }
 0x188   : > { %v1518_v53 = vadd.f32 %v1513_v39, %v1483_v12 }
 0x18a   : > { %v1535_v47 = vpop.permute.xlu1 %1534 }
 0x18b   : > { %v1533_v16 = vpop.permute.xlu0 %1532  ;;  %v1539_v30 = vadd.f32 %v1535_v47, %v1497_v28 }
 0x18c   : > { %v1538_v59 = vadd.f32 %v1533_v16, %v1496_v20 }
 0x18e   : > { %v1557_v0 = vpop.permute.xlu1 %1556 }
 0x18f   : > { %v1555_v55 = vpop.permute.xlu0 %1554  ;;  %v1561_v11 = vadd.f32 %v1557_v0, %v1519_v10 }
 0x190   : > { %v1560_v1 = vadd.f32 %v1555_v55, %v1518_v53 }
 0x192   : > { %v1577_v18 = vpop.permute.xlu1 %1576 }
 0x193   : > { %v1575_v14 = vpop.permute.xlu0 %1574  ;;  %v1581_v13 = vadd.f32 %v1577_v18, %v1539_v30 }
 0x194   : > { %v1580_v42 = vadd.f32 %v1575_v14, %v1538_v59 }
 0x196   : > { %v1599_v27 = vpop.permute.xlu1 %1598 }
 0x197   : > { %v1597_v44 = vpop.permute.xlu0 %1596  ;;  %v1603_v52 = vadd.f32 %v1599_v27, %v1561_v11 }
 0x198   : > { %v1602_v8 = vadd.f32 %v1597_v44, %v1560_v1 }
 0x19a   : > { %v1619_v49 = vpop.permute.xlu1 %1618 }
 0x19b   : > { %v1617_v21 = vpop.permute.xlu0 %1616  ;;  %v1623_v33 = vadd.f32 %v1619_v49, %v1581_v13 }
 0x19c   : > { %v1622_v61 = vadd.f32 %v1617_v21, %v1580_v42 }
 0x19e   : > { %v1641_v19 = vpop.permute.xlu1 %1640 }
 0x19f   : > { %v1639_v56 = vpop.permute.xlu0 %1638  ;;  %v1645_v3 = vadd.f32 %v1641_v19, %v1603_v52 }
 0x1a0   : > { %v1644_v24 = vadd.f32 %v1639_v56, %v1602_v8 }
 0x1a2   : > { %v1661_v63 = vpop.permute.xlu1 %1660 }
 0x1a3   : > { %v1659_v45 = vpop.permute.xlu0 %1658  ;;  %v1665_v54 = vadd.f32 %v1661_v63, %v1623_v33 }
 0x1a4   : > { %v1664_v5 = vadd.f32 %v1659_v45, %v1622_v61 }
 0x1a6   : > { %v1683_v48 = vpop.permute.xlu1 %1682 }
 0x1a7   : > { %v1681_v46 = vpop.permute.xlu0 %1680  ;;  %v1687_v37 = vadd.f32 %v1683_v48, %v1645_v3 }
 0x1a8   : > { %v1686_v34 = vadd.f32 %v1681_v46, %v1644_v24 }
 0x1aa   : > { %v1703_v60 = vpop.permute.xlu1 %1702 }
 0x1ab   : > { %v1701_v23 = vpop.permute.xlu0 %1700  ;;  %v1707_v28 = vadd.f32 %v1703_v60, %v1665_v54 }
 0x1ac   : > { %v1706_v20 = vadd.f32 %v1701_v23, %v1664_v5 }
 0x1ae   : > { %v1725_v6 = vpop.permute.xlu1 %1724 }
 0x1af   : > { %v1723_v58 = vpop.permute.xlu0 %1722  ;;  %v1729_v4 = vadd.f32 %v1725_v6, %v1687_v37 }
 0x1b0   : > { %v1728_v39 = vadd.f32 %v1723_v58, %v1686_v34 }
 0x1b2   : > { %v1745_v50 = vpop.permute.xlu1 %1744 }
 0x1b3   : > { %v1743_v31 = vpop.permute.xlu0 %1742  ;;  %v1749_v10 = vadd.f32 %v1745_v50, %v1707_v28 }
 0x1b4   : > { %v1748_v53 = vadd.f32 %v1743_v31, %v1706_v20 }
 0x1b6   : > { %v1760_v41 = vpop.permute.xlu1 %1759 }
 0x1b7   : > { %v1758_v43 = vpop.permute.xlu0 %1757  ;;  %v1764_v30 = vadd.f32 %v1760_v41, %v1729_v4 }
 0x1b8   : > { %v1763_v59 = vadd.f32 %v1758_v43, %v1728_v39 }
 0x1ba   : > { %v1773_v29 = vpop.permute.xlu1 %1772 }
 0x1bb   : > { %v1771_v17 = vpop.permute.xlu0 %1770  ;;  %v1777_v0 = vadd.f32 %v1773_v29, %v1749_v10 }
 0x1bc   : > { %v1776_v55 = vadd.f32 %v1771_v17, %v1748_v53 }
 0x1be   : > { %v1795_v57 = vpop.permute.xlu1 %1794 }
 0x1bf   : > { %v1793_v7 = vpop.permute.xlu0 %1792  ;;  %v1799_v11 = vadd.f32 %v1795_v57, %v1764_v30 }
 0x1c0   : > { %v1798_v1 = vadd.f32 %v1793_v7, %v1763_v59 }
 0x1c2   : > { %v1815_v22 = vpop.permute.xlu1 %1814 }
 0x1c3   : > { %v1813_v35 = vpop.permute.xlu0 %1812  ;;  %v1819_v18 = vadd.f32 %v1815_v22, %v1777_v0 }
 0x1c4   : > { %v1818_v14 = vadd.f32 %v1813_v35, %v1776_v55 }
 0x1c6   : > { %v1837_v25 = vpop.permute.xlu1 %1836 }
 0x1c7   : > { %v1835_v15 = vpop.permute.xlu0 %1834  ;;  %v1841_v27 = vadd.f32 %v1837_v25, %v1799_v11 }
 0x1c8   : > { %v1840_v44 = vadd.f32 %v1835_v15, %v1798_v1 }
 0x1ca   : > { %v1857_v36 = vpop.permute.xlu1 %1856 }
 0x1cb   : > { %v1855_v32 = vpop.permute.xlu0 %1854  ;;  %v1861_v52 = vadd.f32 %v1857_v36, %v1819_v18 }
 0x1cc   : > { %v1860_v8 = vadd.f32 %v1855_v32, %v1818_v14 }
 0x1ce   : > { %v1879_v40 = vpop.permute.xlu1 %1878 }
 0x1cf   : > { %v1877_v51 = vpop.permute.xlu0 %1876  ;;  %v1883_v49 = vadd.f32 %v1879_v40, %v1841_v27 }
 0x1d0   : > { %v1882_v21 = vadd.f32 %v1877_v51, %v1840_v44 }
 0x1d2   : > { %v1899_v9 = vpop.permute.xlu1 %1898 }
 0x1d3   : > { %v1897_v38 = vpop.permute.xlu0 %1896  ;;  %v1903_v19 = vadd.f32 %v1899_v9, %v1861_v52 }
 0x1d4   : > { %v1902_v56 = vadd.f32 %v1897_v38, %v1860_v8 }
 0x1d6   : > { %v1921_v26 = vpop.permute.xlu1 %1920 }
 0x1d7   : > { %v1919_v62 = vpop.permute.xlu0 %1918  ;;  %v1925_v48 = vadd.f32 %v1921_v26, %v1883_v49 }
 0x1d8   : > { %v1924_v46 = vadd.f32 %v1919_v62, %v1882_v21 }
 0x1da   : > { %v1941_v2 = vpop.permute.xlu1 %1940 }
 0x1db   : > { %v1939_v12 = vpop.permute.xlu0 %1938  ;;  %v1945_v60 = vadd.f32 %v1941_v2, %v1903_v19 }
 0x1dc   : > { %v1944_v23 = vadd.f32 %v1939_v12, %v1902_v56 }
 0x1de   : > { %v1963_v47 = vpop.permute.xlu1 %1962 }
 0x1df   : > { %v1961_v16 = vpop.permute.xlu0 %1960  ;;  %v1967_v6 = vadd.f32 %v1963_v47, %v1925_v48 }
 0x1e0   : > { %v1966_v58 = vadd.f32 %v1961_v16, %v1924_v46 }
 0x1e2   : > { %v1983_v13 = vpop.permute.xlu1 %1982 }
 0x1e3   : > { %v1981_v42 = vpop.permute.xlu0 %1980  ;;  %v1987_v50 = vadd.f32 %v1983_v13, %v1945_v60 }
 0x1e4   : > { %v1986_v31 = vadd.f32 %v1981_v42, %v1944_v23 }
 0x1e6   : > { %v2005_v63 = vpop.permute.xlu1 %2004 }
 0x1e7   : > { %v2003_v45 = vpop.permute.xlu0 %2002  ;;  %v2009_v29 = vadd.f32 %v2005_v63, %v1967_v6 }
 0x1e8   : > { %v2008_v17 = vadd.f32 %v2003_v45, %v1966_v58 }
 0x1ea   : > { %v2025_v41 = vpop.permute.xlu1 %2024 }
 0x1eb   : > { %v2023_v43 = vpop.permute.xlu0 %2022  ;;  %v2029_v57 = vadd.f32 %v2025_v41, %v1987_v50 }
 0x1ec   : > { %v2028_v7 = vadd.f32 %v2023_v43, %v1986_v31 }
 0x1ed   : > { %v2031_v22 = vadd.f32 %v2029_v57, %v2009_v29 }
 0x1ee   : > { %v2030_v35 = vadd.f32 %v2028_v7, %v2008_v17 }
 0x1ef   : > { %v2227_v25 = vmul.f32 -1.442695, %v2031_v22 }
 0x1f0   : > { %v2226_v15 = vmul.f32 -1.442695, %v2030_v35 }
 0x1f1   : > { %2283 = vpow2.f32 %v2227_v25 }
 0x1f2   : > { %2285 = vpow2.f32 %v2226_v15 }
 0x1fe   : > { %v2284_v36 = vpop.eup %2283 }
 0x1ff   : > { %v2286_v32 = vpop.eup %2285  ;;  %v2039_v40 = vadd.f32 1.0, %v2284_v36 }
 0x200   : > { %v2038_v51 = vadd.f32 1.0, %v2286_v32 }
 0x201   : > { %2287 = vrcp.f32 %v2039_v40 }
 0x202   : > { %2289 = vrcp.f32 %v2038_v51 }
 0x20e   : > { %v2288_v9 = vpop.eup %2287 }
 0x20f   : > { %v2290_v38 = vpop.eup %2289  ;;  %2046 = vst.msk [vmem:[%s116_s18 + $0x8] sm:$0xff] %vm2044_vm6, %v2288_v9 }
 0x210   : > { %2045 = vst.msk [vmem:[%s116_s18] sm:$0xff] %vm2044_vm6, %v2290_v38 }
 0x211   : > { %2328 = shalt.err (!%p2325_p8)
}
 0x212   : > { %s2329_s3 = scalar_lea.hbm %s3715_s25, 256  ;;  %s2333_s5 = scalar_lea.hbm %s3761_s2, 512 }
 0x213   : > { %p2330_p9 = scmp.ne.s32.totalorder %s3715_s25, %s2329_s3  ;;  %p2334_p0 = scmp.lt.s32.totalorder %s3715_s25, %s3761_s2 }
 0x214   : > { %p2335_p1 = scmp.lt.s32.totalorder %s2333_s5, %s2329_s3 }
 0x215   : > { %p2331_p12 = pnand %p2330_p9, %p2445_p10 }
 0x216   : > { %p2336_p2 = por %p2335_p1, %p2334_p0 }
 0x217   : > { %p2332_p13 = pneg %p2331_p12 }
 0x219   : > { %p2337_p3 = pnand %p2336_p2, %p2332_p13 }
 0x21b   : > { %2340 = shalt.err (!%p2337_p3)
}
 0x21c   : > { %s2387_s10 = smov 128   ;;  %s2388_s11 = smov 8  }
 0x21d   : > { %2235 = dma.vmem_to_hbm [thread:$0]  (%p2445_p10), %s3717_s20, 256, %s3715_s25, %s3719_s26, %s2387_s10, %s2387_s10, %s2388_s11  }
 0x21e PF: > { %p2241_p4 = scmp.ge.s32.totalorder %s2377_s16, 2  ;;  %s2076_s27 = sand.u32 1, %s2365_s14  }
 0x21f   : > { %s2077_s12 = scalar_lea.sflag [#allocation5], %s2076_s27 }
 0x220   : > { %p2238_p5 = pnand %p2241_p4, %p2449_p11 }
 0x222   : > { %p2239_p6 = pneg %p2238_p5 }
 0x224   : > { %2360 = dma.done.wait (%p2239_p6), %s2077_s12, 256  }
 0x225   : > { %2362 = vsyncadd (%p2239_p6), %s2077_s12, 4294967040  ;;  %p18_p7 = scmp.ge.s32.totalorder %s2432_s19, 4   ;;  %s3861_s14 = smov %s2369_s15 }
 0x226   : > { %s3862_s15 = smov %s2373_s0  ;;  %s3863_s0 = smov %s2443_s22 }
 0x227   : > { %s3864_s16 = smov %s2432_s19  ;;  %20 = sbr.rel (!%p18_p7) target bundleno = 18 (0x12), region = 59 }
 0x22c   :  { %2082 = vsyncpa [#allocation5], 1 }
 0x22d   :  { %2084 = vsyncpa [#allocation5 + $0x1], 1 }

</bundles_post_ra>
